<compile_context>
chip_gen: v6e
topology: v6e:2x2x1
jax: 0.10.0
libtpu: 0.0.40
codegen_flags: <defaults>
</compile_context>

<pallas_src>
import functools

import jax
import jax.numpy as jnp
from jax.experimental import pallas as pl
from jax.experimental.pallas import tpu as pltpu

LANE = 128
_BN_EPS = 1e-5


def _round_up(x, m):
    return (x + m - 1) // m * m


def _vmem_capacity_bytes():
    """Per-core VMEM capacity (v5e/v6e: 128 MiB, v7x: 64 MiB); safe fallback."""
    try:
        info = pltpu.get_tpu_info()
        for name in ("vmem_capacity_bytes", "vmem_bytes", "vmem_size_bytes"):
            v = getattr(info, name, None)
            if isinstance(v, (int, float)) and v > 0:
                return int(v)
    except Exception:
        pass
    return 64 * 1024 * 1024


def _pick_tile_rows(h, w, ws_fn, budget):
    """Largest divisor of H whose estimated working set fits `budget`, soft-capped so
    a tile's matmul M-dim (th * W) stays around a few thousand rows."""
    divs = [d for d in range(1, h + 1) if h % d == 0]
    fit = [d for d in divs if ws_fn(d) <= budget] or [1]
    capped = [d for d in fit if d * w <= 4096]
    # TODO(synk): support masked boundary tiles so awkward/prime H cannot force tiny tiles.
    return max(capped) if capped else min(fit)


def _mosaic_params(ws_bytes, cap, semantics):
    vmem_limit = int(min(cap * 0.9, max(ws_bytes * 1.5, 32 * 1024 * 1024)))
    return pltpu.CompilerParams(dimension_semantics=semantics,
                                vmem_limit_bytes=vmem_limit)


# --------------------------------------------------------------------------- #
# Kernel A: halo-window 3x3 conv with the *previous* layer's BN affine fused   #
# in, plus per-tile BN partial stats for this layer's BN.                       #
# --------------------------------------------------------------------------- #
def _conv3x3_bn_halo_kernel(x_hbm, w_ref, scale_ref, shift_ref, y_ref, stats_ref,
                            halo, sems, *, th, out_w):
    b = pl.program_id(0)
    i = pl.program_id(1)
    last = pl.num_programs(1) - 1
    row0 = i * th
    cin = halo.shape[-1]
    cout = y_ref.shape[-1]

    # ---- single read of the activation: manual DMA of the (th+2)-row halo window ----
    main = pltpu.make_async_copy(x_hbm.at[b, pl.ds(row0, th)],
                                 halo.at[pl.ds(1, th)], sems.at[0])
    main.start()

    @pl.when(i > 0)
    def _():
        pltpu.make_async_copy(x_hbm.at[b, pl.ds(row0 - 1, 1)],
                              halo.at[pl.ds(0, 1)], sems.at[1]).start()

    @pl.when(i < last)
    def _():
        pltpu.make_async_copy(x_hbm.at[b, pl.ds(row0 + th, 1)],
                              halo.at[pl.ds(th + 1, 1)], sems.at[2]).start()

    main.wait()

    @pl.when(i > 0)
    def _():
        pltpu.make_async_copy(x_hbm.at[b, pl.ds(row0 - 1, 1)],
                              halo.at[pl.ds(0, 1)], sems.at[1]).wait()

    @pl.when(i < last)
    def _():
        pltpu.make_async_copy(x_hbm.at[b, pl.ds(row0 + th, 1)],
                              halo.at[pl.ds(th + 1, 1)], sems.at[2]).wait()

    # ---- previous layer's BN affine (identity for the raw input layer), then the
    #      conv zero-padding: image-boundary halo rows are zeroed, W borders are
    #      added as zero columns in-register. ----
    x = halo[...].astype(jnp.float32) * scale_ref[...] + shift_ref[...]
    rows = jax.lax.broadcasted_iota(jnp.int32, x.shape, 0)
    pad_row = ((i == 0) & (rows == 0)) | ((i == last) & (rows == th + 1))
    x = jnp.where(pad_row, 0.0, x).astype(jnp.bfloat16)
    zcol = jnp.zeros((th + 2, 1, cin), jnp.bfloat16)
    x = jnp.concatenate([zcol, x, zcol], axis=1)              # (th+2, W+2, cin)

    # ---- 9 shifted MXU matmuls, one contiguous f32 accumulation chain ----
    acc = jnp.zeros((th * out_w, cout), jnp.float32)
    for kh in range(3):
        xk = x[kh:kh + th]                                    # (th, W+2, cin)
        for kw in range(3):
            xs = xk[:, kw:kw + out_w, :].reshape(th * out_w, cin)
            acc = acc + jnp.dot(xs, w_ref[kh, kw],
                                preferred_element_type=jnp.float32)

    # pre-BN conv output in bf16 (next kernel applies this layer's BN affine)
    y_ref[...] = acc.reshape(1, th, out_w, cout).astype(y_ref.dtype)
    ps = jnp.sum(acc, axis=0, keepdims=True)                  # (1, cout)
    pq = jnp.sum(acc * acc, axis=0, keepdims=True)            # (1, cout)
    stats_ref[...] = jnp.concatenate([ps, pq], axis=0).reshape(1, 1, 2, cout)


def _conv3x3_halo(x, wk, scale, shift):
    """x: (N, H, W, Cin_p) bf16 pre-affine activation; wk: (3,3,Cin_p,Cout_p) bf16;
    scale/shift: (Cin_p,) f32 affine applied to x in-kernel.
    Returns pre-BN y (N, H, W, Cout_p) bf16 and stats (N, G, 2, Cout_p) f32."""
    n, h, w, cin = x.shape
    cout = wk.shape[-1]
    cap = _vmem_capacity_bytes()

    def ws(th):
        halo_buf = (th + 2) * w * cin * 2
        x_tmp = (th + 2) * (w + 2) * cin * (4 + 2)            # f32 affine temp + padded bf16
        weights = 9 * cin * cout * 2
        acc = 2 * th * w * cout * 4                           # f32 acc (+ spill slack)
        y_out = 2 * th * w * cout * 2                         # double-buffered output block
        return halo_buf + x_tmp + weights + acc + y_out

    th = _pick_tile_rows(h, w, ws, cap // 2)
    g = h // th

    flops = 2 * n * h * w * 9 * cin * cout
    bytes_accessed = (n * h * w * cin * 2 + 9 * cin * cout * 2
                      + n * h * w * cout * 2 + n * g * 2 * cout * 4)

    y, stats = pl.pallas_call(
        functools.partial(_conv3x3_bn_halo_kernel, th=th, out_w=w),
        grid=(n, g),
        in_specs=[pl.BlockSpec(memory_space=pl.ANY),
                  pl.BlockSpec((3, 3, cin, cout), lambda b, i: (0, 0, 0, 0)),
                  pl.BlockSpec((1, 1, cin), lambda b, i: (0, 0, 0)),
                  pl.BlockSpec((1, 1, cin), lambda b, i: (0, 0, 0))],
        out_specs=[pl.BlockSpec((1, th, w, cout), lambda b, i: (b, i, 0, 0)),
                   pl.BlockSpec((1, 1, 2, cout), lambda b, i: (b, i, 0, 0))],
        out_shape=[jax.ShapeDtypeStruct((n, h, w, cout), jnp.bfloat16),
                   jax.ShapeDtypeStruct((n, g, 2, cout), jnp.float32)],
        scratch_shapes=[pltpu.VMEM((th + 2, w, cin), jnp.bfloat16),
                        pltpu.SemaphoreType.DMA((3,))],
        compiler_params=_mosaic_params(ws(th), cap, ("parallel", "arbitrary")),
        cost_estimate=pl.CostEstimate(flops=flops, transcendentals=0,
                                      bytes_accessed=bytes_accessed),
    )(x, wk, scale.reshape(1, 1, cin), shift.reshape(1, 1, cin))
    return y, stats


# --------------------------------------------------------------------------- #
# Kernel B: single-dot im2col conv for the stem layer (tiny real Cin).         #
# --------------------------------------------------------------------------- #
def _matmul_stats_kernel(p_ref, w_ref, y_ref, stats_ref):
    _, th, w, k = p_ref.shape
    cout = y_ref.shape[-1]
    acc = jnp.dot(p_ref[...].reshape(th * w, k), w_ref[...],
                  preferred_element_type=jnp.float32)
    y_ref[...] = acc.reshape(1, th, w, cout).astype(y_ref.dtype)
    ps = jnp.sum(acc, axis=0, keepdims=True)
    pq = jnp.sum(acc * acc, axis=0, keepdims=True)
    stats_ref[...] = jnp.concatenate([ps, pq], axis=0).reshape(1, 1, 2, cout)


def _conv3x3_im2col(x, w_hwio, cout_p):
    """x: (N, H, W, Cin) f32 (already ReLU'd); single-dot conv with K = 9*Cin padded
    to one lane group.  Returns pre-BN y (N, H, W, Cout_p) bf16, stats (N,G,2,Cout_p)."""
    n, h, w, cin = x.shape
    cout = w_hwio.shape[-1]
    k = 9 * cin
    kp = _round_up(k, LANE)
    cap = _vmem_capacity_bytes()

    xp = jnp.pad(x, ((0, 0), (1, 1), (1, 1), (0, 0)))
    taps = [xp[:, dh:dh + h, dw:dw + w, :] for dh in range(3) for dw in range(3)]
    pat = jnp.concatenate(taps, axis=-1)
    pat = jnp.pad(pat, ((0, 0), (0, 0), (0, 0), (0, kp - k))).astype(jnp.bfloat16)
    wf = jnp.pad(w_hwio.reshape(k, cout).astype(jnp.float32),
                 ((0, kp - k), (0, cout_p - cout))).astype(jnp.bfloat16)

    def ws(th):
        return (2 * th * w * kp * 2 + kp * cout_p * 2
                + 2 * th * w * cout_p * 4 + 2 * th * w * cout_p * 2)

    th = _pick_tile_rows(h, w, ws, cap // 2)
    g = h // th

    flops = 2 * n * h * w * kp * cout_p
    bytes_accessed = (n * h * w * (kp + cout_p) * 2 + kp * cout_p * 2
                      + n * g * 2 * cout_p * 4)

    y, stats = pl.pallas_call(
        _matmul_stats_kernel,
        grid=(n, g),
        in_specs=[pl.BlockSpec((1, th, w, kp), lambda b, i: (b, i, 0, 0)),
                  pl.BlockSpec((kp, cout_p), lambda b, i: (0, 0))],
        out_specs=[pl.BlockSpec((1, th, w, cout_p), lambda b, i: (b, i, 0, 0)),
                   pl.BlockSpec((1, 1, 2, cout_p), lambda b, i: (b, i, 0, 0))],
        out_shape=[jax.ShapeDtypeStruct((n, h, w, cout_p), jnp.bfloat16),
                   jax.ShapeDtypeStruct((n, g, 2, cout_p), jnp.float32)],
        compiler_params=_mosaic_params(ws(th), cap, ("parallel", "arbitrary")),
        cost_estimate=pl.CostEstimate(flops=flops, transcendentals=0,
                                      bytes_accessed=bytes_accessed),
    )(pat, wf)
    return y, stats


# --------------------------------------------------------------------------- #
# Kernel C: final BN affine (f32 output, channel padding dropped in-kernel).   #
# --------------------------------------------------------------------------- #
def _bn_affine_kernel(y_ref, scale_ref, shift_ref, o_ref):
    a = y_ref[...].astype(jnp.float32) * scale_ref[...] + shift_ref[...]
    o_ref[...] = a[..., : o_ref.shape[-1]].astype(o_ref.dtype)


def _bn_apply(y, scale, shift, cout_real):
    n, h, w, c = y.shape
    cap = _vmem_capacity_bytes()

    def ws(th):
        return th * w * (2 * c * 2 + c * 4 + 2 * cout_real * 4)

    th = _pick_tile_rows(h, w, ws, cap // 2)
    g = h // th

    out = pl.pallas_call(
        _bn_affine_kernel,
        grid=(n, g),
        in_specs=[pl.BlockSpec((1, th, w, c), lambda b, i: (b, i, 0, 0)),
                  pl.BlockSpec((1, 1, 1, c), lambda b, i: (0, 0, 0, 0)),
                  pl.BlockSpec((1, 1, 1, c), lambda b, i: (0, 0, 0, 0))],
        out_specs=pl.BlockSpec((1, th, w, cout_real), lambda b, i: (b, i, 0, 0)),
        out_shape=jax.ShapeDtypeStruct((n, h, w, cout_real), jnp.float32),
        compiler_params=_mosaic_params(ws(th), cap, ("parallel", "parallel")),
        cost_estimate=pl.CostEstimate(flops=2 * n * h * w * c, transcendentals=0,
                                      bytes_accessed=n * h * w * (c * 2 + cout_real * 4)),
    )(y, scale.reshape(1, 1, 1, c), shift.reshape(1, 1, 1, c))
    return out


# --------------------------------------------------------------------------- #
# BN stats finalize (tiny, plain JAX) + parameter packing                       #
# --------------------------------------------------------------------------- #
def _bn_fold(stats, gamma, beta, c_p, m_total):
    """Fold streamed per-tile sums into per-channel scale/shift (training-mode BN)."""
    tot = jnp.sum(stats.astype(jnp.float32), axis=(0, 1))     # (2, c_p)
    mean = tot[0] / m_total
    var = jnp.maximum(tot[1] / m_total - mean * mean, 0.0)    # biased variance
    g = _pack_vec(gamma, c_p)
    b = _pack_vec(beta, c_p)
    scale = g * jax.lax.rsqrt(var + _BN_EPS)
    shift = b - mean * scale
    return scale, shift


def _pack_w(w, cin_p, cout_p):
    _, _, cin, cout = w.shape
    wp = jnp.zeros((3, 3, cin_p, cout_p), jnp.float32).at[:, :, :cin, :cout].set(w)
    return wp.astype(jnp.bfloat16)


def _pack_vec(v, c_p):
    return jnp.zeros((c_p,), jnp.float32).at[: v.shape[0]].set(v)


def init_vgg_block_params(key, in_channels, middle_channels, out_channels):
    """Deterministic synthetic parameters (PyTorch-equivalent shapes, HWIO conv).

    Conv biases are omitted: with training-mode BatchNorm directly after each conv,
    mean subtraction cancels any per-channel constant bias exactly."""
    k1, k2, k3, k4, k5, k6 = jax.random.split(key, 6)
    w1 = 0.1 * jax.random.normal(k1, (3, 3, in_channels, middle_channels), jnp.float32)
    g1 = 1.0 + 0.1 * jax.random.normal(k2, (middle_channels,), jnp.float32)
    be1 = 0.1 * jax.random.normal(k3, (middle_channels,), jnp.float32)
    w2 = 0.1 * jax.random.normal(k4, (3, 3, middle_channels, out_channels), jnp.float32)
    g2 = 1.0 + 0.1 * jax.random.normal(k5, (out_channels,), jnp.float32)
    be2 = 0.1 * jax.random.normal(k6, (out_channels,), jnp.float32)
    return {"w1": w1, "g1": g1, "be1": be1, "w2": w2, "g2": g2, "be2": be2}


# --------------------------------------------------------------------------- #
# Forward: ReLU -> Conv1 -> BN1 -> Conv2 -> BN2 (ReLU only on the input).      #
# --------------------------------------------------------------------------- #
def vgg_block_forward(x_nchw, params):
    n, cin, h, w = x_nchw.shape
    cmid = params["w1"].shape[-1]
    cout = params["w2"].shape[-1]
    cin_p, cmid_p, cout_p = (_round_up(c, LANE) for c in (cin, cmid, cout))
    m_total = n * h * w

    # Single ReLU on the block input (nn.Sequential ordering), then NHWC.
    x = jnp.maximum(x_nchw.astype(jnp.float32), 0.0)
    x = jnp.transpose(x, (0, 2, 3, 1))

    # ----- layer 1: conv1 + streamed BN1 stats -----
    if 9 * cin <= LANE:
        # VGG-stem path: one im2col dot instead of 9 taps each padded Cin -> 128.
        y1, s1 = _conv3x3_im2col(x, params["w1"], cmid_p)
    else:
        x1 = jnp.pad(x, ((0, 0), (0, 0), (0, 0), (0, cin_p - cin))).astype(jnp.bfloat16)
        y1, s1 = _conv3x3_halo(x1, _pack_w(params["w1"], cin_p, cmid_p),
                               jnp.ones((cin_p,), jnp.float32),
                               jnp.zeros((cin_p,), jnp.float32))
    scale1, shift1 = _bn_fold(s1, params["g1"], params["be1"], cmid_p, m_total)

    # ----- layer 2: BN1 affine fused into conv2's halo path, + streamed BN2 stats -----
    y2, s2 = _conv3x3_halo(y1, _pack_w(params["w2"], cmid_p, cout_p), scale1, shift1)
    scale2, shift2 = _bn_fold(s2, params["g2"], params["be2"], cout_p, m_total)

    # ----- BN2 apply, channel unpad folded into the kernel -----
    out = _bn_apply(y2, scale2, shift2, cout)                 # (N, H, W, cout) f32
    # TODO(synk): fold this NHWC->NCHW transpose into the last kernel's out BlockSpec.
    return jnp.transpose(out, (0, 3, 1, 2))


if __name__ == "__main__":
    key = jax.random.PRNGKey(0)
    kx, kp = jax.random.split(key)

    N, Cin, Cmid, Cout, H, W = 2, 4, 8, 8, 16, 16
    x = jax.random.normal(kx, (N, Cin, H, W), jnp.float32)
    params = init_vgg_block_params(kp, Cin, Cmid, Cout)

    fwd = jax.jit(vgg_block_forward)
    out = jax.block_until_ready(fwd(x, params))

    assert out.shape == (N, Cout, H, W)
    assert bool(jnp.all(jnp.isfinite(out)))
    print("KERNEL_OK")
</pallas_src>

<mosaic_0001>
module attributes {stable_mosaic.version = 11 : i64} {
  func.func @_matmul_stats_kernel(%arg0: i32, %arg1: i32, %arg2: memref<1x16x16x128xbf16, #tpu.memory_space<vmem>>, %arg3: memref<128x128xbf16, #tpu.memory_space<vmem>>, %arg4: memref<1x16x16x128xbf16, #tpu.memory_space<vmem>>, %arg5: memref<1x1x2x128xf32, #tpu.memory_space<vmem>>) attributes {dimension_semantics = [#tpu.dimension_semantics<parallel>, #tpu.dimension_semantics<arbitrary>], iteration_bounds = array<i64: 2, 1>, scalar_prefetch = 0 : i64, scratch_operands = 0 : i64, tpu.core_type = #tpu.core_type<tc>, window_params = [{transform_indices = @transform_0, window_bounds = array<i64: 1, 16, 16, 128>}, {pipeline_mode = #tpu.pipeline_mode<synchronous>, transform_indices = @transform_1, window_bounds = array<i64: 128, 128>}, {transform_indices = @transform_2, window_bounds = array<i64: 1, 16, 16, 128>}, {transform_indices = @transform_3, window_bounds = array<i64: 1, 1, 2, 128>}]} {
    %c0 = arith.constant 0 : index
    %c0_0 = arith.constant 0 : index
    %c0_1 = arith.constant 0 : index
    %c0_2 = arith.constant 0 : index
    %0 = vector.load %arg2[%c0, %c0_0, %c0_1, %c0_2] : memref<1x16x16x128xbf16, #tpu.memory_space<vmem>>, vector<1x16x16x128xbf16>
    %1 = vector.shape_cast %0 : vector<1x16x16x128xbf16> to vector<256x128xbf16>
    %c0_3 = arith.constant 0 : index
    %c0_4 = arith.constant 0 : index
    %2 = vector.load %arg3[%c0_3, %c0_4] : memref<128x128xbf16, #tpu.memory_space<vmem>>, vector<128x128xbf16>
    %cst = arith.constant dense<0.000000e+00> : vector<256x128xf32>
    %3 = tpu.matmul %1, %2, %cst {dimension_numbers = #tpu.dot_dimension_numbers<[1], [0], [0], [1], [0, 0, 1, 1], [], []>} : vector<256x128xbf16>, vector<128x128xbf16>, vector<256x128xf32> -> vector<256x128xf32>
    %4 = vector.shape_cast %3 : vector<256x128xf32> to vector<1x16x16x128xf32>
    %5 = arith.truncf %4 : vector<1x16x16x128xf32> to vector<1x16x16x128xbf16>
    %c0_5 = arith.constant 0 : index
    %c0_6 = arith.constant 0 : index
    %c0_7 = arith.constant 0 : index
    %c0_8 = arith.constant 0 : index
    %6 = vector.load %arg4[%c0_5, %c0_6, %c0_7, %c0_8] : memref<1x16x16x128xbf16, #tpu.memory_space<vmem>>, vector<1x16x16x128xbf16>
    tpu.vector_store %arg4[%c0_5, %c0_6, %c0_7, %c0_8], %5 {strides = array<i32>} : memref<1x16x16x128xbf16, #tpu.memory_space<vmem>>, vector<1x16x16x128xbf16>,
    %cst_9 = arith.constant dense<0.000000e+00> : vector<128xf32>
    %7 = vector.multi_reduction <add>, %3, %cst_9 [0] : vector<256x128xf32> to vector<128xf32>
    %8 = vector.shape_cast %7 : vector<128xf32> to vector<1x128xf32>
    %9 = arith.mulf %3, %3 : vector<256x128xf32>
    %cst_10 = arith.constant dense<0.000000e+00> : vector<128xf32>
    %10 = vector.multi_reduction <add>, %9, %cst_10 [0] : vector<256x128xf32> to vector<128xf32>
    %11 = vector.shape_cast %10 : vector<128xf32> to vector<1x128xf32>
    %12 = tpu.concatenate %8, %11 in 0 : vector<1x128xf32>, vector<1x128xf32> -> vector<2x128xf32>
    %13 = vector.shape_cast %12 : vector<2x128xf32> to vector<1x1x2x128xf32>
    %c0_11 = arith.constant 0 : index
    %c0_12 = arith.constant 0 : index
    %c0_13 = arith.constant 0 : index
    %c0_14 = arith.constant 0 : index
    %14 = vector.load %arg5[%c0_11, %c0_12, %c0_13, %c0_14] : memref<1x1x2x128xf32, #tpu.memory_space<vmem>>, vector<1x1x2x128xf32>
    tpu.vector_store %arg5[%c0_11, %c0_12, %c0_13, %c0_14], %13 {strides = array<i32>} : memref<1x1x2x128xf32, #tpu.memory_space<vmem>>, vector<1x1x2x128xf32>,
    return
  }
  func.func @transform_0(%arg0: i32, %arg1: i32) -> (i32, i32, i32, i32) {
    %c0_i32 = arith.constant 0 : i32
    %c0_i32_0 = arith.constant 0 : i32
    %c0_i32_1 = arith.constant 0 : i32
    return %arg0, %arg1, %c0_i32, %c0_i32_0 : i32, i32, i32, i32
  }
  func.func @transform_1(%arg0: i32, %arg1: i32) -> (i32, i32) {
    %c0_i32 = arith.constant 0 : i32
    %c0_i32_0 = arith.constant 0 : i32
    %c0_i32_1 = arith.constant 0 : i32
    return %c0_i32, %c0_i32_0 : i32, i32
  }
  func.func @transform_2(%arg0: i32, %arg1: i32) -> (i32, i32, i32, i32) {
    %c0_i32 = arith.constant 0 : i32
    %c0_i32_0 = arith.constant 0 : i32
    %c0_i32_1 = arith.constant 0 : i32
    return %arg0, %arg1, %c0_i32, %c0_i32_0 : i32, i32, i32, i32
  }
  func.func @transform_3(%arg0: i32, %arg1: i32) -> (i32, i32, i32, i32) {
    %c0_i32 = arith.constant 0 : i32
    %c0_i32_0 = arith.constant 0 : i32
    %c0_i32_1 = arith.constant 0 : i32
    return %arg0, %arg1, %c0_i32, %c0_i32_0 : i32, i32, i32, i32
  }
}

module attributes {stable_mosaic.version = 11 : i64} {
  func.func @_conv3x3_bn_halo_kernel(%arg0: i32, %arg1: i32, %arg2: memref<2x16x16x128xbf16, #tpu.memory_space<any>>, %arg3: memref<3x3x128x128xbf16, #tpu.memory_space<vmem>>, %arg4: memref<1x1x128xf32, #tpu.memory_space<vmem>>, %arg5: memref<1x1x128xf32, #tpu.memory_space<vmem>>, %arg6: memref<1x16x16x128xbf16, #tpu.memory_space<vmem>>, %arg7: memref<1x1x2x128xf32, #tpu.memory_space<vmem>>, %arg8: memref<18x16x128xbf16, #tpu.memory_space<vmem>>, %arg9: memref<3x!tpu.dma_semaphore, #tpu.memory_space<semaphore_mem>>) attributes {dimension_semantics = [#tpu.dimension_semantics<parallel>, #tpu.dimension_semantics<arbitrary>], iteration_bounds = array<i64: 2, 1>, scalar_prefetch = 0 : i64, scratch_operands = 2 : i64, tpu.core_type = #tpu.core_type<tc>, window_params = [{}, {pipeline_mode = #tpu.pipeline_mode<synchronous>, transform_indices = @transform_1, window_bounds = array<i64: 3, 3, 128, 128>}, {pipeline_mode = #tpu.pipeline_mode<synchronous>, transform_indices = @transform_2, window_bounds = array<i64: 1, 1, 128>}, {pipeline_mode = #tpu.pipeline_mode<synchronous>, transform_indices = @transform_3, window_bounds = array<i64: 1, 1, 128>}, {transform_indices = @transform_4, window_bounds = array<i64: 1, 16, 16, 128>}, {transform_indices = @transform_5, window_bounds = array<i64: 1, 1, 2, 128>}]} {
    %c16_i32 = arith.constant 16 : i32
    %0 = arith.muli %arg1, %c16_i32 : i32
    %c0_i32 = arith.constant 0 : i32
    %c0_i32_0 = arith.constant 0 : i32
    %c0_i32_1 = arith.constant 0 : i32
    %1 = tpu.memref_slice %arg2[%arg0, %0, %c0_i32_0, %c0_i32_1] : memref<2x16x16x128xbf16, #tpu.memory_space<any>> -> memref<1x16x16x128xbf16, #tpu.memory_space<any>>
    %2 = tpu.memref_squeeze %1 : memref<1x16x16x128xbf16, #tpu.memory_space<any>> -> memref<16x16x128xbf16, #tpu.memory_space<any>>
    %c1_i32 = arith.constant 1 : i32
    %c0_i32_2 = arith.constant 0 : i32
    %c0_i32_3 = arith.constant 0 : i32
    %3 = tpu.memref_slice %arg8[%c1_i32, %c0_i32_2, %c0_i32_3] : memref<18x16x128xbf16, #tpu.memory_space<vmem>> -> memref<16x16x128xbf16, #tpu.memory_space<vmem>>
    %4 = tpu.memref_slice %arg9[%c0_i32] : memref<3x!tpu.dma_semaphore, #tpu.memory_space<semaphore_mem>> -> memref<1x!tpu.dma_semaphore, #tpu.memory_space<semaphore_mem>>
    %5 = tpu.memref_squeeze %4 : memref<1x!tpu.dma_semaphore, #tpu.memory_space<semaphore_mem>> -> memref<!tpu.dma_semaphore, #tpu.memory_space<semaphore_mem>>
    tpu.enqueue_dma source(%2 : memref<16x16x128xbf16, #tpu.memory_space<any>>) target(%3 : memref<16x16x128xbf16, #tpu.memory_space<vmem>>) target_semaphore(%5 : memref<!tpu.dma_semaphore, #tpu.memory_space<semaphore_mem>>)
    %c0_i32_4 = arith.constant 0 : i32
    %6 = arith.cmpi sgt, %arg1, %c0_i32_4 : i32
    %7 = arith.extui %6 : i1 to i32
    %c0_i32_5 = arith.constant 0 : i32
    %8 = arith.cmpi ne, %7, %c0_i32_5 : i32
    scf.if %8 {
      %c1_i32_84 = arith.constant 1 : i32
      %117 = arith.subi %0, %c1_i32_84 : i32
      %c1_i32_85 = arith.constant 1 : i32
      %c0_i32_86 = arith.constant 0 : i32
      %c0_i32_87 = arith.constant 0 : i32
      %118 = tpu.memref_slice %arg2[%arg0, %117, %c0_i32_86, %c0_i32_87] : memref<2x16x16x128xbf16, #tpu.memory_space<any>> -> memref<1x1x16x128xbf16, #tpu.memory_space<any>>
      %119 = tpu.memref_squeeze %118 : memref<1x1x16x128xbf16, #tpu.memory_space<any>> -> memref<1x16x128xbf16, #tpu.memory_space<any>>
      %c0_i32_88 = arith.constant 0 : i32
      %c0_i32_89 = arith.constant 0 : i32
      %c0_i32_90 = arith.constant 0 : i32
      %120 = tpu.memref_slice %arg8[%c0_i32_88, %c0_i32_89, %c0_i32_90] : memref<18x16x128xbf16, #tpu.memory_space<vmem>> -> memref<1x16x128xbf16, #tpu.memory_space<vmem>>
      %121 = tpu.memref_slice %arg9[%c1_i32_85] : memref<3x!tpu.dma_semaphore, #tpu.memory_space<semaphore_mem>> -> memref<1x!tpu.dma_semaphore, #tpu.memory_space<semaphore_mem>>
      %122 = tpu.memref_squeeze %121 : memref<1x!tpu.dma_semaphore, #tpu.memory_space<semaphore_mem>> -> memref<!tpu.dma_semaphore, #tpu.memory_space<semaphore_mem>>
      tpu.enqueue_dma source(%119 : memref<1x16x128xbf16, #tpu.memory_space<any>>) target(%120 : memref<1x16x128xbf16, #tpu.memory_space<vmem>>) target_semaphore(%122 : memref<!tpu.dma_semaphore, #tpu.memory_space<semaphore_mem>>)
    } else {
    }
    %c0_i32_6 = arith.constant 0 : i32
    %9 = arith.cmpi slt, %arg1, %c0_i32_6 : i32
    %10 = arith.extui %9 : i1 to i32
    %c0_i32_7 = arith.constant 0 : i32
    %11 = arith.cmpi ne, %10, %c0_i32_7 : i32
    scf.if %11 {
      %c16_i32_84 = arith.constant 16 : i32
      %117 = arith.addi %0, %c16_i32_84 : i32
      %c2_i32 = arith.constant 2 : i32
      %c0_i32_85 = arith.constant 0 : i32
      %c0_i32_86 = arith.constant 0 : i32
      %118 = tpu.memref_slice %arg2[%arg0, %117, %c0_i32_85, %c0_i32_86] : memref<2x16x16x128xbf16, #tpu.memory_space<any>> -> memref<1x1x16x128xbf16, #tpu.memory_space<any>>
      %119 = tpu.memref_squeeze %118 : memref<1x1x16x128xbf16, #tpu.memory_space<any>> -> memref<1x16x128xbf16, #tpu.memory_space<any>>
      %c17_i32_87 = arith.constant 17 : i32
      %c0_i32_88 = arith.constant 0 : i32
      %c0_i32_89 = arith.constant 0 : i32
      %120 = tpu.memref_slice %arg8[%c17_i32_87, %c0_i32_88, %c0_i32_89] : memref<18x16x128xbf16, #tpu.memory_space<vmem>> -> memref<1x16x128xbf16, #tpu.memory_space<vmem>>
      %121 = tpu.memref_slice %arg9[%c2_i32] : memref<3x!tpu.dma_semaphore, #tpu.memory_space<semaphore_mem>> -> memref<1x!tpu.dma_semaphore, #tpu.memory_space<semaphore_mem>>
      %122 = tpu.memref_squeeze %121 : memref<1x!tpu.dma_semaphore, #tpu.memory_space<semaphore_mem>> -> memref<!tpu.dma_semaphore, #tpu.memory_space<semaphore_mem>>
      tpu.enqueue_dma source(%119 : memref<1x16x128xbf16, #tpu.memory_space<any>>) target(%120 : memref<1x16x128xbf16, #tpu.memory_space<vmem>>) target_semaphore(%122 : memref<!tpu.dma_semaphore, #tpu.memory_space<semaphore_mem>>)
    } else {
    }
    %c0_i32_8 = arith.constant 0 : i32
    %c0_i32_9 = arith.constant 0 : i32
    %c0_i32_10 = arith.constant 0 : i32
    %12 = tpu.memref_slice %arg2[%arg0, %0, %c0_i32_9, %c0_i32_10] : memref<2x16x16x128xbf16, #tpu.memory_space<any>> -> memref<1x16x16x128xbf16, #tpu.memory_space<any>>
    %13 = tpu.memref_squeeze %12 : memref<1x16x16x128xbf16, #tpu.memory_space<any>> -> memref<16x16x128xbf16, #tpu.memory_space<any>>
    %c1_i32_11 = arith.constant 1 : i32
    %c0_i32_12 = arith.constant 0 : i32
    %c0_i32_13 = arith.constant 0 : i32
    %14 = tpu.memref_slice %arg8[%c1_i32_11, %c0_i32_12, %c0_i32_13] : memref<18x16x128xbf16, #tpu.memory_space<vmem>> -> memref<16x16x128xbf16, #tpu.memory_space<vmem>>
    %15 = tpu.memref_slice %arg9[%c0_i32_8] : memref<3x!tpu.dma_semaphore, #tpu.memory_space<semaphore_mem>> -> memref<1x!tpu.dma_semaphore, #tpu.memory_space<semaphore_mem>>
    %16 = tpu.memref_squeeze %15 : memref<1x!tpu.dma_semaphore, #tpu.memory_space<semaphore_mem>> -> memref<!tpu.dma_semaphore, #tpu.memory_space<semaphore_mem>>
    tpu.wait_dma2 semaphore(%16 : memref<!tpu.dma_semaphore, #tpu.memory_space<semaphore_mem>>) src(%13 : memref<16x16x128xbf16, #tpu.memory_space<any>>) dst(%14 : memref<16x16x128xbf16, #tpu.memory_space<vmem>>)
    %c0_i32_14 = arith.constant 0 : i32
    %17 = arith.cmpi sgt, %arg1, %c0_i32_14 : i32
    %18 = arith.extui %17 : i1 to i32
    %c0_i32_15 = arith.constant 0 : i32
    %19 = arith.cmpi ne, %18, %c0_i32_15 : i32
    scf.if %19 {
      %c1_i32_84 = arith.constant 1 : i32
      %117 = arith.subi %0, %c1_i32_84 : i32
      %c1_i32_85 = arith.constant 1 : i32
      %c0_i32_86 = arith.constant 0 : i32
      %c0_i32_87 = arith.constant 0 : i32
      %118 = tpu.memref_slice %arg2[%arg0, %117, %c0_i32_86, %c0_i32_87] : memref<2x16x16x128xbf16, #tpu.memory_space<any>> -> memref<1x1x16x128xbf16, #tpu.memory_space<any>>
      %119 = tpu.memref_squeeze %118 : memref<1x1x16x128xbf16, #tpu.memory_space<any>> -> memref<1x16x128xbf16, #tpu.memory_space<any>>
      %c0_i32_88 = arith.constant 0 : i32
      %c0_i32_89 = arith.constant 0 : i32
      %c0_i32_90 = arith.constant 0 : i32
      %120 = tpu.memref_slice %arg8[%c0_i32_88, %c0_i32_89, %c0_i32_90] : memref<18x16x128xbf16, #tpu.memory_space<vmem>> -> memref<1x16x128xbf16, #tpu.memory_space<vmem>>
      %121 = tpu.memref_slice %arg9[%c1_i32_85] : memref<3x!tpu.dma_semaphore, #tpu.memory_space<semaphore_mem>> -> memref<1x!tpu.dma_semaphore, #tpu.memory_space<semaphore_mem>>
      %122 = tpu.memref_squeeze %121 : memref<1x!tpu.dma_semaphore, #tpu.memory_space<semaphore_mem>> -> memref<!tpu.dma_semaphore, #tpu.memory_space<semaphore_mem>>
      tpu.wait_dma2 semaphore(%122 : memref<!tpu.dma_semaphore, #tpu.memory_space<semaphore_mem>>) src(%119 : memref<1x16x128xbf16, #tpu.memory_space<any>>) dst(%120 : memref<1x16x128xbf16, #tpu.memory_space<vmem>>)
    } else {
    }
    %c0_i32_16 = arith.constant 0 : i32
    %20 = arith.cmpi slt, %arg1, %c0_i32_16 : i32
    %21 = arith.extui %20 : i1 to i32
    %c0_i32_17 = arith.constant 0 : i32
    %22 = arith.cmpi ne, %21, %c0_i32_17 : i32
    scf.if %22 {
      %c16_i32_84 = arith.constant 16 : i32
      %117 = arith.addi %0, %c16_i32_84 : i32
      %c2_i32 = arith.constant 2 : i32
      %c0_i32_85 = arith.constant 0 : i32
      %c0_i32_86 = arith.constant 0 : i32
      %118 = tpu.memref_slice %arg2[%arg0, %117, %c0_i32_85, %c0_i32_86] : memref<2x16x16x128xbf16, #tpu.memory_space<any>> -> memref<1x1x16x128xbf16, #tpu.memory_space<any>>
      %119 = tpu.memref_squeeze %118 : memref<1x1x16x128xbf16, #tpu.memory_space<any>> -> memref<1x16x128xbf16, #tpu.memory_space<any>>
      %c17_i32_87 = arith.constant 17 : i32
      %c0_i32_88 = arith.constant 0 : i32
      %c0_i32_89 = arith.constant 0 : i32
      %120 = tpu.memref_slice %arg8[%c17_i32_87, %c0_i32_88, %c0_i32_89] : memref<18x16x128xbf16, #tpu.memory_space<vmem>> -> memref<1x16x128xbf16, #tpu.memory_space<vmem>>
      %121 = tpu.memref_slice %arg9[%c2_i32] : memref<3x!tpu.dma_semaphore, #tpu.memory_space<semaphore_mem>> -> memref<1x!tpu.dma_semaphore, #tpu.memory_space<semaphore_mem>>
      %122 = tpu.memref_squeeze %121 : memref<1x!tpu.dma_semaphore, #tpu.memory_space<semaphore_mem>> -> memref<!tpu.dma_semaphore, #tpu.memory_space<semaphore_mem>>
      tpu.wait_dma2 semaphore(%122 : memref<!tpu.dma_semaphore, #tpu.memory_space<semaphore_mem>>) src(%119 : memref<1x16x128xbf16, #tpu.memory_space<any>>) dst(%120 : memref<1x16x128xbf16, #tpu.memory_space<vmem>>)
    } else {
    }
    %c0 = arith.constant 0 : index
    %c0_18 = arith.constant 0 : index
    %c0_19 = arith.constant 0 : index
    %23 = vector.load %arg8[%c0, %c0_18, %c0_19] : memref<18x16x128xbf16, #tpu.memory_space<vmem>>, vector<18x16x128xbf16>
    %24 = arith.extf %23 : vector<18x16x128xbf16> to vector<18x16x128xf32>
    %c0_20 = arith.constant 0 : index
    %c0_21 = arith.constant 0 : index
    %c0_22 = arith.constant 0 : index
    %25 = vector.load %arg4[%c0_20, %c0_21, %c0_22] : memref<1x1x128xf32, #tpu.memory_space<vmem>>, vector<1x1x128xf32>
    %26 = vector.broadcast %25 : vector<1x1x128xf32> to vector<18x16x128xf32>
    %27 = arith.mulf %24, %26 : vector<18x16x128xf32>
    %c0_23 = arith.constant 0 : index
    %c0_24 = arith.constant 0 : index
    %c0_25 = arith.constant 0 : index
    %28 = vector.load %arg5[%c0_23, %c0_24, %c0_25] : memref<1x1x128xf32, #tpu.memory_space<vmem>>, vector<1x1x128xf32>
    %29 = vector.broadcast %28 : vector<1x1x128xf32> to vector<18x16x128xf32>
    %30 = arith.addf %27, %29 : vector<18x16x128xf32>
    %31 = tpu.iota {dimensions = array<i32: 0>} : vector<18x16x128xi32>
    %c0_i32_26 = arith.constant 0 : i32
    %32 = arith.cmpi eq, %arg1, %c0_i32_26 : i32
    %c0_i32_27 = arith.constant 0 : i32
    %33 = vector.broadcast %c0_i32_27 : i32 to vector<18x16x128xi32>
    %34 = arith.cmpi eq, %31, %33 : vector<18x16x128xi32>
    %35 = vector.broadcast %32 : i1 to vector<18x16x128xi1>
    %36 = arith.andi %35, %34 : vector<18x16x128xi1>
    %c0_i32_28 = arith.constant 0 : i32
    %37 = arith.cmpi eq, %arg1, %c0_i32_28 : i32
    %c17_i32 = arith.constant 17 : i32
    %38 = vector.broadcast %c17_i32 : i32 to vector<18x16x128xi32>
    %39 = arith.cmpi eq, %31, %38 : vector<18x16x128xi32>
    %40 = vector.broadcast %37 : i1 to vector<18x16x128xi1>
    %41 = arith.andi %40, %39 : vector<18x16x128xi1>
    %42 = arith.ori %36, %41 : vector<18x16x128xi1>
    %cst = arith.constant 0.000000e+00 : f32
    %43 = vector.broadcast %cst : f32 to vector<18x16x128xf32>
    %44 = arith.select %42, %43, %30 : vector<18x16x128xi1>, vector<18x16x128xf32>
    %45 = arith.truncf %44 : vector<18x16x128xf32> to vector<18x16x128xbf16>
    %cst_29 = arith.constant 0.000000e+00 : bf16
    %46 = vector.broadcast %cst_29 : bf16 to vector<18x1x128xbf16>
    %47 = tpu.concatenate %46, %45, %46 in 1 : vector<18x1x128xbf16>, vector<18x16x128xbf16>, vector<18x1x128xbf16> -> vector<18x18x128xbf16>
    %cst_30 = arith.constant 0.000000e+00 : f32
    %48 = vector.broadcast %cst_30 : f32 to vector<256x128xf32>
    %49 = vector.extract_strided_slice %47 {offsets = [0, 0, 0], sizes = [16, 18, 128], strides = [1, 1, 1]} : vector<18x18x128xbf16> to vector<16x18x128xbf16>
    %50 = vector.extract_strided_slice %49 {offsets = [0, 0, 0], sizes = [16, 16, 128], strides = [1, 1, 1]} : vector<16x18x128xbf16> to vector<16x16x128xbf16>
    %51 = vector.shape_cast %50 : vector<16x16x128xbf16> to vector<256x128xbf16>
    %c0_31 = arith.constant 0 : index
    %c0_32 = arith.constant 0 : index
    %c0_33 = arith.constant 0 : index
    %c0_34 = arith.constant 0 : index
    %52 = vector.load %arg3[%c0_31, %c0_32, %c0_33, %c0_34] : memref<3x3x128x128xbf16, #tpu.memory_space<vmem>>, vector<1x1x128x128xbf16>
    %53 = vector.shape_cast %52 : vector<1x1x128x128xbf16> to vector<128x128xbf16>
    %cst_35 = arith.constant dense<0.000000e+00> : vector<256x128xf32>
    %54 = tpu.matmul %51, %53, %cst_35 {dimension_numbers = #tpu.dot_dimension_numbers<[1], [0], [0], [1], [0, 0, 1, 1], [], []>} : vector<256x128xbf16>, vector<128x128xbf16>, vector<256x128xf32> -> vector<256x128xf32>
    %55 = arith.addf %48, %54 : vector<256x128xf32>
    %56 = vector.extract_strided_slice %49 {offsets = [0, 1, 0], sizes = [16, 16, 128], strides = [1, 1, 1]} : vector<16x18x128xbf16> to vector<16x16x128xbf16>
    %57 = vector.shape_cast %56 : vector<16x16x128xbf16> to vector<256x128xbf16>
    %c0_36 = arith.constant 0 : index
    %c1 = arith.constant 1 : index
    %c0_37 = arith.constant 0 : index
    %c0_38 = arith.constant 0 : index
    %58 = vector.load %arg3[%c0_36, %c1, %c0_37, %c0_38] : memref<3x3x128x128xbf16, #tpu.memory_space<vmem>>, vector<1x1x128x128xbf16>
    %59 = vector.shape_cast %58 : vector<1x1x128x128xbf16> to vector<128x128xbf16>
    %cst_39 = arith.constant dense<0.000000e+00> : vector<256x128xf32>
    %60 = tpu.matmul %57, %59, %cst_39 {dimension_numbers = #tpu.dot_dimension_numbers<[1], [0], [0], [1], [0, 0, 1, 1], [], []>} : vector<256x128xbf16>, vector<128x128xbf16>, vector<256x128xf32> -> vector<256x128xf32>
    %61 = arith.addf %55, %60 : vector<256x128xf32>
    %62 = vector.extract_strided_slice %49 {offsets = [0, 2, 0], sizes = [16, 16, 128], strides = [1, 1, 1]} : vector<16x18x128xbf16> to vector<16x16x128xbf16>
    %63 = vector.shape_cast %62 : vector<16x16x128xbf16> to vector<256x128xbf16>
    %c0_40 = arith.constant 0 : index
    %c2 = arith.constant 2 : index
    %c0_41 = arith.constant 0 : index
    %c0_42 = arith.constant 0 : index
    %64 = vector.load %arg3[%c0_40, %c2, %c0_41, %c0_42] : memref<3x3x128x128xbf16, #tpu.memory_space<vmem>>, vector<1x1x128x128xbf16>
    %65 = vector.shape_cast %64 : vector<1x1x128x128xbf16> to vector<128x128xbf16>
    %cst_43 = arith.constant dense<0.000000e+00> : vector<256x128xf32>
    %66 = tpu.matmul %63, %65, %cst_43 {dimension_numbers = #tpu.dot_dimension_numbers<[1], [0], [0], [1], [0, 0, 1, 1], [], []>} : vector<256x128xbf16>, vector<128x128xbf16>, vector<256x128xf32> -> vector<256x128xf32>
    %67 = arith.addf %61, %66 : vector<256x128xf32>
    %68 = vector.extract_strided_slice %47 {offsets = [1, 0, 0], sizes = [16, 18, 128], strides = [1, 1, 1]} : vector<18x18x128xbf16> to vector<16x18x128xbf16>
    %69 = vector.extract_strided_slice %68 {offsets = [0, 0, 0], sizes = [16, 16, 128], strides = [1, 1, 1]} : vector<16x18x128xbf16> to vector<16x16x128xbf16>
    %70 = vector.shape_cast %69 : vector<16x16x128xbf16> to vector<256x128xbf16>
    %c1_44 = arith.constant 1 : index
    %c0_45 = arith.constant 0 : index
    %c0_46 = arith.constant 0 : index
    %c0_47 = arith.constant 0 : index
    %71 = vector.load %arg3[%c1_44, %c0_45, %c0_46, %c0_47] : memref<3x3x128x128xbf16, #tpu.memory_space<vmem>>, vector<1x1x128x128xbf16>
    %72 = vector.shape_cast %71 : vector<1x1x128x128xbf16> to vector<128x128xbf16>
    %cst_48 = arith.constant dense<0.000000e+00> : vector<256x128xf32>
    %73 = tpu.matmul %70, %72, %cst_48 {dimension_numbers = #tpu.dot_dimension_numbers<[1], [0], [0], [1], [0, 0, 1, 1], [], []>} : vector<256x128xbf16>, vector<128x128xbf16>, vector<256x128xf32> -> vector<256x128xf32>
    %74 = arith.addf %67, %73 : vector<256x128xf32>
    %75 = vector.extract_strided_slice %68 {offsets = [0, 1, 0], sizes = [16, 16, 128], strides = [1, 1, 1]} : vector<16x18x128xbf16> to vector<16x16x128xbf16>
    %76 = vector.shape_cast %75 : vector<16x16x128xbf16> to vector<256x128xbf16>
    %c1_49 = arith.constant 1 : index
    %c1_50 = arith.constant 1 : index
    %c0_51 = arith.constant 0 : index
    %c0_52 = arith.constant 0 : index
    %77 = vector.load %arg3[%c1_49, %c1_50, %c0_51, %c0_52] : memref<3x3x128x128xbf16, #tpu.memory_space<vmem>>, vector<1x1x128x128xbf16>
    %78 = vector.shape_cast %77 : vector<1x1x128x128xbf16> to vector<128x128xbf16>
    %cst_53 = arith.constant dense<0.000000e+00> : vector<256x128xf32>
    %79 = tpu.matmul %76, %78, %cst_53 {dimension_numbers = #tpu.dot_dimension_numbers<[1], [0], [0], [1], [0, 0, 1, 1], [], []>} : vector<256x128xbf16>, vector<128x128xbf16>, vector<256x128xf32> -> vector<256x128xf32>
    %80 = arith.addf %74, %79 : vector<256x128xf32>
    %81 = vector.extract_strided_slice %68 {offsets = [0, 2, 0], sizes = [16, 16, 128], strides = [1, 1, 1]} : vector<16x18x128xbf16> to vector<16x16x128xbf16>
    %82 = vector.shape_cast %81 : vector<16x16x128xbf16> to vector<256x128xbf16>
    %c1_54 = arith.constant 1 : index
    %c2_55 = arith.constant 2 : index
    %c0_56 = arith.constant 0 : index
    %c0_57 = arith.constant 0 : index
    %83 = vector.load %arg3[%c1_54, %c2_55, %c0_56, %c0_57] : memref<3x3x128x128xbf16, #tpu.memory_space<vmem>>, vector<1x1x128x128xbf16>
    %84 = vector.shape_cast %83 : vector<1x1x128x128xbf16> to vector<128x128xbf16>
    %cst_58 = arith.constant dense<0.000000e+00> : vector<256x128xf32>
    %85 = tpu.matmul %82, %84, %cst_58 {dimension_numbers = #tpu.dot_dimension_numbers<[1], [0], [0], [1], [0, 0, 1, 1], [], []>} : vector<256x128xbf16>, vector<128x128xbf16>, vector<256x128xf32> -> vector<256x128xf32>
    %86 = arith.addf %80, %85 : vector<256x128xf32>
    %87 = vector.extract_strided_slice %47 {offsets = [2, 0, 0], sizes = [16, 18, 128], strides = [1, 1, 1]} : vector<18x18x128xbf16> to vector<16x18x128xbf16>
    %88 = vector.extract_strided_slice %87 {offsets = [0, 0, 0], sizes = [16, 16, 128], strides = [1, 1, 1]} : vector<16x18x128xbf16> to vector<16x16x128xbf16>
    %89 = vector.shape_cast %88 : vector<16x16x128xbf16> to vector<256x128xbf16>
    %c2_59 = arith.constant 2 : index
    %c0_60 = arith.constant 0 : index
    %c0_61 = arith.constant 0 : index
    %c0_62 = arith.constant 0 : index
    %90 = vector.load %arg3[%c2_59, %c0_60, %c0_61, %c0_62] : memref<3x3x128x128xbf16, #tpu.memory_space<vmem>>, vector<1x1x128x128xbf16>
    %91 = vector.shape_cast %90 : vector<1x1x128x128xbf16> to vector<128x128xbf16>
    %cst_63 = arith.constant dense<0.000000e+00> : vector<256x128xf32>
    %92 = tpu.matmul %89, %91, %cst_63 {dimension_numbers = #tpu.dot_dimension_numbers<[1], [0], [0], [1], [0, 0, 1, 1], [], []>} : vector<256x128xbf16>, vector<128x128xbf16>, vector<256x128xf32> -> vector<256x128xf32>
    %93 = arith.addf %86, %92 : vector<256x128xf32>
    %94 = vector.extract_strided_slice %87 {offsets = [0, 1, 0], sizes = [16, 16, 128], strides = [1, 1, 1]} : vector<16x18x128xbf16> to vector<16x16x128xbf16>
    %95 = vector.shape_cast %94 : vector<16x16x128xbf16> to vector<256x128xbf16>
    %c2_64 = arith.constant 2 : index
    %c1_65 = arith.constant 1 : index
    %c0_66 = arith.constant 0 : index
    %c0_67 = arith.constant 0 : index
    %96 = vector.load %arg3[%c2_64, %c1_65, %c0_66, %c0_67] : memref<3x3x128x128xbf16, #tpu.memory_space<vmem>>, vector<1x1x128x128xbf16>
    %97 = vector.shape_cast %96 : vector<1x1x128x128xbf16> to vector<128x128xbf16>
    %cst_68 = arith.constant dense<0.000000e+00> : vector<256x128xf32>
    %98 = tpu.matmul %95, %97, %cst_68 {dimension_numbers = #tpu.dot_dimension_numbers<[1], [0], [0], [1], [0, 0, 1, 1], [], []>} : vector<256x128xbf16>, vector<128x128xbf16>, vector<256x128xf32> -> vector<256x128xf32>
    %99 = arith.addf %93, %98 : vector<256x128xf32>
    %100 = vector.extract_strided_slice %87 {offsets = [0, 2, 0], sizes = [16, 16, 128], strides = [1, 1, 1]} : vector<16x18x128xbf16> to vector<16x16x128xbf16>
    %101 = vector.shape_cast %100 : vector<16x16x128xbf16> to vector<256x128xbf16>
    %c2_69 = arith.constant 2 : index
    %c2_70 = arith.constant 2 : index
    %c0_71 = arith.constant 0 : index
    %c0_72 = arith.constant 0 : index
    %102 = vector.load %arg3[%c2_69, %c2_70, %c0_71, %c0_72] : memref<3x3x128x128xbf16, #tpu.memory_space<vmem>>, vector<1x1x128x128xbf16>
    %103 = vector.shape_cast %102 : vector<1x1x128x128xbf16> to vector<128x128xbf16>
    %cst_73 = arith.constant dense<0.000000e+00> : vector<256x128xf32>
    %104 = tpu.matmul %101, %103, %cst_73 {dimension_numbers = #tpu.dot_dimension_numbers<[1], [0], [0], [1], [0, 0, 1, 1], [], []>} : vector<256x128xbf16>, vector<128x128xbf16>, vector<256x128xf32> -> vector<256x128xf32>
    %105 = arith.addf %99, %104 : vector<256x128xf32>
    %106 = vector.shape_cast %105 : vector<256x128xf32> to vector<1x16x16x128xf32>
    %107 = arith.truncf %106 : vector<1x16x16x128xf32> to vector<1x16x16x128xbf16>
    %c0_74 = arith.constant 0 : index
    %c0_75 = arith.constant 0 : index
    %c0_76 = arith.constant 0 : index
    %c0_77 = arith.constant 0 : index
    %108 = vector.load %arg6[%c0_74, %c0_75, %c0_76, %c0_77] : memref<1x16x16x128xbf16, #tpu.memory_space<vmem>>, vector<1x16x16x128xbf16>
    tpu.vector_store %arg6[%c0_74, %c0_75, %c0_76, %c0_77], %107 {strides = array<i32>} : memref<1x16x16x128xbf16, #tpu.memory_space<vmem>>, vector<1x16x16x128xbf16>,
    %cst_78 = arith.constant dense<0.000000e+00> : vector<128xf32>
    %109 = vector.multi_reduction <add>, %105, %cst_78 [0] : vector<256x128xf32> to vector<128xf32>
    %110 = vector.shape_cast %109 : vector<128xf32> to vector<1x128xf32>
    %111 = arith.mulf %105, %105 : vector<256x128xf32>
    %cst_79 = arith.constant dense<0.000000e+00> : vector<128xf32>
    %112 = vector.multi_reduction <add>, %111, %cst_79 [0] : vector<256x128xf32> to vector<128xf32>
    %113 = vector.shape_cast %112 : vector<128xf32> to vector<1x128xf32>
    %114 = tpu.concatenate %110, %113 in 0 : vector<1x128xf32>, vector<1x128xf32> -> vector<2x128xf32>
    %115 = vector.shape_cast %114 : vector<2x128xf32> to vector<1x1x2x128xf32>
    %c0_80 = arith.constant 0 : index
    %c0_81 = arith.constant 0 : index
    %c0_82 = arith.constant 0 : index
    %c0_83 = arith.constant 0 : index
    %116 = vector.load %arg7[%c0_80, %c0_81, %c0_82, %c0_83] : memref<1x1x2x128xf32, #tpu.memory_space<vmem>>, vector<1x1x2x128xf32>
    tpu.vector_store %arg7[%c0_80, %c0_81, %c0_82, %c0_83], %115 {strides = array<i32>} : memref<1x1x2x128xf32, #tpu.memory_space<vmem>>, vector<1x1x2x128xf32>,
    return
  }
  func.func @transform_1(%arg0: i32, %arg1: i32) -> (i32, i32, i32, i32) {
    %c0_i32 = arith.constant 0 : i32
    %c0_i32_0 = arith.constant 0 : i32
    %c0_i32_1 = arith.constant 0 : i32
    %c0_i32_2 = arith.constant 0 : i32
    %c0_i32_3 = arith.constant 0 : i32
    return %c0_i32, %c0_i32_0, %c0_i32_1, %c0_i32_2 : i32, i32, i32, i32
  }
  func.func @transform_2(%arg0: i32, %arg1: i32) -> (i32, i32, i32) {
    %c0_i32 = arith.constant 0 : i32
    %c0_i32_0 = arith.constant 0 : i32
    %c0_i32_1 = arith.constant 0 : i32
    %c0_i32_2 = arith.constant 0 : i32
    return %c0_i32, %c0_i32_0, %c0_i32_1 : i32, i32, i32
  }
  func.func @transform_3(%arg0: i32, %arg1: i32) -> (i32, i32, i32) {
    %c0_i32 = arith.constant 0 : i32
    %c0_i32_0 = arith.constant 0 : i32
    %c0_i32_1 = arith.constant 0 : i32
    %c0_i32_2 = arith.constant 0 : i32
    return %c0_i32, %c0_i32_0, %c0_i32_1 : i32, i32, i32
  }
  func.func @transform_4(%arg0: i32, %arg1: i32) -> (i32, i32, i32, i32) {
    %c0_i32 = arith.constant 0 : i32
    %c0_i32_0 = arith.constant 0 : i32
    %c0_i32_1 = arith.constant 0 : i32
    return %arg0, %arg1, %c0_i32, %c0_i32_0 : i32, i32, i32, i32
  }
  func.func @transform_5(%arg0: i32, %arg1: i32) -> (i32, i32, i32, i32) {
    %c0_i32 = arith.constant 0 : i32
    %c0_i32_0 = arith.constant 0 : i32
    %c0_i32_1 = arith.constant 0 : i32
    return %arg0, %arg1, %c0_i32, %c0_i32_0 : i32, i32, i32, i32
  }
}

module attributes {stable_mosaic.version = 11 : i64} {
  func.func @_bn_affine_kernel(%arg0: i32, %arg1: i32, %arg2: memref<1x16x16x128xbf16, #tpu.memory_space<vmem>>, %arg3: memref<1x1x1x128xf32, #tpu.memory_space<vmem>>, %arg4: memref<1x1x1x128xf32, #tpu.memory_space<vmem>>, %arg5: memref<1x16x16x8xf32, #tpu.memory_space<vmem>>) attributes {dimension_semantics = [#tpu.dimension_semantics<parallel>, #tpu.dimension_semantics<parallel>], iteration_bounds = array<i64: 2, 1>, scalar_prefetch = 0 : i64, scratch_operands = 0 : i64, tpu.core_type = #tpu.core_type<tc>, window_params = [{transform_indices = @transform_0, window_bounds = array<i64: 1, 16, 16, 128>}, {pipeline_mode = #tpu.pipeline_mode<synchronous>, transform_indices = @transform_1, window_bounds = array<i64: 1, 1, 1, 128>}, {pipeline_mode = #tpu.pipeline_mode<synchronous>, transform_indices = @transform_2, window_bounds = array<i64: 1, 1, 1, 128>}, {transform_indices = @transform_3, window_bounds = array<i64: 1, 16, 16, 8>}]} {
    %c0 = arith.constant 0 : index
    %c0_0 = arith.constant 0 : index
    %c0_1 = arith.constant 0 : index
    %c0_2 = arith.constant 0 : index
    %0 = vector.load %arg2[%c0, %c0_0, %c0_1, %c0_2] : memref<1x16x16x128xbf16, #tpu.memory_space<vmem>>, vector<1x16x16x128xbf16>
    %1 = arith.extf %0 : vector<1x16x16x128xbf16> to vector<1x16x16x128xf32>
    %c0_3 = arith.constant 0 : index
    %c0_4 = arith.constant 0 : index
    %c0_5 = arith.constant 0 : index
    %c0_6 = arith.constant 0 : index
    %2 = vector.load %arg3[%c0_3, %c0_4, %c0_5, %c0_6] : memref<1x1x1x128xf32, #tpu.memory_space<vmem>>, vector<1x1x1x128xf32>
    %3 = vector.broadcast %2 : vector<1x1x1x128xf32> to vector<1x16x16x128xf32>
    %4 = arith.mulf %1, %3 : vector<1x16x16x128xf32>
    %c0_7 = arith.constant 0 : index
    %c0_8 = arith.constant 0 : index
    %c0_9 = arith.constant 0 : index
    %c0_10 = arith.constant 0 : index
    %5 = vector.load %arg4[%c0_7, %c0_8, %c0_9, %c0_10] : memref<1x1x1x128xf32, #tpu.memory_space<vmem>>, vector<1x1x1x128xf32>
    %6 = vector.broadcast %5 : vector<1x1x1x128xf32> to vector<1x16x16x128xf32>
    %7 = arith.addf %4, %6 : vector<1x16x16x128xf32>
    %8 = vector.extract_strided_slice %7 {offsets = [0, 0, 0, 0], sizes = [1, 16, 16, 8], strides = [1, 1, 1, 1]} : vector<1x16x16x128xf32> to vector<1x16x16x8xf32>
    %c0_11 = arith.constant 0 : index
    %c0_12 = arith.constant 0 : index
    %c0_13 = arith.constant 0 : index
    %c0_14 = arith.constant 0 : index
    %9 = vector.load %arg5[%c0_11, %c0_12, %c0_13, %c0_14] : memref<1x16x16x8xf32, #tpu.memory_space<vmem>>, vector<1x16x16x8xf32>
    tpu.vector_store %arg5[%c0_11, %c0_12, %c0_13, %c0_14], %8 {strides = array<i32>} : memref<1x16x16x8xf32, #tpu.memory_space<vmem>>, vector<1x16x16x8xf32>,
    return
  }
  func.func @transform_0(%arg0: i32, %arg1: i32) -> (i32, i32, i32, i32) {
    %c0_i32 = arith.constant 0 : i32
    %c0_i32_0 = arith.constant 0 : i32
    %c0_i32_1 = arith.constant 0 : i32
    return %arg0, %arg1, %c0_i32, %c0_i32_0 : i32, i32, i32, i32
  }
  func.func @transform_1(%arg0: i32, %arg1: i32) -> (i32, i32, i32, i32) {
    %c0_i32 = arith.constant 0 : i32
    %c0_i32_0 = arith.constant 0 : i32
    %c0_i32_1 = arith.constant 0 : i32
    %c0_i32_2 = arith.constant 0 : i32
    %c0_i32_3 = arith.constant 0 : i32
    return %c0_i32, %c0_i32_0, %c0_i32_1, %c0_i32_2 : i32, i32, i32, i32
  }
  func.func @transform_2(%arg0: i32, %arg1: i32) -> (i32, i32, i32, i32) {
    %c0_i32 = arith.constant 0 : i32
    %c0_i32_0 = arith.constant 0 : i32
    %c0_i32_1 = arith.constant 0 : i32
    %c0_i32_2 = arith.constant 0 : i32
    %c0_i32_3 = arith.constant 0 : i32
    return %c0_i32, %c0_i32_0, %c0_i32_1, %c0_i32_2 : i32, i32, i32, i32
  }
  func.func @transform_3(%arg0: i32, %arg1: i32) -> (i32, i32, i32, i32) {
    %c0_i32 = arith.constant 0 : i32
    %c0_i32_0 = arith.constant 0 : i32
    %c0_i32_1 = arith.constant 0 : i32
    return %arg0, %arg1, %c0_i32, %c0_i32_0 : i32, i32, i32, i32
  }
}

</mosaic_0001>

<bundles_post_ra>
// kernel: vgg_block_forward.3
= control target key start
LH: loop header
LB: loop body
LE: loop exit
PB: predicated region body
PF: predicated region fallthrough
CT: control target
= control target key end

     0   :  { %s1371_s12 = smov 0   ;;  %s1373_s13 = smov 0   ;;  %s1565_s0 = inlined_call_operand.vmem [shape: bf16[2,16,16,128], index: 0, kind: input, shape index: {}]   ;;  %s1566_s1 = inlined_call_operand.vmem [shape: bf16[128,128], index: 1, kind: input, shape index: {}]   ;;  %s1567_s2 = inlined_call_operand.vmem [shape: bf16[2,16,16,128], index: 2, kind: output, shape index: {0}]   ;;  %s1568_s3 = inlined_call_operand.vmem [shape: f32[2,1,2,128], index: 3, kind: output, shape index: {1}]  }
   0x1   :  { %s1375_s14 = smov 0  }
   0x2 LB: > { %s26_s15 = sadd.s32 1, %s1345_s13  ;;  %p998_p0 = scmp.ge.s32.totalorder %s1349_s14, 1  ;;  %s1349_s14 = sphi %s1375_s14, %s14_s14   ;;  %s1345_s13 = sphi %s1373_s13, %s1570_s13   ;;  %s1341_s12 = sphi %s1371_s12, %s1569_s12  }
   0x3   : > { %p28_p1 = scmp.ge.s32.totalorder %s26_s15, 2  ;;  %p164_p2 = scmp.lt.s32.totalorder %s1349_s14, 3 }
   0x5   : > { %s1572_s15 = smov (%p28_p1, %s26_s15), 0  ;;  %p165_p3 = pnand %p998_p0, %p164_p2 }
   0x6   : > { %p206_p4 = scmp.lt.s32.totalorder (!%p165_p3), %s1341_s12, 1 }
   0x7   : > { %168 = sbr.rel (%p165_p3) target bundleno = 322 (0x142), region = 28 }
   0xc   : > { %v1303_v0 = vld [vmem:[%s1566_s1 + $0x38] sm:$0xff]   ;;  %v1304_v1 = vld [vmem:[%s1566_s1 + $0x30] sm:$0xff]   ;;  %s1574_s12 = smov (!%p206_p4, %s1341_s12), 1  ;;  %v1305_v2 = vld [vmem:[%s1566_s1 + $0x28] sm:$0xff]   ;;  %vm854_vm0 = vcmask 1040384  }
   0xd   : > { %1215 = vmatprep.subr.bf16.mxu0 %v1303_v0  ;;  %1263 = vmatprep.subr.bf16.mxu1 %v1303_v0  ;;  %s1062_s22 = sshll.u32 %s1574_s12, 7  ;;  %v1306_v3 = vld [vmem:[%s1566_s1 + $0x20] sm:$0xff]   ;;  %v1307_v5 = vld [vmem:[%s1566_s1 + $0x18] sm:$0xff]   ;;  %v1308_v6 = vld [vmem:[%s1566_s1 + $0x10] sm:$0xff]   ;;  %s1003_s16 = sshll.u32 %s1574_s12, 1 }
   0xe   : > { %1216 = vmatpush3.bf16.msra.mxu0 %v1303_v0  ;;  %1271 = vmatpush3.bf16.msra.mxu1 %v1303_v0  ;;  %s1406_s25 = scalar_lea.vmem %s1565_s0, %s1062_s22  ;;  %v1309_v8 = vld [vmem:[%s1566_s1 + $0x8] sm:$0xff]   ;;  %v1310_v9 = vld [vmem:[%s1566_s1] sm:$0xff]   ;;  %s1448_s11 = scalar_lea.vmem %s1567_s2, %s1062_s22 }
   0xf   : > { %1217 = vmatprep.subr.bf16.mxu0 %v1304_v1  ;;  %1264 = vmatprep.subr.bf16.mxu1 %v1304_v1  ;;  %v1311_v4 = vld [vmem:[%s1406_s25] sm:$0xff]   ;;  %v1312_v10 = vld [vmem:[%s1406_s25 + $0x8] sm:$0xff]   ;;  %v1313_v12 = vld [vmem:[%s1406_s25 + $0x10] sm:$0xff]   ;;  %s233_s19 = scalar_lea.vmem %s1568_s3, %s1003_s16 }
  0x10   : > { %1231 = vmatprep.mubr.bf16.mxu0 %v1311_v4  ;;  %v1319_v7 = vld [vmem:[%s1406_s25 + $0x40] sm:$0xff]   ;;  %v1320_v11 = vld [vmem:[%s1406_s25 + $0x48] sm:$0xff]   ;;  %v1321_v13 = vld [vmem:[%s1406_s25 + $0x50] sm:$0xff]  }
  0x11   : > { %1247 = vmatprep.mubr.bf16.mxu1 %v1319_v7  ;;  %v1314_v14 = vld [vmem:[%s1406_s25 + $0x18] sm:$0xff]   ;;  %v1315_v16 = vld [vmem:[%s1406_s25 + $0x20] sm:$0xff]   ;;  %v1316_v18 = vld [vmem:[%s1406_s25 + $0x28] sm:$0xff]  }
  0x12   : > { %1218 = vmatpush3.bf16.msra.mxu0 %v1304_v1  ;;  %1272 = vmatpush3.bf16.msra.mxu1 %v1304_v1  ;;  %v1322_v15 = vld [vmem:[%s1406_s25 + $0x58] sm:$0xff]   ;;  %v1323_v17 = vld [vmem:[%s1406_s25 + $0x60] sm:$0xff]   ;;  %v1324_v19 = vld [vmem:[%s1406_s25 + $0x68] sm:$0xff]  }
  0x13   : > { %1219 = vmatprep.subr.bf16.mxu0 %v1305_v2  ;;  %1265 = vmatprep.subr.bf16.mxu1 %v1305_v2  ;;  %v1317_v20 = vld [vmem:[%s1406_s25 + $0x30] sm:$0xff]   ;;  %v1318_v22 = vld [vmem:[%s1406_s25 + $0x38] sm:$0xff]  }
  0x14   : > { %v1325_v21 = vld [vmem:[%s1406_s25 + $0x70] sm:$0xff]   ;;  %v1326_v23 = vld [vmem:[%s1406_s25 + $0x78] sm:$0xff]  }
  0x16   : > { %1220 = vmatpush3.bf16.msra.mxu0 %v1305_v2  ;;  %1273 = vmatpush3.bf16.msra.mxu1 %v1305_v2 }
  0x17   : > { %1221 = vmatprep.subr.bf16.mxu0 %v1306_v3  ;;  %1266 = vmatprep.subr.bf16.mxu1 %v1306_v3 }
  0x1a   : > { %1222 = vmatpush3.bf16.msra.mxu0 %v1306_v3  ;;  %1274 = vmatpush3.bf16.msra.mxu1 %v1306_v3 }
  0x1b   : > { %1223 = vmatprep.subr.bf16.mxu0 %v1307_v5  ;;  %1267 = vmatprep.subr.bf16.mxu1 %v1307_v5 }
  0x1e   : > { %1224 = vmatpush3.bf16.msra.mxu0 %v1307_v5  ;;  %1275 = vmatpush3.bf16.msra.mxu1 %v1307_v5 }
  0x1f   : > { %1225 = vmatprep.subr.bf16.mxu0 %v1308_v6  ;;  %1268 = vmatprep.subr.bf16.mxu1 %v1308_v6 }
  0x22   : > { %1226 = vmatpush3.bf16.msra.mxu0 %v1308_v6  ;;  %1276 = vmatpush3.bf16.msra.mxu1 %v1308_v6 }
  0x23   : > { %1227 = vmatprep.subr.bf16.mxu0 %v1309_v8  ;;  %1269 = vmatprep.subr.bf16.mxu1 %v1309_v8 }
  0x26   : > { %1228 = vmatpush3.bf16.msra.mxu0 %v1309_v8  ;;  %1277 = vmatpush3.bf16.msra.mxu1 %v1309_v8 }
  0x27   : > { %1229 = vmatprep.subr.bf16.mxu0 %v1310_v9  ;;  %1270 = vmatprep.subr.bf16.mxu1 %v1310_v9 }
  0x2a   : > { %1230 = vmatpush3.bf16.msra.mxu0 %v1310_v9  ;;  %1278 = vmatpush3.bf16.msra.mxu1 %v1310_v9 }
  0x2d   : > { %1232 = vmatmul.mubr.bf16.vlgmr.msra.gmra.mxu0 %v1312_v10  ;;  %1248 = vmatmul.mubr.bf16.vlgmr.msra.gmra.mxu1 %v1320_v11 }
  0x2e   : > { %1235 = vmatprep.mubr.bf16.mxu0 %v1313_v12  ;;  %1251 = vmatprep.mubr.bf16.mxu1 %v1321_v13 }
  0x35   : > { %1236 = vmatmul.mubr.bf16.gmra.mxu0 %v1314_v14  ;;  %1252 = vmatmul.mubr.bf16.gmra.mxu1 %v1322_v15 }
  0x36   : > { %1239 = vmatprep.mubr.bf16.mxu0 %v1315_v16  ;;  %1255 = vmatprep.mubr.bf16.mxu1 %v1323_v17 }
  0x3d   : > { %1240 = vmatmul.mubr.bf16.gmra.mxu0 %v1316_v18  ;;  %1256 = vmatmul.mubr.bf16.gmra.mxu1 %v1324_v19 }
  0x3e   : > { %1243 = vmatprep.mubr.bf16.mxu0 %v1317_v20  ;;  %1259 = vmatprep.mubr.bf16.mxu1 %v1325_v21 }
  0x45   : > { %1244 = vmatmul.mubr.bf16.gmra.mxu0 %v1318_v22  ;;  %1260 = vmatmul.mubr.bf16.gmra.mxu1 %v1326_v23 }
  0xed   : > { %v1233_v24 = vpop.f32.mrf.mxu0  ;;  %v1439_v25 = vpop.f32.mrf.mxu1 }
  0xee   : > { %v787_v41 = vmul.f32 %v1233_v24, %v1233_v24 }
  0xef   : > { %v461_v26 = vpop.f32.mrf.mxu0  ;;  %v1441_v27 = vpop.f32.mrf.mxu1 }
  0xf0   : > { %v785_v32 = vmul.f32 %v461_v26, %v461_v26 }
  0xf1   : > { %v1234_v28 = vpop.f32.mrf.mxu0  ;;  %v1450_v29 = vpop.f32.mrf.mxu1 }
  0xf2   : > { %v1104_v30 = vpack.c.bf16 %v1234_v28, %v1233_v24  ;;  %v1144_v31 = vpack.c.bf16 %v1450_v29, %v1439_v25  ;;  %v788_v46 = vmul.f32 %v1234_v28, %v1234_v28 }
  0xf3   : > { %v464_v33 = vpop.f32.mrf.mxu0  ;;  %v1454_v34 = vpop.f32.mrf.mxu1 }
  0xf4   : > { %1176 = vst [vmem:[%s1448_s11 + $0x8] sm:$0xff] %v1104_v30   ;;  %v1099_v35 = vpack.c.bf16 %v464_v33, %v461_v26  ;;  %v748_v36 = vadd.f32 %v464_v33, %v461_v26  ;;  %v786_v37 = vmul.f32 %v464_v33, %v464_v33  ;;  %1184 = vst [vmem:[%s1448_s11 + $0x48] sm:$0xff] %v1144_v31  }
  0xf5   : > { %v1139_v38 = vpack.c.bf16 %v1454_v34, %v1441_v27  ;;  %v1237_v39 = vpop.f32.mrf.mxu0  ;;  %v1460_v40 = vpop.f32.mrf.mxu1 }
  0xf6   : > { %1100 = vst [vmem:[%s1448_s11] sm:$0xff] %v1099_v35   ;;  %v749_v42 = vadd.f32 %v1233_v24, %v748_v36  ;;  %v817_v43 = vadd.f32 %v786_v37, %v785_v32  ;;  %v791_v1 = vmul.f32 %v1237_v39, %v1237_v39 }
  0xf7   : > { %1183 = vst [vmem:[%s1448_s11 + $0x40] sm:$0xff] %v1139_v38   ;;  %v477_v44 = vpop.f32.mrf.mxu0  ;;  %v1464_v45 = vpop.f32.mrf.mxu1 }
  0xf8   : > { %v818_v47 = vadd.f32 %v817_v43, %v787_v41  ;;  %v750_v48 = vadd.f32 %v1234_v28, %v749_v42  ;;  %v789_v52 = vmul.f32 %v477_v44, %v477_v44 }
  0xf9   : > { %v1238_v49 = vpop.f32.mrf.mxu0  ;;  %v1466_v50 = vpop.f32.mrf.mxu1 }
  0xfa   : > { %v751_v51 = vadd.f32 %v750_v48, %v477_v44  ;;  %v819_v53 = vadd.f32 %v818_v47, %v788_v46  ;;  %v1114_v54 = vpack.c.bf16 %v1238_v49, %v1237_v39  ;;  %v1154_v56 = vpack.c.bf16 %v1466_v50, %v1460_v40 }
  0xfb   : > { %v480_v55 = vpop.f32.mrf.mxu0  ;;  %v1470_v57 = vpop.f32.mrf.mxu1  ;;  %v792_v6 = vmul.f32 %v1238_v49, %v1238_v49 }
  0xfc   : > { %v820_v58 = vadd.f32 %v819_v53, %v789_v52  ;;  %1178 = vst [vmem:[%s1448_s11 + $0x18] sm:$0xff] %v1114_v54   ;;  %v1109_v59 = vpack.c.bf16 %v480_v55, %v477_v44  ;;  %v752_v60 = vadd.f32 %v751_v51, %v480_v55  ;;  %v790_v61 = vmul.f32 %v480_v55, %v480_v55 }
  0xfd   : > { %v1241_v62 = vpop.f32.mrf.mxu0  ;;  %1186 = vst [vmem:[%s1448_s11 + $0x58] sm:$0xff] %v1154_v56   ;;  %v1149_v63 = vpack.c.bf16 %v1470_v57, %v1464_v45  ;;  %v1476_v0 = vpop.f32.mrf.mxu1 }
  0xfe   : > { %1177 = vst [vmem:[%s1448_s11 + $0x10] sm:$0xff] %v1109_v59   ;;  %v753_v2 = vadd.f32 %v1237_v39, %v752_v60  ;;  %v821_v3 = vadd.f32 %v820_v58, %v790_v61  ;;  %v795_v26 = vmul.f32 %v1241_v62, %v1241_v62  ;;  %v801_v61 = vmul.f32 %v1441_v27, %v1441_v27 }
  0xff   : > { %v493_v4 = vpop.f32.mrf.mxu0  ;;  %1185 = vst [vmem:[%s1448_s11 + $0x50] sm:$0xff] %v1149_v63   ;;  %v1480_v5 = vpop.f32.mrf.mxu1 }
 0x100   : > { %v822_v7 = vadd.f32 %v821_v3, %v791_v1  ;;  %v754_v8 = vadd.f32 %v1238_v49, %v753_v2  ;;  %v793_v12 = vmul.f32 %v493_v4, %v493_v4  ;;  %v802_v2 = vmul.f32 %v1454_v34, %v1454_v34 }
 0x101   : > { %v1242_v9 = vpop.f32.mrf.mxu0  ;;  %v1482_v10 = vpop.f32.mrf.mxu1 }
 0x102   : > { %v755_v11 = vadd.f32 %v754_v8, %v493_v4  ;;  %v823_v13 = vadd.f32 %v822_v7, %v792_v6  ;;  %v1124_v14 = vpack.c.bf16 %v1242_v9, %v1241_v62  ;;  %v1164_v16 = vpack.c.bf16 %v1482_v10, %v1476_v0 }
 0x103   : > { %v496_v15 = vpop.f32.mrf.mxu0  ;;  %v1486_v17 = vpop.f32.mrf.mxu1  ;;  %v796_v33 = vmul.f32 %v1242_v9, %v1242_v9  ;;  %v804_v8 = vmul.f32 %v1450_v29, %v1450_v29 }
 0x104   : > { %v824_v18 = vadd.f32 %v823_v13, %v793_v12  ;;  %1180 = vst [vmem:[%s1448_s11 + $0x28] sm:$0xff] %v1124_v14   ;;  %v1119_v19 = vpack.c.bf16 %v496_v15, %v493_v4  ;;  %v756_v20 = vadd.f32 %v755_v11, %v496_v15  ;;  %v794_v21 = vmul.f32 %v496_v15, %v496_v15 }
 0x105   : > { %v1245_v22 = vpop.f32.mrf.mxu0  ;;  %1188 = vst [vmem:[%s1448_s11 + $0x68] sm:$0xff] %v1164_v16   ;;  %v1159_v23 = vpack.c.bf16 %v1486_v17, %v1480_v5  ;;  %v1492_v24 = vpop.f32.mrf.mxu1  ;;  %v803_v4 = vmul.f32 %v1439_v25, %v1439_v25  ;;  %v805_v12 = vmul.f32 %v1464_v45, %v1464_v45  ;;  %v806_v15 = vmul.f32 %v1470_v57, %v1470_v57 }
 0x106   : > { %1179 = vst [vmem:[%s1448_s11 + $0x20] sm:$0xff] %v1119_v19   ;;  %v757_v28 = vadd.f32 %v1241_v62, %v756_v20  ;;  %v825_v30 = vadd.f32 %v824_v18, %v794_v21  ;;  %v799_v54 = vmul.f32 %v1245_v22, %v1245_v22  ;;  %v809_v21 = vmul.f32 %v1480_v5, %v1480_v5 }
 0x107   : > { %v509_v31 = vpop.f32.mrf.mxu0  ;;  %1187 = vst [vmem:[%s1448_s11 + $0x60] sm:$0xff] %v1159_v23   ;;  %v1496_v32 = vpop.f32.mrf.mxu1 }
 0x108   : > { %v826_v35 = vadd.f32 %v825_v30, %v795_v26  ;;  %v758_v36 = vadd.f32 %v1242_v9, %v757_v28  ;;  %v797_v41 = vmul.f32 %v509_v31, %v509_v31  ;;  %v810_v26 = vmul.f32 %v1486_v17, %v1486_v17 }
 0x109   : > { %v1246_v37 = vpop.f32.mrf.mxu0  ;;  %v1498_v38 = vpop.f32.mrf.mxu1 }
 0x10a   : > { %v759_v39 = vadd.f32 %v758_v36, %v509_v31  ;;  %v827_v42 = vadd.f32 %v826_v35, %v796_v33  ;;  %v1134_v43 = vpack.c.bf16 %v1246_v37, %v1245_v22  ;;  %v1174_v46 = vpack.c.bf16 %v1498_v38, %v1492_v24 }
 0x10b   : > { %v512_v44 = vpop.f32.mrf.mxu0  ;;  %v576_v47 = vpop.f32.mrf.mxu1  ;;  %v800_v58 = vmul.f32 %v1246_v37, %v1246_v37  ;;  %v813_v35 = vmul.f32 %v1496_v32, %v1496_v32 }
 0x10c   : > { %v828_v48 = vadd.f32 %v827_v42, %v797_v41  ;;  %1182 = vst [vmem:[%s1448_s11 + $0x38] sm:$0xff] %v1134_v43   ;;  %v1129_v49 = vpack.c.bf16 %v512_v44, %v509_v31  ;;  %v760_v51 = vadd.f32 %v759_v39, %v512_v44  ;;  %v798_v52 = vmul.f32 %v512_v44, %v512_v44 }
 0x10d   : > { %1190 = vst [vmem:[%s1448_s11 + $0x78] sm:$0xff] %v1174_v46   ;;  %v1169_v53 = vpack.c.bf16 %v576_v47, %v1496_v32  ;;  %v814_v39 = vmul.f32 %v576_v47, %v576_v47  ;;  %v815_v41 = vmul.f32 %v1492_v24, %v1492_v24  ;;  %v816_v43 = vmul.f32 %v1498_v38, %v1498_v38 }
 0x10e   : > { %1181 = vst [vmem:[%s1448_s11 + $0x30] sm:$0xff] %v1129_v49   ;;  %v761_v55 = vadd.f32 %v1245_v22, %v760_v51  ;;  %v829_v56 = vadd.f32 %v828_v48, %v798_v52 }
 0x10f   : > { %1189 = vst [vmem:[%s1448_s11 + $0x70] sm:$0xff] %v1169_v53  }
 0x110   : > { %v762_v59 = vadd.f32 %v1246_v37, %v761_v55  ;;  %v830_v60 = vadd.f32 %v829_v56, %v799_v54 }
 0x112   : > { %v831_v62 = vadd.f32 %v830_v60, %v800_v58  ;;  %v763_v63 = vadd.f32 %v762_v59, %v1441_v27 }
 0x114   : > { %v764_v1 = vadd.f32 %v763_v63, %v1454_v34  ;;  %v832_v3 = vadd.f32 %v831_v62, %v801_v61 }
 0x116   : > { %v765_v6 = vadd.f32 %v1439_v25, %v764_v1  ;;  %v833_v7 = vadd.f32 %v832_v3, %v802_v2  ;;  %v807_v25 = vmul.f32 %v1460_v40, %v1460_v40 }
 0x118   : > { %v834_v9 = vadd.f32 %v833_v7, %v803_v4  ;;  %v766_v11 = vadd.f32 %v1450_v29, %v765_v6  ;;  %v808_v29 = vmul.f32 %v1466_v50, %v1466_v50 }
 0x11a   : > { %v767_v27 = vadd.f32 %v766_v11, %v1464_v45  ;;  %v835_v13 = vadd.f32 %v834_v9, %v804_v8 }
 0x11c   : > { %v836_v34 = vadd.f32 %v835_v13, %v805_v12  ;;  %v768_v14 = vadd.f32 %v767_v27, %v1470_v57 }
 0x11e   : > { %v769_v16 = vadd.f32 %v1460_v40, %v768_v14  ;;  %v837_v18 = vadd.f32 %v836_v34, %v806_v15  ;;  %v811_v40 = vmul.f32 %v1476_v0, %v1476_v0 }
 0x120   : > { %v838_v19 = vadd.f32 %v837_v18, %v807_v25  ;;  %v770_v20 = vadd.f32 %v1466_v50, %v769_v16  ;;  %v812_v50 = vmul.f32 %v1482_v10, %v1482_v10 }
 0x122   : > { %v771_v45 = vadd.f32 %v770_v20, %v1480_v5  ;;  %v839_v22 = vadd.f32 %v838_v19, %v808_v29 }
 0x124   : > { %v840_v23 = vadd.f32 %v839_v22, %v809_v21  ;;  %v772_v57 = vadd.f32 %v771_v45, %v1486_v17 }
 0x126   : > { %v773_v28 = vadd.f32 %v1476_v0, %v772_v57  ;;  %v841_v30 = vadd.f32 %v840_v23, %v810_v26 }
 0x128   : > { %v842_v31 = vadd.f32 %v841_v30, %v811_v40  ;;  %v774_v33 = vadd.f32 %v1482_v10, %v773_v28 }
 0x12a   : > { %v775_v5 = vadd.f32 %v774_v33, %v1496_v32  ;;  %v843_v36 = vadd.f32 %v842_v31, %v812_v50 }
 0x12c   : > { %v844_v37 = vadd.f32 %v843_v36, %v813_v35  ;;  %v776_v17 = vadd.f32 %v775_v5, %v576_v47 }
 0x12e   : > { %v777_v0 = vadd.f32 %v1492_v24, %v776_v17  ;;  %v845_v42 = vadd.f32 %v844_v37, %v814_v39 }
 0x130   : > { %v778_v10 = vadd.f32 %v1498_v38, %v777_v0  ;;  %v846_v44 = vadd.f32 %v845_v42, %v815_v41 }
 0x132   : > { %v779_v46 = vrot.slane %v778_v10, 4  ;;  %v847_v48 = vadd.f32 %v846_v44, %v816_v43 }
 0x134   : > { %v780_v32 = vadd.f32 %v779_v46, %v778_v10  ;;  %v848_v49 = vrot.slane %v847_v48, 4 }
 0x136   : > { %v781_v51 = vrot.slane %v780_v32, 2  ;;  %v849_v52 = vadd.f32 %v848_v49, %v847_v48 }
 0x138   : > { %v782_v47 = vadd.f32 %v781_v51, %v780_v32  ;;  %v850_v53 = vrot.slane %v849_v52, 2 }
 0x13a   : > { %v783_v54 = vrot.slane %v782_v47, 1  ;;  %v851_v55 = vadd.f32 %v850_v53, %v849_v52 }
 0x13c   : > { %v852_v56 = vrot.slane %v851_v55, 1  ;;  %v784_v24 = vadd.f32 %v783_v54, %v782_v47 }
 0x13e   : > { %v853_v38 = vadd.f32 %v852_v56, %v851_v55 }
 0x140   : > { %v855_v58 = vsel %vm854_vm0, %v784_v24, %v853_v38 }
 0x141   : > { %856 = vst [vmem:[%s233_s19] sm:$0x3] %v855_v58 }
 0x142 PF: > { %s14_s14 = sadd.s32 1, %s1349_s14   ;;  %s1569_s12 = smov %s1345_s13 }
 0x143   : > { %p11_p5 = scmp.ge.s32.totalorder %s14_s14, 4   ;;  %s1570_s13 = smov %s1572_s15 }
 0x145   :  { %13 = sbr.rel (!%p11_p5) target bundleno = 2 (0x2), region = 70 }

// kernel: vgg_block_forward.5
= control target key start
LH: loop header
LB: loop body
LE: loop exit
PB: predicated region body
PF: predicated region fallthrough
CT: control target
= control target key end

     0   :  { %s648_s12 = smov 0   ;;  %s650_s13 = smov 0   ;;  %s839_s0 = inlined_call_operand.vmem [shape: bf16[2,16,16,128], index: 0, kind: input, shape index: {}]   ;;  %s840_s1 = inlined_call_operand.vmem [shape: f32[1,1,1,128], index: 1, kind: input, shape index: {}]   ;;  %s841_s2 = inlined_call_operand.vmem [shape: f32[1,1,1,128], index: 2, kind: input, shape index: {}]   ;;  %s842_s3 = inlined_call_operand.vmem [shape: f32[2,16,16,8], index: 3, kind: output, shape index: {}]  }
   0x1   :  { %s652_s14 = smov 0  }
   0x2 LB: > { %s25_s15 = sadd.s32 1, %s622_s13  ;;  %p490_p0 = scmp.ge.s32.totalorder %s626_s14, 1  ;;  %s626_s14 = sphi %s652_s14, %s13_s14   ;;  %s622_s13 = sphi %s650_s13, %s844_s13   ;;  %s618_s12 = sphi %s648_s12, %s843_s12  }
   0x3   : > { %p27_p1 = scmp.ge.s32.totalorder %s25_s15, 2  ;;  %p159_p2 = scmp.lt.s32.totalorder %s626_s14, 3 }
   0x5   : > { %s846_s15 = smov (%p27_p1, %s25_s15), 0  ;;  %p160_p3 = pnand %p490_p0, %p159_p2 }
   0x6   : > { %p194_p4 = scmp.lt.s32.totalorder (!%p160_p3), %s618_s12, 1 }
   0x7   : > { %163 = sbr.rel (%p160_p3) target bundleno = 44 (0x2c), region = 32 }
   0xc   : > { %s848_s12 = smov (!%p194_p4, %s618_s12), 1  ;;  %v674_v0 = vld [vmem:[%s840_s1] ss:$0 sm:$0xff]  ;;  %vm357_vm0 = vcmask 64512  }
   0xd   : > { %s499_s16 = sshll.u32 %s848_s12, 7  ;;  %s500_s22 = sshll.u32 %s848_s12, 8  ;;  %v683_v9 = vld [vmem:[%s841_s2] ss:$0 sm:$0xff] }
   0xe   : > { %s669_s19 = scalar_lea.vmem %s839_s0, %s499_s16  ;;  %s692_s27 = scalar_lea.vmem %s842_s3, %s500_s22 }
   0xf   : > { %v502_v1 = vld [vmem:[%s669_s19] sm:$0xff]   ;;  %v565_v2 = vld [vmem:[%s669_s19 + $0x8] sm:$0xff]   ;;  %v566_v3 = vld [vmem:[%s669_s19 + $0x10] sm:$0xff]  }
  0x10   : > { %v503_v4 = vunpack.c.l.bf16 %v502_v1  ;;  %v504_v5 = vunpack.c.h.bf16 %v502_v1  ;;  %v507_v6 = vunpack.c.l.bf16 %v565_v2  ;;  %v508_v7 = vunpack.c.h.bf16 %v565_v2  ;;  %v567_v8 = vld [vmem:[%s669_s19 + $0x18] sm:$0xff]   ;;  %v568_v22 = vld [vmem:[%s669_s19 + $0x20] sm:$0xff]   ;;  %v569_v23 = vld [vmem:[%s669_s19 + $0x28] sm:$0xff]  }
  0x11   : > { %v511_v10 = vunpack.c.l.bf16 %v566_v3  ;;  %v512_v11 = vunpack.c.h.bf16 %v566_v3  ;;  %v515_v12 = vunpack.c.l.bf16 %v567_v8  ;;  %v516_v13 = vunpack.c.h.bf16 %v567_v8  ;;  %v570_v28 = vld [vmem:[%s669_s19 + $0x30] sm:$0xff]   ;;  %v571_v29 = vld [vmem:[%s669_s19 + $0x38] sm:$0xff]   ;;  %v572_v50 = vld [vmem:[%s669_s19 + $0x40] sm:$0xff]  }
  0x12   : > { %v286_v14 = vmul.f32 %v503_v4, %v674_v0  ;;  %v287_v15 = vmul.f32 %v504_v5, %v674_v0  ;;  %v288_v16 = vmul.f32 %v507_v6, %v674_v0  ;;  %v289_v17 = vmul.f32 %v508_v7, %v674_v0  ;;  %v573_v51 = vld [vmem:[%s669_s19 + $0x48] sm:$0xff]   ;;  %v574_v56 = vld [vmem:[%s669_s19 + $0x50] sm:$0xff]   ;;  %v575_v57 = vld [vmem:[%s669_s19 + $0x58] sm:$0xff]  }
  0x13   : > { %v290_v18 = vmul.f32 %v511_v10, %v674_v0  ;;  %v291_v19 = vmul.f32 %v512_v11, %v674_v0  ;;  %v292_v20 = vmul.f32 %v515_v12, %v674_v0  ;;  %v293_v21 = vmul.f32 %v516_v13, %v674_v0 }
  0x14   : > { %v325_v24 = vadd.f32 %v683_v9, %v286_v14  ;;  %v326_v25 = vadd.f32 %v683_v9, %v287_v15  ;;  %v327_v26 = vadd.f32 %v683_v9, %v288_v16  ;;  %v328_v27 = vadd.f32 %v683_v9, %v289_v17  ;;  %v576_v16 = vld [vmem:[%s669_s19 + $0x60] sm:$0xff]   ;;  %v577_v17 = vld [vmem:[%s669_s19 + $0x68] sm:$0xff]  }
  0x15   : > { %v329_v30 = vadd.f32 %v683_v9, %v290_v18  ;;  %v330_v31 = vadd.f32 %v683_v9, %v291_v19  ;;  %v331_v32 = vadd.f32 %v683_v9, %v292_v20  ;;  %v332_v33 = vadd.f32 %v683_v9, %v293_v21 }
  0x16   : > { %358 = vst.msk [vmem:[%s692_s27] sm:$0xff] %vm357_vm0, %v325_v24  ;;  %359 = vst.msk [vmem:[%s692_s27 + $0x8] sm:$0xff] %vm357_vm0, %v326_v25  ;;  %v519_v34 = vunpack.c.l.bf16 %v568_v22  ;;  %v520_v35 = vunpack.c.h.bf16 %v568_v22  ;;  %v523_v36 = vunpack.c.l.bf16 %v569_v23  ;;  %v524_v37 = vunpack.c.h.bf16 %v569_v23  ;;  %v578_v22 = vld [vmem:[%s669_s19 + $0x70] sm:$0xff]   ;;  %v579_v23 = vld [vmem:[%s669_s19 + $0x78] sm:$0xff]  }
  0x17   : > { %360 = vst.msk [vmem:[%s692_s27 + $0x10] sm:$0xff] %vm357_vm0, %v327_v26  ;;  %361 = vst.msk [vmem:[%s692_s27 + $0x18] sm:$0xff] %vm357_vm0, %v328_v27  ;;  %v527_v38 = vunpack.c.l.bf16 %v570_v28  ;;  %v528_v39 = vunpack.c.h.bf16 %v570_v28  ;;  %v531_v40 = vunpack.c.l.bf16 %v571_v29  ;;  %v532_v41 = vunpack.c.h.bf16 %v571_v29 }
  0x18   : > { %362 = vst.msk [vmem:[%s692_s27 + $0x20] sm:$0xff] %vm357_vm0, %v329_v30  ;;  %363 = vst.msk [vmem:[%s692_s27 + $0x28] sm:$0xff] %vm357_vm0, %v330_v31  ;;  %v294_v42 = vmul.f32 %v519_v34, %v674_v0  ;;  %v295_v43 = vmul.f32 %v520_v35, %v674_v0  ;;  %v296_v44 = vmul.f32 %v523_v36, %v674_v0  ;;  %v535_v62 = vunpack.c.l.bf16 %v572_v50 }
  0x19   : > { %364 = vst.msk [vmem:[%s692_s27 + $0x30] sm:$0xff] %vm357_vm0, %v331_v32  ;;  %365 = vst.msk [vmem:[%s692_s27 + $0x38] sm:$0xff] %vm357_vm0, %v332_v33  ;;  %v297_v45 = vmul.f32 %v524_v37, %v674_v0  ;;  %v298_v46 = vmul.f32 %v527_v38, %v674_v0  ;;  %v299_v47 = vmul.f32 %v528_v39, %v674_v0  ;;  %v536_v63 = vunpack.c.h.bf16 %v572_v50 }
  0x1a   : > { %v300_v48 = vmul.f32 %v531_v40, %v674_v0  ;;  %v301_v49 = vmul.f32 %v532_v41, %v674_v0  ;;  %v333_v52 = vadd.f32 %v683_v9, %v294_v42  ;;  %v334_v53 = vadd.f32 %v683_v9, %v295_v43 }
  0x1b   : > { %v335_v54 = vadd.f32 %v683_v9, %v296_v44  ;;  %v336_v55 = vadd.f32 %v683_v9, %v297_v45  ;;  %v337_v58 = vadd.f32 %v683_v9, %v298_v46  ;;  %v338_v59 = vadd.f32 %v683_v9, %v299_v47 }
  0x1c   : > { %v339_v60 = vadd.f32 %v683_v9, %v300_v48  ;;  %v340_v61 = vadd.f32 %v683_v9, %v301_v49  ;;  %366 = vst.msk [vmem:[%s692_s27 + $0x40] sm:$0xff] %vm357_vm0, %v333_v52  ;;  %367 = vst.msk [vmem:[%s692_s27 + $0x48] sm:$0xff] %vm357_vm0, %v334_v53  ;;  %v539_v1 = vunpack.c.l.bf16 %v573_v51  ;;  %v540_v2 = vunpack.c.h.bf16 %v573_v51 }
  0x1d   : > { %368 = vst.msk [vmem:[%s692_s27 + $0x50] sm:$0xff] %vm357_vm0, %v335_v54  ;;  %369 = vst.msk [vmem:[%s692_s27 + $0x58] sm:$0xff] %vm357_vm0, %v336_v55  ;;  %v543_v3 = vunpack.c.l.bf16 %v574_v56  ;;  %v544_v4 = vunpack.c.h.bf16 %v574_v56  ;;  %v547_v5 = vunpack.c.l.bf16 %v575_v57  ;;  %v548_v6 = vunpack.c.h.bf16 %v575_v57 }
  0x1e   : > { %370 = vst.msk [vmem:[%s692_s27 + $0x60] sm:$0xff] %vm357_vm0, %v337_v58  ;;  %371 = vst.msk [vmem:[%s692_s27 + $0x68] sm:$0xff] %vm357_vm0, %v338_v59  ;;  %v302_v7 = vmul.f32 %v535_v62, %v674_v0  ;;  %v303_v8 = vmul.f32 %v536_v63, %v674_v0  ;;  %v304_v10 = vmul.f32 %v539_v1, %v674_v0  ;;  %v551_v28 = vunpack.c.l.bf16 %v576_v16 }
  0x1f   : > { %372 = vst.msk [vmem:[%s692_s27 + $0x70] sm:$0xff] %vm357_vm0, %v339_v60  ;;  %373 = vst.msk [vmem:[%s692_s27 + $0x78] sm:$0xff] %vm357_vm0, %v340_v61  ;;  %v305_v11 = vmul.f32 %v540_v2, %v674_v0  ;;  %v306_v12 = vmul.f32 %v543_v3, %v674_v0  ;;  %v307_v13 = vmul.f32 %v544_v4, %v674_v0  ;;  %v552_v29 = vunpack.c.h.bf16 %v576_v16 }
  0x20   : > { %v308_v14 = vmul.f32 %v547_v5, %v674_v0  ;;  %v309_v15 = vmul.f32 %v548_v6, %v674_v0  ;;  %v341_v18 = vadd.f32 %v683_v9, %v302_v7  ;;  %v342_v19 = vadd.f32 %v683_v9, %v303_v8 }
  0x21   : > { %v343_v20 = vadd.f32 %v683_v9, %v304_v10  ;;  %v344_v21 = vadd.f32 %v683_v9, %v305_v11  ;;  %v345_v24 = vadd.f32 %v683_v9, %v306_v12  ;;  %v346_v25 = vadd.f32 %v683_v9, %v307_v13 }
  0x22   : > { %v347_v26 = vadd.f32 %v683_v9, %v308_v14  ;;  %v348_v27 = vadd.f32 %v683_v9, %v309_v15  ;;  %374 = vst.msk [vmem:[%s692_s27 + $0x80] sm:$0xff] %vm357_vm0, %v341_v18  ;;  %375 = vst.msk [vmem:[%s692_s27 + $0x88] sm:$0xff] %vm357_vm0, %v342_v19  ;;  %v555_v30 = vunpack.c.l.bf16 %v577_v17  ;;  %v556_v31 = vunpack.c.h.bf16 %v577_v17 }
  0x23   : > { %376 = vst.msk [vmem:[%s692_s27 + $0x90] sm:$0xff] %vm357_vm0, %v343_v20  ;;  %377 = vst.msk [vmem:[%s692_s27 + $0x98] sm:$0xff] %vm357_vm0, %v344_v21  ;;  %v559_v32 = vunpack.c.l.bf16 %v578_v22  ;;  %v560_v33 = vunpack.c.h.bf16 %v578_v22  ;;  %v563_v34 = vunpack.c.l.bf16 %v579_v23  ;;  %v564_v35 = vunpack.c.h.bf16 %v579_v23 }
  0x24   : > { %378 = vst.msk [vmem:[%s692_s27 + $0xa0] sm:$0xff] %vm357_vm0, %v345_v24  ;;  %379 = vst.msk [vmem:[%s692_s27 + $0xa8] sm:$0xff] %vm357_vm0, %v346_v25  ;;  %v310_v36 = vmul.f32 %v551_v28, %v674_v0  ;;  %v311_v37 = vmul.f32 %v552_v29, %v674_v0  ;;  %v312_v38 = vmul.f32 %v555_v30, %v674_v0 }
  0x25   : > { %380 = vst.msk [vmem:[%s692_s27 + $0xb0] sm:$0xff] %vm357_vm0, %v347_v26  ;;  %381 = vst.msk [vmem:[%s692_s27 + $0xb8] sm:$0xff] %vm357_vm0, %v348_v27  ;;  %v313_v39 = vmul.f32 %v556_v31, %v674_v0  ;;  %v314_v40 = vmul.f32 %v559_v32, %v674_v0  ;;  %v315_v41 = vmul.f32 %v560_v33, %v674_v0 }
  0x26   : > { %v316_v42 = vmul.f32 %v563_v34, %v674_v0  ;;  %v317_v43 = vmul.f32 %v564_v35, %v674_v0  ;;  %v349_v44 = vadd.f32 %v683_v9, %v310_v36  ;;  %v350_v45 = vadd.f32 %v683_v9, %v311_v37 }
  0x27   : > { %v351_v46 = vadd.f32 %v683_v9, %v312_v38  ;;  %v352_v47 = vadd.f32 %v683_v9, %v313_v39  ;;  %v353_v48 = vadd.f32 %v683_v9, %v314_v40  ;;  %v354_v49 = vadd.f32 %v683_v9, %v315_v41 }
  0x28   : > { %v355_v50 = vadd.f32 %v683_v9, %v316_v42  ;;  %v356_v51 = vadd.f32 %v683_v9, %v317_v43  ;;  %382 = vst.msk [vmem:[%s692_s27 + $0xc0] sm:$0xff] %vm357_vm0, %v349_v44  ;;  %383 = vst.msk [vmem:[%s692_s27 + $0xc8] sm:$0xff] %vm357_vm0, %v350_v45 }
  0x29   : > { %384 = vst.msk [vmem:[%s692_s27 + $0xd0] sm:$0xff] %vm357_vm0, %v351_v46  ;;  %385 = vst.msk [vmem:[%s692_s27 + $0xd8] sm:$0xff] %vm357_vm0, %v352_v47 }
  0x2a   : > { %386 = vst.msk [vmem:[%s692_s27 + $0xe0] sm:$0xff] %vm357_vm0, %v353_v48  ;;  %387 = vst.msk [vmem:[%s692_s27 + $0xe8] sm:$0xff] %vm357_vm0, %v354_v49 }
  0x2b   : > { %388 = vst.msk [vmem:[%s692_s27 + $0xf0] sm:$0xff] %vm357_vm0, %v355_v50  ;;  %389 = vst.msk [vmem:[%s692_s27 + $0xf8] sm:$0xff] %vm357_vm0, %v356_v51 }
  0x2c PF: > { %s13_s14 = sadd.s32 1, %s626_s14   ;;  %s843_s12 = smov %s622_s13 }
  0x2d   : > { %p10_p5 = scmp.ge.s32.totalorder %s13_s14, 4   ;;  %s844_s13 = smov %s846_s15 }
  0x2f   :  { %12 = sbr.rel (!%p10_p5) target bundleno = 2 (0x2), region = 62 }

// kernel: vgg_block_forward.4
= control target key start
LH: loop header
LB: loop body
LE: loop exit
PB: predicated region body
PF: predicated region fallthrough
CT: control target
= control target key end

     0   :  { %s5181_s18 = smov 0   ;;  %s5183_s19 = smov 0   ;;  %s6587_s0 = inlined_call_operand.vmem [shape: bf16[2,16,16,128], index: 0, kind: input, shape index: {}]   ;;  %s6588_s1 = inlined_call_operand.vmem [shape: bf16[3,3,128,128], index: 1, kind: input, shape index: {}]   ;;  %s6589_s2 = inlined_call_operand.vmem [shape: f32[1,1,128], index: 2, kind: input, shape index: {}]   ;;  %s6590_s3 = inlined_call_operand.vmem [shape: f32[1,1,128], index: 3, kind: input, shape index: {}]   ;;  %s6591_s4 = inlined_call_operand.vmem [shape: bf16[2,16,16,128], index: 4, kind: output, shape index: {0}]   ;;  %s6592_s5 = inlined_call_operand.vmem [shape: f32[2,1,2,128], index: 5, kind: output, shape index: {1}]  }
   0x1   :  { %s5185_s20 = smov 0  }
   0x2 LB: > { %s28_s21 = sadd.s32 1, %s5144_s19  ;;  %p3901_p0 = scmp.ge.s32.totalorder %s5148_s20, 1  ;;  %s5148_s20 = sphi %s5185_s20, %s16_s20   ;;  %s5144_s19 = sphi %s5183_s19, %s6696_s19   ;;  %s5140_s18 = sphi %s5181_s18, %s6695_s18  }
   0x3   : > { %p30_p1 = scmp.ge.s32.totalorder %s28_s21, 2  ;;  %p172_p2 = scmp.lt.s32.totalorder %s5148_s20, 3 }
   0x5   : > { %s6698_s21 = smov (%p30_p1, %s28_s21), 0  ;;  %p173_p3 = pnand %p3901_p0, %p172_p2 }
   0x7   : > { %176 = sbr.rel (%p173_p3) target bundleno = 594 (0x252), region = 32 }
   0xc   : > { %p206_p4 = scmp.lt.s32.totalorder %s5140_s18, 1  ;;  %s4152_s22 = sshll.u32 %s5140_s18, 7 }
   0xd   : > { %s229_s25 = scalar_lea.vmem %s6587_s0, %s4152_s22 }
   0xe   : > { %s6700_s18 = smov (!%p206_p4, %s5140_s18), 1  ;;  %v5202_v0 = vld [vmem:[%s229_s25] sm:$0xff]  ;;  %v5204_v1 = vld [vmem:[%s229_s25 + $0x8] sm:$0xff]  ;;  %v5206_v2 = vld [vmem:[%s229_s25 + $0x10] sm:$0xff] }
   0xf   : > { %v5208_v3 = vld [vmem:[%s229_s25 + $0x18] sm:$0xff]  ;;  %v5210_v4 = vld [vmem:[%s229_s25 + $0x20] sm:$0xff]  ;;  %v5212_v5 = vld [vmem:[%s229_s25 + $0x28] sm:$0xff]  ;;  %s4151_s26 = sshll.u32 %s6700_s18, 7  ;;  %s3904_s27 = sshll.u32 %s6700_s18, 1 }
  0x10   : > { %v5214_v6 = vld [vmem:[%s229_s25 + $0x30] sm:$0xff]  ;;  %v5216_v7 = vld [vmem:[%s229_s25 + $0x38] sm:$0xff]  ;;  %v5218_v8 = vld [vmem:[%s229_s25 + $0x40] sm:$0xff]  ;;  %s5223_s30 = scalar_lea.vmem %s6591_s4, %s4151_s26  ;;  %s5228_s8 = scalar_lea.vmem %s6592_s5, %s3904_s27 }
  0x11   : > { %v5230_v9 = vld [vmem:[%s229_s25 + $0x48] sm:$0xff]  ;;  %v5232_v10 = vld [vmem:[%s229_s25 + $0x50] sm:$0xff]  ;;  %v5234_v11 = vld [vmem:[%s229_s25 + $0x58] sm:$0xff] }
  0x12   : > { %v5236_v12 = vld [vmem:[%s229_s25 + $0x60] sm:$0xff]  ;;  %v5238_v13 = vld [vmem:[%s229_s25 + $0x68] sm:$0xff]  ;;  %v5240_v14 = vld [vmem:[%s229_s25 + $0x70] sm:$0xff] }
  0x13   : > { %v5242_v15 = vld [vmem:[%s229_s25 + $0x78] sm:$0xff] }
  0x14   : > { %303 = vsyncadd [#allocation3], 2048 }
  0x15   : > { %5136 = dma.done.wait [#allocation3], 2048 }
  0x16   : > { %5137 = vsyncadd [#allocation3], 4294965248  ;;  %vm812_vm0 = vcmask 1040384   ;;  %vm813_vm1 = vsmask.f32 256  ;;  %v5150_v16 = vmov 0   ;;  %v4216_v29 = vunpack.c.l.bf16 %v5216_v7 }
  0x17   : > { %v653_v17 = vrot.slane %v5150_v16, 7  ;;  %vm5245_vm2 = vmand %vm812_vm0, %vm813_vm1  ;;  %vm867_vm3 = vsmask.f32 7424  ;;  %v5050_v26 = vld [vmem:[%s6588_s1 + $0x78] sm:$0xff]   ;;  %v5051_v27 = vld [vmem:[%s6588_s1 + $0x70] sm:$0xff]   ;;  %v4217_v30 = vunpack.c.h.bf16 %v5216_v7  ;;  %v4188_v31 = vunpack.c.l.bf16 %v5202_v0 }
  0x18   : > { %4577 = vmatprep.subr.bf16.mxu0 %v5050_v26  ;;  %5009 = vmatprep.subr.bf16.mxu1 %v5050_v26  ;;  %v4189_v33 = vunpack.c.h.bf16 %v5202_v0  ;;  %v4220_v34 = vunpack.c.l.bf16 %v5218_v8  ;;  %v4221_v35 = vunpack.c.h.bf16 %v5218_v8  ;;  %v5052_v36 = vld [vmem:[%s6588_s1 + $0x68] sm:$0xff]   ;;  %v4192_v37 = vunpack.c.l.bf16 %v5204_v1  ;;  %v5053_v49 = vld [vmem:[%s6588_s1 + $0x60] sm:$0xff]   ;;  %v5109_v18 = vld [vmem:[%s6588_s1 + $0x230] sm:$0xff]  }
  0x19   : > { %v5251_v19 = vsel %vm5245_vm2, 0, %v653_v17  ;;  %v5255_v20 = vsel %vm5245_vm2, %v653_v17, 0  ;;  %4578 = vmatpush3.bf16.msra.mxu0 %v5050_v26  ;;  %5017 = vmatpush3.bf16.msra.mxu1 %v5050_v26  ;;  %v4193_v38 = vunpack.c.h.bf16 %v5204_v1  ;;  %v4224_v39 = vunpack.c.l.bf16 %v5230_v9  ;;  %v5301_v54 = vld [vmem:[%s6589_s2] ss:$0 sm:$0xff] }
  0x1a   : > { %v869_v21 = vshrl.u32 %v5251_v19, 16  ;;  %v871_v22 = vshll.u32 %v5251_v19, 16  ;;  %v876_v23 = vshll.u32 %v5255_v20, 16  ;;  %4579 = vmatprep.subr.bf16.mxu0 %v5051_v27  ;;  %5010 = vmatprep.subr.bf16.mxu1 %v5051_v27  ;;  %v4225_v40 = vunpack.c.h.bf16 %v5230_v9  ;;  %v5306_v55 = vld [vmem:[%s6590_s3] ss:$0 sm:$0xff] }
  0x1b   : > { %v4196_v41 = vunpack.c.l.bf16 %v5206_v2  ;;  %v4197_v42 = vunpack.c.h.bf16 %v5206_v2  ;;  %v4228_v43 = vunpack.c.l.bf16 %v5232_v10  ;;  %v4229_v44 = vunpack.c.h.bf16 %v5232_v10  ;;  %v5056_v2 = vld [vmem:[%s6588_s1 + $0x48] sm:$0xff]  }
  0x1c   : > { %v873_v24 = vrot.slane %v871_v22, 1  ;;  %v878_v25 = vrot.slane %v876_v23, 1  ;;  %v4200_v45 = vunpack.c.l.bf16 %v5208_v3  ;;  %v4201_v46 = vunpack.c.h.bf16 %v5208_v3  ;;  %v5054_v22 = vld [vmem:[%s6588_s1 + $0x58] sm:$0xff]  }
  0x1d   : > { %v4232_v47 = vunpack.c.l.bf16 %v5234_v11  ;;  %v4233_v48 = vunpack.c.h.bf16 %v5234_v11  ;;  %4580 = vmatpush3.bf16.msra.mxu0 %v5051_v27  ;;  %5018 = vmatpush3.bf16.msra.mxu1 %v5051_v27  ;;  %v4204_v50 = vunpack.c.l.bf16 %v5210_v4  ;;  %v4205_v51 = vunpack.c.h.bf16 %v5210_v4  ;;  %v5064_v11 = vld [vmem:[%s6588_s1 + $0x20] sm:$0xff]  }
  0x1e   : > { %v874_v28 = vor.u32 %v873_v24, %v869_v21  ;;  %v4236_v52 = vunpack.c.l.bf16 %v5236_v12  ;;  %v4237_v53 = vunpack.c.h.bf16 %v5236_v12  ;;  %4581 = vmatprep.subr.bf16.mxu0 %v5052_v36  ;;  %5011 = vmatprep.subr.bf16.mxu1 %v5052_v36  ;;  %v4208_v56 = vunpack.c.l.bf16 %v5212_v5 }
  0x1f   : > { %v4209_v57 = vunpack.c.h.bf16 %v5212_v5  ;;  %v4240_v58 = vunpack.c.l.bf16 %v5238_v13  ;;  %v4241_v59 = vunpack.c.h.bf16 %v5238_v13  ;;  %v529_v60 = vmul.f32 %v4216_v29, %v5301_v54 }
  0x20   : > { %v5270_v32 = vsel %vm867_vm3, %v874_v28, %v878_v25  ;;  %v530_v61 = vmul.f32 %v4217_v30, %v5301_v54  ;;  %v515_v62 = vmul.f32 %v4188_v31, %v5301_v54  ;;  %v516_v63 = vmul.f32 %v4189_v33, %v5301_v54 }
  0x21   : > { %6601 = vst [vmem:[#allocation8_spill] sm:$0xff] %v5270_v32  ;;  %4593 = vmatprep.mubr.bf16.mxu0 %v5270_v32  ;;  %v531_v0 = vmul.f32 %v4220_v34, %v5301_v54  ;;  %v532_v1 = vmul.f32 %v4221_v35, %v5301_v54  ;;  %v517_v7 = vmul.f32 %v4192_v37, %v5301_v54  ;;  %v6602_v5 = vunpack.c.l.bf16 %v5214_v6 }
  0x22   : > { %v518_v8 = vmul.f32 %v4193_v38, %v5301_v54  ;;  %4582 = vmatpush3.bf16.msra.mxu0 %v5052_v36  ;;  %5019 = vmatpush3.bf16.msra.mxu1 %v5052_v36  ;;  %v572_v9 = vadd.f32 %v5306_v55, %v529_v60  ;;  %v573_v16 = vadd.f32 %v5306_v55, %v530_v61  ;;  %v5055_v36 = vld [vmem:[%s6588_s1 + $0x50] sm:$0xff]   ;;  %vm1543_vm4 = vcmask 1046528  }
  0x23   : > { %v558_v17 = vadd.f32 %v5306_v55, %v515_v62  ;;  %4583 = vmatprep.subr.bf16.mxu0 %v5053_v49  ;;  %5012 = vmatprep.subr.bf16.mxu1 %v5053_v49  ;;  %v559_v23 = vadd.f32 %v5306_v55, %v516_v63  ;;  %v574_v24 = vadd.f32 %v5306_v55, %v531_v0 }
  0x24   : > { %v575_v25 = vadd.f32 %v5306_v55, %v532_v1  ;;  %v640_v27 = vpack.c.bf16 %v573_v16, %v572_v9  ;;  %v560_v28 = vadd.f32 %v5306_v55, %v517_v7  ;;  %v561_v29 = vadd.f32 %v5306_v55, %v518_v8 }
  0x25   : > { %v533_v30 = vmul.f32 %v4224_v39, %v5301_v54  ;;  %v633_v31 = vpack.c.bf16 %v559_v23, %v558_v17  ;;  %v534_v34 = vmul.f32 %v4225_v40, %v5301_v54  ;;  %v519_v35 = vmul.f32 %v4196_v41, %v5301_v54 }
  0x26   : > { %v641_v33 = vpack.c.bf16 %v575_v25, %v574_v24  ;;  %4584 = vmatpush3.bf16.msra.mxu0 %v5053_v49  ;;  %5020 = vmatpush3.bf16.msra.mxu1 %v5053_v49  ;;  %v707_v37 = vshrl.u32 %v640_v27, 16  ;;  %v710_v38 = vshll.u32 %v640_v27, 16  ;;  %v634_v60 = vpack.c.bf16 %v561_v29, %v560_v28 }
  0x27   : > { %v576_v61 = vadd.f32 %v5306_v55, %v533_v30  ;;  %4585 = vmatprep.subr.bf16.mxu0 %v5054_v22  ;;  %5013 = vmatprep.subr.bf16.mxu1 %v5054_v22  ;;  %v658_v39 = vshrl.u32 %v633_v31, 16  ;;  %v661_v62 = vshll.u32 %v633_v31, 16  ;;  %v577_v49 = vadd.f32 %v5306_v55, %v534_v34 }
  0x28   : > { %v714_v63 = vshrl.u32 %v641_v33, 16  ;;  %v717_v0 = vshll.u32 %v641_v33, 16  ;;  %v709_v40 = vrot.slane %v707_v37, 7  ;;  %v665_v1 = vshrl.u32 %v634_v60, 16 }
  0x29   : > { %v668_v41 = vshll.u32 %v634_v60, 16  ;;  %v660_v7 = vrot.slane %v658_v39, 7  ;;  %v5344_v9 = vmul.f32 %v4197_v42, %v5301_v54  ;;  %v5352_v25 = vadd.f32 %v5306_v55, %v519_v35 }
  0x2a   : > { %v716_v8 = vrot.slane %v714_v63, 7  ;;  %4586 = vmatpush3.bf16.msra.mxu0 %v5054_v22  ;;  %5021 = vmatpush3.bf16.msra.mxu1 %v5054_v22  ;;  %v712_v17 = vor.u32 %v710_v38, %v709_v40  ;;  %v5349_v23 = vsel %vm5245_vm2, %v709_v40, 0  ;;  %v667_v24 = vrot.slane %v665_v1, 7 }
  0x2b   : > { %4587 = vmatprep.subr.bf16.mxu0 %v5055_v36  ;;  %5014 = vmatprep.subr.bf16.mxu1 %v5055_v36  ;;  %v972_v42 = vshll.u32 %v5349_v23, 16  ;;  %v663_v27 = vor.u32 %v661_v62, %v660_v7  ;;  %v5360_v22 = vsel %vm5245_vm2, %v660_v7, 0  ;;  %v642_v33 = vpack.c.bf16 %v577_v49, %v576_v61  ;;  %v5057_v61 = vld [vmem:[%s6588_s1 + $0x40] sm:$0xff]  }
  0x2c   : > { %v719_v28 = vor.u32 %v717_v0, %v716_v8  ;;  %v5364_v29 = vsel %vm5245_vm2, 0, %v712_v17  ;;  %v888_v30 = vshll.u32 %v5360_v22, 16  ;;  %v5369_v31 = vsel %vm5245_vm2, %v716_v8, 0 }
  0x2d   : > { %v965_v34 = vshrl.u32 %v5364_v29, 16  ;;  %v967_v35 = vshll.u32 %v5364_v29, 16  ;;  %v974_v37 = vrot.slane %v972_v42, 1  ;;  %v5375_v38 = vsel %vm5245_vm2, 0, %v663_v27 }
  0x2e   : > { %4588 = vmatpush3.bf16.msra.mxu0 %v5055_v36  ;;  %5022 = vmatpush3.bf16.msra.mxu1 %v5055_v36  ;;  %v881_v60 = vshrl.u32 %v5375_v38, 16  ;;  %v883_v39 = vshll.u32 %v5375_v38, 16  ;;  %v890_v62 = vrot.slane %v888_v30, 1  ;;  %v5381_v63 = vsel %vm5245_vm2, 0, %v719_v28  ;;  %v5058_v30 = vld [vmem:[%s6588_s1 + $0x38] sm:$0xff]  }
  0x2f   : > { %4589 = vmatprep.subr.bf16.mxu0 %v5056_v2  ;;  %5015 = vmatprep.subr.bf16.mxu1 %v5056_v2  ;;  %v969_v0 = vrot.slane %v967_v35, 1  ;;  %v977_v40 = vshrl.u32 %v5381_v63, 16  ;;  %v979_v36 = vshll.u32 %v5381_v63, 16  ;;  %v984_v1 = vshll.u32 %v5369_v31, 16 }
  0x30   : > { %v885_v49 = vrot.slane %v883_v39, 1  ;;  %v670_v7 = vor.u32 %v668_v41, %v667_v24  ;;  %v5391_v8 = vsel %vm5245_vm2, %v667_v24, 0  ;;  %v721_v17 = vshrl.u32 %v642_v33, 16  ;;  %v5059_v41 = vld [vmem:[%s6588_s1 + $0xb8] sm:$0xff]  }
  0x31   : > { %v970_v42 = vor.u32 %v969_v0, %v965_v34  ;;  %v981_v27 = vrot.slane %v979_v36, 1  ;;  %v986_v28 = vrot.slane %v984_v1, 1  ;;  %v900_v35 = vshll.u32 %v5391_v8, 16 }
  0x32   : > { %4590 = vmatpush3.bf16.msra.mxu0 %v5056_v2  ;;  %5023 = vmatpush3.bf16.msra.mxu1 %v5056_v2  ;;  %v886_v16 = vor.u32 %v885_v49, %v881_v60  ;;  %v5402_v24 = vsel %vm5245_vm2, 0, %v670_v7  ;;  %v723_v34 = vrot.slane %v721_v17, 7  ;;  %v724_v39 = vshll.u32 %v642_v33, 16 }
  0x33   : > { %4591 = vmatprep.subr.bf16.mxu0 %v5057_v61  ;;  %5016 = vmatprep.subr.bf16.mxu1 %v5057_v61  ;;  %v5405_v0 = vsel %vm867_vm3, %v970_v42, %v974_v37  ;;  %v982_v36 = vor.u32 %v981_v27, %v977_v40  ;;  %v893_v1 = vshrl.u32 %v5402_v24, 16  ;;  %v895_v2 = vshll.u32 %v5402_v24, 16 }
  0x34   : > { %4609 = vmatprep.mubr.bf16.mxu1 %v5405_v0  ;;  %v5411_v60 = vsel %vm867_vm3, %v886_v16, %v890_v62  ;;  %v902_v49 = vrot.slane %v900_v35, 1  ;;  %v726_v7 = vor.u32 %v724_v39, %v723_v34  ;;  %v5415_v33 = vsel %vm5245_vm2, %v723_v34, 0  ;;  %v5060_v16 = vld [vmem:[%s6588_s1 + $0x30] sm:$0xff]  }
  0x35   : > { %v5418_v17 = vsel %vm867_vm3, %v982_v36, %v986_v28  ;;  %v897_v37 = vrot.slane %v895_v2, 1  ;;  %v996_v40 = vshll.u32 %v5415_v33, 16  ;;  %v563_v42 = vadd.f32 %v5306_v55, %v5344_v9 }
  0x36   : > { %4592 = vmatpush3.bf16.msra.mxu0 %v5057_v61  ;;  %5024 = vmatpush3.bf16.msra.mxu1 %v5057_v61  ;;  %v5428_v62 = vsel %vm5245_vm2, 0, %v726_v7  ;;  %v535_v27 = vmul.f32 %v4228_v43, %v5301_v54  ;;  %v536_v28 = vmul.f32 %v4229_v44, %v5301_v54  ;;  %v521_v9 = vmul.f32 %v4200_v45, %v5301_v54  ;;  %v5061_v61 = vld [vmem:[%s6588_s1 + $0xb0] sm:$0xff]  }
  0x37   : > { %4625 = vmatprep.subr.bf16.mxu1 %v5058_v30  ;;  %4673 = vmatprep.subr.bf16.mxu0 %v5059_v41  ;;  %v898_v35 = vor.u32 %v897_v37, %v893_v1  ;;  %v989_v34 = vshrl.u32 %v5428_v62, 16  ;;  %v991_v39 = vshll.u32 %v5428_v62, 16  ;;  %v998_v43 = vrot.slane %v996_v40, 1 }
  0x38   : > { %v635_v36 = vpack.c.bf16 %v563_v42, %v5352_v25  ;;  %v578_v10 = vadd.f32 %v5306_v55, %v535_v27  ;;  %v579_v44 = vadd.f32 %v5306_v55, %v536_v28  ;;  %v522_v45 = vmul.f32 %v4201_v46, %v5301_v54 }
  0x39   : > { %4594 = vmatmul.mubr.bf16.vlgmr.msra.gmra.mxu0 %v5411_v60  ;;  %4610 = vmatmul.mubr.bf16.vlgmr.msra.gmra.mxu1 %v5418_v17  ;;  %v5453_v1 = vsel %vm867_vm3, %v898_v35, %v902_v49  ;;  %v993_v2 = vrot.slane %v991_v39, 1  ;;  %v564_v7 = vadd.f32 %v5306_v55, %v521_v9  ;;  %v537_v25 = vmul.f32 %v4232_v47, %v5301_v54  ;;  %v5062_v49 = vld [vmem:[%s6588_s1 + $0x28] sm:$0xff]  }
  0x3a   : > { %4626 = vmatpush3.bf16.msra.mxu1 %v5058_v30  ;;  %4674 = vmatpush3.bf16.msra.mxu0 %v5059_v41  ;;  %v672_v37 = vshrl.u32 %v635_v36, 16  ;;  %v675_v40 = vshll.u32 %v635_v36, 16  ;;  %v643_v3 = vpack.c.bf16 %v579_v44, %v578_v10  ;;  %v565_v46 = vadd.f32 %v5306_v55, %v522_v45  ;;  %v5063_v35 = vld [vmem:[%s6588_s1 + $0xa8] sm:$0xff]  }
  0x3b   : > { %4627 = vmatprep.subr.bf16.mxu1 %v5060_v16  ;;  %4675 = vmatprep.subr.bf16.mxu0 %v5061_v61  ;;  %v994_v42 = vor.u32 %v993_v2, %v989_v34  ;;  %v538_v27 = vmul.f32 %v4233_v48, %v5301_v54  ;;  %v580_v47 = vadd.f32 %v5306_v55, %v537_v25  ;;  %v5065_v2 = vld [vmem:[%s6588_s1 + $0xa0] sm:$0xff]  }
  0x3c   : > { %4597 = vmatprep.mubr.bf16.mxu0 %v5453_v1  ;;  %v674_v41 = vrot.slane %v672_v37, 7  ;;  %v728_v28 = vshrl.u32 %v643_v3, 16  ;;  %v731_v9 = vshll.u32 %v643_v3, 16  ;;  %v636_v34 = vpack.c.bf16 %v565_v46, %v564_v7 }
  0x3d   : > { %v5473_v39 = vsel %vm867_vm3, %v994_v42, %v998_v43  ;;  %v581_v48 = vadd.f32 %v5306_v55, %v538_v27  ;;  %v523_v36 = vmul.f32 %v4204_v50, %v5301_v54  ;;  %v524_v10 = vmul.f32 %v4205_v51, %v5301_v54 }
  0x3e   : > { %4628 = vmatpush3.bf16.msra.mxu1 %v5060_v16  ;;  %4676 = vmatpush3.bf16.msra.mxu0 %v5061_v61  ;;  %v677_v44 = vor.u32 %v675_v40, %v674_v41  ;;  %v5487_v43 = vsel %vm5245_vm2, %v674_v41, 0  ;;  %v730_v45 = vrot.slane %v728_v28, 7  ;;  %v679_v7 = vshrl.u32 %v636_v34, 16 }
  0x3f   : > { %4613 = vmatprep.mubr.bf16.mxu1 %v5473_v39  ;;  %v912_v50 = vshll.u32 %v5487_v43, 16  ;;  %4629 = vmatprep.subr.bf16.mxu1 %v5062_v49  ;;  %v682_v4 = vshll.u32 %v636_v34, 16  ;;  %v644_v51 = vpack.c.bf16 %v581_v48, %v580_v47  ;;  %v566_v16 = vadd.f32 %v5306_v55, %v523_v36  ;;  %v5066_v47 = vld [vmem:[%s6588_s1 + $0x18] sm:$0xff]  }
  0x40   : > { %v5497_v61 = vsel %vm5245_vm2, 0, %v677_v44  ;;  %v733_v25 = vor.u32 %v731_v9, %v730_v45  ;;  %v5501_v37 = vsel %vm5245_vm2, %v730_v45, 0  ;;  %4677 = vmatprep.subr.bf16.mxu0 %v5063_v35  ;;  %v681_v40 = vrot.slane %v679_v7, 7  ;;  %v5067_v48 = vld [vmem:[%s6588_s1 + $0x98] sm:$0xff]  }
  0x41   : > { %v905_v3 = vshrl.u32 %v5497_v61, 16  ;;  %v907_v46 = vshll.u32 %v5497_v61, 16  ;;  %v914_v42 = vrot.slane %v912_v50, 1  ;;  %v1008_v27 = vshll.u32 %v5501_v37, 16 }
  0x42   : > { %v5511_v41 = vsel %vm5245_vm2, 0, %v733_v25  ;;  %4630 = vmatpush3.bf16.msra.mxu1 %v5062_v49  ;;  %4678 = vmatpush3.bf16.msra.mxu0 %v5063_v35  ;;  %v684_v28 = vor.u32 %v682_v4, %v681_v40  ;;  %v5515_v9 = vsel %vm5245_vm2, %v681_v40, 0  ;;  %v735_v34 = vshrl.u32 %v644_v51, 16 }
  0x43   : > { %v909_v36 = vrot.slane %v907_v46, 1  ;;  %v1001_v44 = vshrl.u32 %v5511_v41, 16  ;;  %v1003_v45 = vshll.u32 %v5511_v41, 16  ;;  %v1010_v7 = vrot.slane %v1008_v27, 1  ;;  %4631 = vmatprep.subr.bf16.mxu1 %v5064_v11  ;;  %4679 = vmatprep.subr.bf16.mxu0 %v5065_v2  ;;  %v5069_v27 = vld [vmem:[%s6588_s1 + $0x90] sm:$0xff]  }
  0x44   : > { %v5524_v49 = vsel %vm5245_vm2, 0, %v684_v28  ;;  %v924_v35 = vshll.u32 %v5515_v9, 16  ;;  %v737_v50 = vrot.slane %v735_v34, 7  ;;  %v738_v4 = vshll.u32 %v644_v51, 16 }
  0x45   : > { %v910_v25 = vor.u32 %v909_v36, %v905_v3  ;;  %v1005_v40 = vrot.slane %v1003_v45, 1  ;;  %v917_v30 = vshrl.u32 %v5524_v49, 16  ;;  %v919_v46 = vshll.u32 %v5524_v49, 16 }
  0x46   : > { %4632 = vmatpush3.bf16.msra.mxu1 %v5064_v11  ;;  %4680 = vmatpush3.bf16.msra.mxu0 %v5065_v2  ;;  %v926_v26 = vrot.slane %v924_v35, 1  ;;  %v740_v21 = vor.u32 %v738_v4, %v737_v50  ;;  %v5534_v28 = vsel %vm5245_vm2, %v737_v50, 0  ;;  %v567_v51 = vadd.f32 %v5306_v55, %v524_v10 }
  0x47   : > { %v5538_v3 = vsel %vm867_vm3, %v910_v25, %v914_v42  ;;  %v1006_v34 = vor.u32 %v1005_v40, %v1001_v44  ;;  %v921_v36 = vrot.slane %v919_v46, 1  ;;  %v1020_v45 = vshll.u32 %v5534_v28, 16  ;;  %4633 = vmatprep.subr.bf16.mxu1 %v5066_v47  ;;  %4681 = vmatprep.subr.bf16.mxu0 %v5067_v48  ;;  %v5068_v44 = vld [vmem:[%s6588_s1 + $0x10] sm:$0xff]   ;;  %v5071_v46 = vld [vmem:[%s6588_s1 + $0x88] sm:$0xff]  }
  0x48   : > { %4598 = vmatmul.mubr.bf16.gmra.mxu0 %v5538_v3  ;;  %v5544_v11 = vsel %vm5245_vm2, 0, %v740_v21  ;;  %v637_v2 = vpack.c.bf16 %v567_v51, %v566_v16  ;;  %v539_v10 = vmul.f32 %v4236_v52, %v5301_v54  ;;  %v540_v42 = vmul.f32 %v4237_v53, %v5301_v54 }
  0x49   : > { %v5556_v35 = vsel %vm867_vm3, %v1006_v34, %v1010_v7  ;;  %v922_v50 = vor.u32 %v921_v36, %v917_v30  ;;  %v1013_v21 = vshrl.u32 %v5544_v11, 16  ;;  %v1015_v16 = vshll.u32 %v5544_v11, 16 }
  0x4a   : > { %4614 = vmatmul.mubr.bf16.gmra.mxu1 %v5556_v35  ;;  %v1022_v4 = vrot.slane %v1020_v45, 1  ;;  %v686_v52 = vshrl.u32 %v637_v2, 16  ;;  %v689_v25 = vshll.u32 %v637_v2, 16  ;;  %v582_v12 = vadd.f32 %v5306_v55, %v539_v10  ;;  %4682 = vmatpush3.bf16.msra.mxu0 %v5067_v48  ;;  %v5070_v48 = vld [vmem:[%s6588_s1 + $0x8] sm:$0xff]  }
  0x4b   : > { %v5563_v53 = vsel %vm867_vm3, %v922_v50, %v926_v26  ;;  %v1017_v40 = vrot.slane %v1015_v16, 1  ;;  %v583_v7 = vadd.f32 %v5306_v55, %v540_v42  ;;  %4634 = vmatpush3.bf16.msra.mxu1 %v5066_v47  ;;  %4683 = vmatprep.subr.bf16.mxu0 %v5069_v27  ;;  %v525_v30 = vmul.f32 %v4208_v56, %v5301_v54  ;;  %v5073_v16 = vld [vmem:[%s6588_s1 + $0x80] sm:$0xff]  }
  0x4c   : > { %4601 = vmatprep.mubr.bf16.mxu0 %v5563_v53  ;;  %v688_v51 = vrot.slane %v686_v52, 7  ;;  %4635 = vmatprep.subr.bf16.mxu1 %v5068_v44  ;;  %v526_v26 = vmul.f32 %v4209_v57, %v5301_v54  ;;  %v541_v47 = vmul.f32 %v4240_v58, %v5301_v54  ;;  %v542_v56 = vmul.f32 %v4241_v59, %v5301_v54 }
  0x4d   : > { %v1018_v34 = vor.u32 %v1017_v40, %v1013_v21  ;;  %v645_v36 = vpack.c.bf16 %v583_v7, %v582_v12  ;;  %v568_v45 = vadd.f32 %v5306_v55, %v525_v30  ;;  %v527_v57 = vmul.f32 %v6602_v5, %v5301_v54 }
  0x4e   : > { %v691_v2 = vor.u32 %v689_v25, %v688_v51  ;;  %v5591_v58 = vsel %vm5245_vm2, %v688_v51, 0  ;;  %4684 = vmatpush3.bf16.msra.mxu0 %v5069_v27  ;;  %v569_v13 = vadd.f32 %v5306_v55, %v526_v26  ;;  %v584_v59 = vadd.f32 %v5306_v55, %v541_v47 }
  0x4f   : > { %v5596_v10 = vsel %vm867_vm3, %v1018_v34, %v1022_v4  ;;  %v936_v42 = vshll.u32 %v5591_v58, 16  ;;  %v742_v50 = vshrl.u32 %v645_v36, 16  ;;  %v745_v21 = vshll.u32 %v645_v36, 16  ;;  %4636 = vmatpush3.bf16.msra.mxu1 %v5068_v44  ;;  %4685 = vmatprep.subr.bf16.mxu0 %v5071_v46  ;;  %v5072_v44 = vld [vmem:[%s6588_s1] sm:$0xff]  }
  0x50   : > { %6603 = vst [vmem:[#allocation9_spill] sm:$0xff] %v5596_v10  ;;  %4617 = vmatprep.mubr.bf16.mxu1 %v5596_v10  ;;  %v5605_v27 = vsel %vm5245_vm2, 0, %v691_v2  ;;  %v638_v52 = vpack.c.bf16 %v569_v13, %v568_v45  ;;  %v585_v4 = vadd.f32 %v5306_v55, %v542_v56  ;;  %v6604_v25 = vunpack.c.h.bf16 %v5214_v6  ;;  %4637 = vmatprep.subr.bf16.mxu1 %v5070_v48  ;;  %v5625_v2 = vld [vmem:[%s6588_s1 + $0xf8] sm:$0xff]  }
  0x51   : > { %v929_v40 = vshrl.u32 %v5605_v27, 16  ;;  %v931_v7 = vshll.u32 %v5605_v27, 16  ;;  %v938_v30 = vrot.slane %v936_v42, 1  ;;  %v744_v51 = vrot.slane %v742_v50, 7 }
  0x52   : > { %v528_v12 = vmul.f32 %v6604_v25, %v5301_v54  ;;  %v693_v26 = vshrl.u32 %v638_v52, 16  ;;  %v696_v47 = vshll.u32 %v638_v52, 16  ;;  %v646_v34 = vpack.c.bf16 %v585_v4, %v584_v59  ;;  %4686 = vmatpush3.bf16.msra.mxu0 %v5071_v46 }
  0x53   : > { %v570_v56 = vadd.f32 %v5306_v55, %v527_v57  ;;  %v933_v36 = vrot.slane %v931_v7, 1  ;;  %v747_v6 = vor.u32 %v745_v21, %v744_v51  ;;  %v5619_v45 = vsel %vm5245_vm2, %v744_v51, 0  ;;  %4638 = vmatpush3.bf16.msra.mxu1 %v5070_v48  ;;  %4687 = vmatprep.subr.bf16.mxu0 %v5073_v16  ;;  %v5630_v57 = vld [vmem:[%s6588_s1 + $0x138] sm:$0xff]  }
  0x54   : > { %v571_v5 = vadd.f32 %v5306_v55, %v528_v12  ;;  %v1032_v46 = vshll.u32 %v5619_v45, 16  ;;  %v695_v13 = vrot.slane %v693_v26, 7  ;;  %v749_v59 = vshrl.u32 %v646_v34, 16  ;;  %4639 = vmatprep.subr.bf16.mxu1 %v5072_v44 }
  0x55   : > { %v752_v42 = vshll.u32 %v646_v34, 16  ;;  %v934_v50 = vor.u32 %v933_v36, %v929_v40  ;;  %v5635_v48 = vsel %vm5245_vm2, 0, %v747_v6  ;;  %v6605_v52 = vunpack.c.l.bf16 %v5240_v14 }
  0x56   : > { %v639_v21 = vpack.c.bf16 %v571_v5, %v570_v56  ;;  %v1025_v25 = vshrl.u32 %v5635_v48, 16  ;;  %v1027_v12 = vshll.u32 %v5635_v48, 16  ;;  %v1034_v7 = vrot.slane %v1032_v46, 1  ;;  %4688 = vmatpush3.bf16.msra.mxu0 %v5073_v16 }
  0x57   : > { %v543_v4 = vmul.f32 %v6605_v52, %v5301_v54  ;;  %v698_v51 = vor.u32 %v696_v47, %v695_v13  ;;  %v5643_v26 = vsel %vm867_vm3, %v934_v50, %v938_v30  ;;  %v5647_v40 = vsel %vm5245_vm2, %v695_v13, 0  ;;  %4640 = vmatpush3.bf16.msra.mxu1 %v5072_v44  ;;  %4769 = vmatprep.subr.bf16.mxu0 %v5630_v57 }
  0x58   : > { %v751_v34 = vrot.slane %v749_v59, 7  ;;  %v700_v56 = vshrl.u32 %v639_v21, 16  ;;  %4602 = vmatmul.mubr.bf16.gmra.mxu0 %v5643_v26  ;;  %v1029_v36 = vrot.slane %v1027_v12, 1  ;;  %v948_v16 = vshll.u32 %v5647_v40, 16  ;;  %4721 = vmatprep.subr.bf16.mxu1 %v5625_v2 }
  0x59   : > { %v5653_v6 = vsel %vm5245_vm2, 0, %v698_v51  ;;  %v703_v30 = vshll.u32 %v639_v21, 16  ;;  %v6606_v51 = vunpack.c.h.bf16 %v5240_v14 }
  0x5a   : > { %v941_v47 = vshrl.u32 %v5653_v6, 16  ;;  %v943_v5 = vshll.u32 %v5653_v6, 16  ;;  %v754_v46 = vor.u32 %v752_v42, %v751_v34  ;;  %v5661_v44 = vsel %vm5245_vm2, %v751_v34, 0 }
  0x5b   : > { %v1030_v13 = vor.u32 %v1029_v36, %v1025_v25  ;;  %v950_v59 = vrot.slane %v948_v16, 1  ;;  %v1044_v50 = vshll.u32 %v5661_v44, 16  ;;  %v702_v52 = vrot.slane %v700_v56, 7 }
  0x5c   : > { %v945_v12 = vrot.slane %v943_v5, 1  ;;  %v5666_v21 = vsel %vm5245_vm2, 0, %v754_v46  ;;  %v544_v32 = vmul.f32 %v6606_v51, %v5301_v54  ;;  %v586_v42 = vadd.f32 %v5306_v55, %v543_v4 }
  0x5d   : > { %v5673_v10 = vsel %vm867_vm3, %v1030_v13, %v1034_v7  ;;  %v1037_v25 = vshrl.u32 %v5666_v21, 16  ;;  %v1039_v34 = vshll.u32 %v5666_v21, 16  ;;  %v705_v36 = vor.u32 %v703_v30, %v702_v52 }
  0x5e   : > { %4618 = vmatmul.mubr.bf16.gmra.mxu1 %v5673_v10  ;;  %v946_v56 = vor.u32 %v945_v12, %v941_v47  ;;  %v5680_v16 = vsel %vm5245_vm2, %v702_v52, 0  ;;  %v587_v14 = vadd.f32 %v5306_v55, %v544_v32  ;;  %v1046_v5 = vrot.slane %v1044_v50, 1 }
  0x5f   : > { %v1041_v54 = vrot.slane %v1039_v34, 1  ;;  %v960_v4 = vshll.u32 %v5680_v16, 16  ;;  %v5689_v46 = vsel %vm5245_vm2, 0, %v705_v36  ;;  %v1544_v50 = vrot.slane %v5251_v19, 1 }
  0x60   : > { %v5685_v7 = vsel %vm867_vm3, %v946_v56, %v950_v59  ;;  %v647_v13 = vpack.c.bf16 %v587_v14, %v586_v42  ;;  %v953_v47 = vshrl.u32 %v5689_v46, 16  ;;  %v955_v52 = vshll.u32 %v5689_v46, 16 }
  0x61   : > { %4605 = vmatprep.mubr.bf16.mxu0 %v5685_v7  ;;  %v1042_v30 = vor.u32 %v1041_v54, %v1037_v25  ;;  %v1545_v12 = vrot.slane %v5255_v20, 1  ;;  %v962_v34 = vrot.slane %v960_v4, 1  ;;  %v1548_v4 = vrot.slane %v5360_v22, 1  ;;  %v5077_v22 = vld [vmem:[%s6588_s1 + $0x130] sm:$0xff]  }
  0x62   : > { %v756_v32 = vshrl.u32 %v647_v13, 16  ;;  %v759_v55 = vshll.u32 %v647_v13, 16  ;;  %v957_v51 = vrot.slane %v955_v52, 1 }
  0x63   : > { %v5697_v59 = vsel %vm867_vm3, %v1042_v30, %v1046_v5  ;;  %v5705_v14 = vsel %vm1543_vm4, %v1544_v50, %v1545_v12  ;;  %v1551_v50 = vrot.slane %v5391_v8, 1  ;;  %v1553_v8 = vrot.slane %v5497_v61, 1 }
  0x64   : > { %4621 = vmatprep.mubr.bf16.mxu1 %v5697_v59  ;;  %v758_v42 = vrot.slane %v756_v32, 7  ;;  %v958_v25 = vor.u32 %v957_v51, %v953_v47  ;;  %6607 = vst [vmem:[#allocation10_spill] sm:$0xff] %v5705_v14  ;;  %v1547_v47 = vrot.slane %v5375_v38, 1 }
  0x66   : > { %v761_v56 = vor.u32 %v759_v55, %v758_v42  ;;  %v5702_v36 = vsel %vm5245_vm2, %v758_v42, 0  ;;  %v5708_v20 = vsel %vm867_vm3, %v958_v25, %v962_v34  ;;  %v1550_v55 = vrot.slane %v5402_v24, 1 }
  0x67   : > { %v1056_v54 = vshll.u32 %v5702_v36, 16  ;;  %4606 = vmatmul.mubr.bf16.gmra.mxu0 %v5708_v20  ;;  %v5724_v51 = vsel %vm1543_vm4, %v1547_v47, %v1548_v4  ;;  %v1554_v25 = vrot.slane %v5487_v43, 1  ;;  %v5079_v4 = vld [vmem:[%s6588_s1 + $0x128] sm:$0xff]   ;;  %v5076_v43 = vld [vmem:[%s6588_s1 + $0xf0] sm:$0xff]   ;;  %v1560_v47 = vrot.slane %v5591_v58, 1  ;;  %v5080_v58 = vld [vmem:[%s6588_s1 + $0xe0] sm:$0xff]  }
  0x68   : > { %v5714_v5 = vsel %vm5245_vm2, 0, %v761_v56  ;;  %4689 = vmatprep.mubr.bf16.mxu0 %v5705_v14  ;;  %v5733_v42 = vsel %vm1543_vm4, %v1550_v55, %v1551_v50  ;;  %v1556_v56 = vrot.slane %v5524_v49, 1  ;;  %v1563_v55 = vrot.slane %v5647_v40, 1 }
  0x69   : > { %v1049_v13 = vshrl.u32 %v5714_v5, 16  ;;  %v1051_v30 = vshll.u32 %v5714_v5, 16  ;;  %v1058_v32 = vrot.slane %v1056_v54, 1  ;;  %v1557_v54 = vrot.slane %v5515_v9, 1 }
  0x6a   : > { %v1565_v40 = vrot.slane %v5689_v46, 1 }
  0x6b   : > { %v1053_v52 = vrot.slane %v1051_v30, 1  ;;  %v5754_v9 = vsel %vm1543_vm4, %v1556_v56, %v1557_v54  ;;  %v1559_v30 = vrot.slane %v5605_v27, 1  ;;  %v1569_v56 = vrot.slane %v5349_v23, 1  ;;  %v5082_v54 = vld [vmem:[%s6588_s1 + $0xd8] sm:$0xff]   ;;  %v5087_v23 = vld [vmem:[%s6588_s1 + $0x108] sm:$0xff]  }
  0x6d   : > { %v1054_v12 = vor.u32 %v1053_v52, %v1049_v13  ;;  %v5748_v13 = vsel %vm1543_vm4, %v1553_v8, %v1554_v25  ;;  %v5078_v52 = vld [vmem:[%s6588_s1 + $0xe8] sm:$0xff]   ;;  %v5085_v8 = vld [vmem:[%s6588_s1 + $0x110] sm:$0xff]   ;;  %v1568_v25 = vrot.slane %v5364_v29, 1 }
  0x6f   : > { %v5730_v34 = vsel %vm867_vm3, %v1054_v12, %v1058_v32  ;;  %4690 = vmatmul.mubr.bf16.vlgmr.msra.gmra.mxu0 %v5724_v51  ;;  %v1562_v32 = vrot.slane %v5653_v6, 1  ;;  %v5083_v12 = vld [vmem:[%s6588_s1 + $0x118] sm:$0xff]  }
  0x70   : > { %6608 = vst [vmem:[#allocation11_spill] sm:$0xff] %v5730_v34  ;;  %4622 = vmatmul.mubr.bf16.gmra.mxu1 %v5730_v34  ;;  %4770 = vmatpush3.bf16.msra.mxu0 %v5630_v57  ;;  %v5081_v57 = vld [vmem:[%s6588_s1 + $0x120] sm:$0xff]  }
  0x71   : > { %4641 = vmatprep.mubr.bf16.mxu1 %v5251_v19  ;;  %4693 = vmatprep.mubr.bf16.mxu0 %v5733_v42  ;;  %v5778_v50 = vsel %vm1543_vm4, %v1562_v32, %v1563_v55  ;;  %v5086_v32 = vld [vmem:[%s6588_s1 + $0xc8] sm:$0xff]   ;;  %v5089_v55 = vld [vmem:[%s6588_s1 + $0x100] sm:$0xff]  }
  0x72   : > { %4771 = vmatprep.subr.bf16.mxu0 %v5077_v22 }
  0x74   : > { %4772 = vmatpush3.bf16.msra.mxu0 %v5077_v22  ;;  %v1566_v22 = vrot.slane %v5680_v16, 1  ;;  %v5801_v16 = vsel %vm1543_vm4, %v1568_v25, %v1569_v56  ;;  %v1581_v25 = vrot.slane %v5534_v28, 1  ;;  %v5090_v56 = vld [vmem:[%s6588_s1 + $0x178] sm:$0xff]   ;;  %v1584_v28 = vrot.slane %v5619_v45, 1 }
  0x75   : > { %4773 = vmatprep.subr.bf16.mxu0 %v5079_v4  ;;  %v1589_v45 = vrot.slane %v5714_v5, 1 }
  0x77   : > { %4694 = vmatmul.mubr.bf16.gmra.mxu0 %v5748_v13 }
  0x78   : > { %4642 = vmatmul.mubr.bf16.vlgmr.msra.gmra.mxu1 %v5375_v38  ;;  %4697 = vmatprep.mubr.bf16.mxu0 %v5754_v9 }
  0x79   : > { %4722 = vmatpush3.bf16.msra.mxu1 %v5625_v2  ;;  %4645 = vmatprep.mubr.bf16.mxu1 %v5402_v24  ;;  %v5772_v2 = vsel %vm1543_vm4, %v1559_v30, %v1560_v47  ;;  %v1572_v30 = vrot.slane %v5369_v31, 1  ;;  %v1574_v47 = vrot.slane %v5428_v62, 1 }
  0x7a   : > { %4723 = vmatprep.subr.bf16.mxu1 %v5076_v43  ;;  %4774 = vmatpush3.bf16.msra.mxu0 %v5079_v4  ;;  %v5798_v4 = vsel %vm1543_vm4, %v1565_v40, %v1566_v22  ;;  %v1577_v40 = vrot.slane %v5511_v41, 1  ;;  %v1578_v22 = vrot.slane %v5501_v37, 1  ;;  %v1583_v37 = vrot.slane %v5635_v48, 1 }
  0x7b   : > { %4775 = vmatprep.subr.bf16.mxu0 %v5081_v57 }
  0x7d   : > { %4724 = vmatpush3.bf16.msra.mxu1 %v5076_v43  ;;  %v5084_v43 = vld [vmem:[%s6588_s1 + $0xd0] sm:$0xff]  }
  0x7e   : > { %4725 = vmatprep.subr.bf16.mxu1 %v5078_v52  ;;  %4776 = vmatpush3.bf16.msra.mxu0 %v5081_v57  ;;  %v1571_v57 = vrot.slane %v5381_v63, 1 }
  0x7f   : > { %4698 = vmatmul.mubr.bf16.gmra.mxu0 %v5772_v2  ;;  %4777 = vmatprep.subr.bf16.mxu0 %v5083_v12 }
  0x80   : > { %4646 = vmatmul.mubr.bf16.gmra.mxu1 %v5497_v61  ;;  %4701 = vmatprep.mubr.bf16.mxu0 %v5778_v50 }
  0x81   : > { %4649 = vmatprep.mubr.bf16.mxu1 %v5524_v49  ;;  %4726 = vmatpush3.bf16.msra.mxu1 %v5078_v52  ;;  %v1575_v52 = vrot.slane %v5415_v33, 1  ;;  %v5088_v33 = vld [vmem:[%s6588_s1 + $0xc0] sm:$0xff]  }
  0x82   : > { %4727 = vmatprep.subr.bf16.mxu1 %v5080_v58  ;;  %4778 = vmatpush3.bf16.msra.mxu0 %v5083_v12  ;;  %v5091_v12 = vld [vmem:[%s6588_s1 + $0x1b8] sm:$0xff]  }
  0x83   : > { %4779 = vmatprep.subr.bf16.mxu0 %v5085_v8  ;;  %v5827_v31 = vsel %vm1543_vm4, %v1574_v47, %v1575_v52  ;;  %v1590_v52 = vrot.slane %v5702_v36, 1  ;;  %v5095_v36 = vld [vmem:[%s6588_s1 + $0x1a8] sm:$0xff]  }
  0x85   : > { %4728 = vmatpush3.bf16.msra.mxu1 %v5080_v58  ;;  %v5824_v58 = vsel %vm1543_vm4, %v1571_v57, %v1572_v30  ;;  %v1587_v57 = vrot.slane %v5661_v44, 1  ;;  %v5861_v30 = vsel %vm1543_vm4, %v1583_v37, %v1584_v28  ;;  %v5873_v44 = vsel %vm1543_vm4, %v1589_v45, %v1590_v52  ;;  %v5098_v37 = vld [vmem:[%s6588_s1 + $0x158] sm:$0xff]   ;;  %v5123_v28 = vld [vmem:[%s6590_s3] ss:$0 sm:$0xff]  ;;  %v5100_v52 = vld [vmem:[%s6588_s1 + $0x150] sm:$0xff]  }
  0x86   : > { %4729 = vmatprep.subr.bf16.mxu1 %v5082_v54  ;;  %4780 = vmatpush3.bf16.msra.mxu0 %v5085_v8  ;;  %v1580_v8 = vrot.slane %v5544_v11, 1 }
  0x87   : > { %4702 = vmatmul.mubr.bf16.gmra.mxu0 %v5798_v4  ;;  %4781 = vmatprep.subr.bf16.mxu0 %v5087_v23 }
  0x88   : > { %4650 = vmatmul.mubr.bf16.gmra.mxu1 %v5605_v27  ;;  %4705 = vmatprep.mubr.bf16.mxu0 %v5801_v16 }
  0x89   : > { %4653 = vmatprep.mubr.bf16.mxu1 %v5653_v6  ;;  %4730 = vmatpush3.bf16.msra.mxu1 %v5082_v54  ;;  %v5847_v54 = vsel %vm1543_vm4, %v1577_v40, %v1578_v22  ;;  %v5096_v40 = vld [vmem:[%s6588_s1 + $0x160] sm:$0xff]  }
  0x8a   : > { %4731 = vmatprep.subr.bf16.mxu1 %v5084_v43  ;;  %4782 = vmatpush3.bf16.msra.mxu0 %v5087_v23  ;;  %v1586_v23 = vrot.slane %v5666_v21, 1  ;;  %v5122_v22 = vld [vmem:[%s6589_s2] ss:$0 sm:$0xff] }
  0x8b   : > { %4783 = vmatprep.subr.bf16.mxu0 %v5089_v55 }
  0x8c   : > { %v5864_v47 = vsel %vm1543_vm4, %v1586_v23, %v1587_v57 }
  0x8d   : > { %4732 = vmatpush3.bf16.msra.mxu1 %v5084_v43  ;;  %v5850_v43 = vsel %vm1543_vm4, %v1580_v8, %v1581_v25 }
  0x8e   : > { %4733 = vmatprep.subr.bf16.mxu1 %v5086_v32  ;;  %4784 = vmatpush3.bf16.msra.mxu0 %v5089_v55  ;;  %v5094_v55 = vld [vmem:[%s6588_s1 + $0x168] sm:$0xff]  }
  0x8f   : > { %4706 = vmatmul.mubr.bf16.gmra.mxu0 %v5824_v58  ;;  %4865 = vmatprep.subr.bf16.mxu0 %v5091_v12 }
  0x90   : > { %4654 = vmatmul.mubr.bf16.gmra.mxu1 %v5689_v46  ;;  %4709 = vmatprep.mubr.bf16.mxu0 %v5827_v31 }
  0x91   : > { %4657 = vmatprep.mubr.bf16.mxu1 %v5364_v29  ;;  %4734 = vmatpush3.bf16.msra.mxu1 %v5086_v32  ;;  %v5093_v32 = vld [vmem:[%s6588_s1 + $0x1b0] sm:$0xff]  }
  0x92   : > { %4735 = vmatprep.subr.bf16.mxu1 %v5088_v33 }
  0x95   : > { %4736 = vmatpush3.bf16.msra.mxu1 %v5088_v33  ;;  %v4248_v33 = vunpack.c.l.bf16 %v5242_v15 }
  0x96   : > { %4817 = vmatprep.subr.bf16.mxu1 %v5090_v56 }
  0x97   : > { %4710 = vmatmul.mubr.bf16.gmra.mxu0 %v5847_v54  ;;  %v545_v8 = vmul.f32 %v5122_v22, %v4248_v33 }
  0x98   : > { %4658 = vmatmul.mubr.bf16.gmra.mxu1 %v5381_v63  ;;  %4713 = vmatprep.mubr.bf16.mxu0 %v5850_v43 }
  0x99   : > { %4661 = vmatprep.mubr.bf16.mxu1 %v5428_v62  ;;  %v588_v23 = vadd.f32 %v5123_v28, %v545_v8  ;;  %v5106_v8 = vld [vmem:[%s6588_s1 + $0x1f8] sm:$0xff]  }
  0x9f   : > { %4714 = vmatmul.mubr.bf16.gmra.mxu0 %v5861_v30 }
  0xa0   : > { %4662 = vmatmul.mubr.bf16.gmra.mxu1 %v5511_v41  ;;  %4717 = vmatprep.mubr.bf16.mxu0 %v5864_v47 }
  0xa1   : > { %4665 = vmatprep.mubr.bf16.mxu1 %v5544_v11 }
  0xa7   : > { %4718 = vmatmul.mubr.bf16.gmra.mxu0 %v5873_v44 }
  0xa8   : > { %4666 = vmatmul.mubr.bf16.gmra.mxu1 %v5635_v48  ;;  %4785 = vmatprep.mubr.bf16.mxu0 %v5411_v60  ;;  %v5092_v60 = vld [vmem:[%s6588_s1 + $0x170] sm:$0xff]  }
  0xa9   : > { %4669 = vmatprep.mubr.bf16.mxu1 %v5666_v21 }
  0xaf   : > { %4786 = vmatmul.mubr.bf16.vlgmr.msra.gmra.mxu0 %v5453_v1 }
  0xb0   : > { %4670 = vmatmul.mubr.bf16.gmra.mxu1 %v5714_v5  ;;  %4866 = vmatpush3.bf16.msra.mxu0 %v5091_v12  ;;  %v4249_v12 = vunpack.c.h.bf16 %v5242_v15  ;;  %v5101_v15 = vld [vmem:[%s6588_s1 + $0x190] sm:$0xff]  }
  0xb1   : > { %4737 = vmatprep.mubr.bf16.mxu1 %v5375_v38  ;;  %4789 = vmatprep.mubr.bf16.mxu0 %v5538_v3  ;;  %v5097_v38 = vld [vmem:[%s6588_s1 + $0x1a0] sm:$0xff]  }
  0xb2   : > { %4867 = vmatprep.subr.bf16.mxu0 %v5093_v32  ;;  %v546_v25 = vmul.f32 %v5122_v22, %v4249_v12  ;;  %v5104_v12 = vld [vmem:[%s6588_s1 + $0x140] sm:$0xff]  }
  0xb4   : > { %4868 = vmatpush3.bf16.msra.mxu0 %v5093_v32  ;;  %v589_v57 = vadd.f32 %v5123_v28, %v546_v25  ;;  %v5103_v32 = vld [vmem:[%s6588_s1 + $0x188] sm:$0xff]  }
  0xb5   : > { %4869 = vmatprep.subr.bf16.mxu0 %v5095_v36 }
  0xb6   : > { %v648_v45 = vpack.c.bf16 %v589_v57, %v588_v23 }
  0xb7   : > { %4790 = vmatmul.mubr.bf16.gmra.mxu0 %v5563_v53 }
  0xb8   : > { %4738 = vmatmul.mubr.bf16.vlgmr.msra.gmra.mxu1 %v5402_v24  ;;  %4793 = vmatprep.mubr.bf16.mxu0 %v5643_v26  ;;  %v766_v33 = vshll.u32 %v648_v45, 16 }
  0xb9   : > { %4818 = vmatpush3.bf16.msra.mxu1 %v5090_v56  ;;  %4741 = vmatprep.mubr.bf16.mxu1 %v5497_v61  ;;  %v5099_v56 = vld [vmem:[%s6588_s1 + $0x198] sm:$0xff]  }
  0xba   : > { %4819 = vmatprep.subr.bf16.mxu1 %v5092_v60  ;;  %4870 = vmatpush3.bf16.msra.mxu0 %v5095_v36  ;;  %v763_v36 = vshrl.u32 %v648_v45, 16 }
  0xbb   : > { %4871 = vmatprep.subr.bf16.mxu0 %v5097_v38 }
  0xbd   : > { %4820 = vmatpush3.bf16.msra.mxu1 %v5092_v60  ;;  %v5102_v60 = vld [vmem:[%s6588_s1 + $0x148] sm:$0xff]  }
  0xbe   : > { %4821 = vmatprep.subr.bf16.mxu1 %v5094_v55  ;;  %4872 = vmatpush3.bf16.msra.mxu0 %v5097_v38  ;;  %v5105_v38 = vld [vmem:[%s6588_s1 + $0x180] sm:$0xff]  }
  0xbf   : > { %4794 = vmatmul.mubr.bf16.gmra.mxu0 %v5685_v7  ;;  %4873 = vmatprep.subr.bf16.mxu0 %v5099_v56 }
  0xc0   : > { %4742 = vmatmul.mubr.bf16.gmra.mxu1 %v5524_v49  ;;  %4797 = vmatprep.mubr.bf16.mxu0 %v5708_v20 }
  0xc1   : > { %4745 = vmatprep.mubr.bf16.mxu1 %v5605_v27  ;;  %4822 = vmatpush3.bf16.msra.mxu1 %v5094_v55  ;;  %v765_v55 = vrot.slane %v763_v36, 7  ;;  %v5111_v36 = vld [vmem:[%s6588_s1 + $0x228] sm:$0xff]  }
  0xc2   : > { %4823 = vmatprep.subr.bf16.mxu1 %v5096_v40  ;;  %4874 = vmatpush3.bf16.msra.mxu0 %v5099_v56  ;;  %v6609_v56 = vld [vmem:[#allocation9_spill] sm:$0xff] }
  0xc3   : > { %4875 = vmatprep.subr.bf16.mxu0 %v5101_v15  ;;  %v768_v22 = vor.u32 %v766_v33, %v765_v55  ;;  %v5117_v33 = vld [vmem:[%s6588_s1 + $0x210] sm:$0xff]  }
  0xc5   : > { %4824 = vmatpush3.bf16.msra.mxu1 %v5096_v40  ;;  %v5107_v40 = vld [vmem:[%s6588_s1 + $0x238] sm:$0xff]   ;;  %v5957_v25 = vsel %vm5245_vm2, 0, %v768_v22  ;;  %v5116_v22 = vld [vmem:[%s6588_s1 + $0x1d0] sm:$0xff]  }
  0xc6   : > { %4825 = vmatprep.subr.bf16.mxu1 %v5098_v37  ;;  %4876 = vmatpush3.bf16.msra.mxu0 %v5101_v15  ;;  %v2127_v15 = vshll.u32 %v5957_v25, 16  ;;  %v2125_v28 = vshrl.u32 %v5957_v25, 16 }
  0xc7   : > { %4798 = vmatmul.mubr.bf16.gmra.mxu0 %v5405_v0  ;;  %4877 = vmatprep.subr.bf16.mxu0 %v5103_v32 }
  0xc8   : > { %4746 = vmatmul.mubr.bf16.gmra.mxu1 %v5653_v6  ;;  %4801 = vmatprep.mubr.bf16.mxu0 %v5418_v17  ;;  %v2129_v23 = vrot.slane %v2127_v15, 1 }
  0xc9   : > { %4749 = vmatprep.mubr.bf16.mxu1 %v5689_v46  ;;  %4826 = vmatpush3.bf16.msra.mxu1 %v5098_v37  ;;  %v5966_v37 = vsel %vm5245_vm2, %v765_v55, 0 }
  0xca   : > { %4827 = vmatprep.subr.bf16.mxu1 %v5100_v52  ;;  %4878 = vmatpush3.bf16.msra.mxu0 %v5103_v32  ;;  %v2132_v57 = vshll.u32 %v5966_v37, 16  ;;  %v2130_v45 = vor.u32 %v2129_v23, %v2125_v28  ;;  %v5118_v28 = vld [vmem:[%s6588_s1 + $0x1c8] sm:$0xff]  }
  0xcb   : > { %4879 = vmatprep.subr.bf16.mxu0 %v5105_v38 }
  0xcd   : > { %4828 = vmatpush3.bf16.msra.mxu1 %v5100_v52  ;;  %v2134_v52 = vrot.slane %v2132_v57, 1 }
  0xce   : > { %4829 = vmatprep.subr.bf16.mxu1 %v5102_v60  ;;  %4880 = vmatpush3.bf16.msra.mxu0 %v5105_v38 }
  0xcf   : > { %4802 = vmatmul.mubr.bf16.gmra.mxu0 %v5473_v39  ;;  %4961 = vmatprep.subr.bf16.mxu0 %v5107_v40  ;;  %v5975_v32 = vsel %vm867_vm3, %v2130_v45, %v2134_v52 }
  0xd0   : > { %4750 = vmatmul.mubr.bf16.gmra.mxu1 %v5364_v29  ;;  %4805 = vmatprep.mubr.bf16.mxu0 %v5556_v35  ;;  %6610 = vst [vmem:[#allocation9_spill] sm:$0xff] %v5975_v32 }
  0xd1   : > { %4753 = vmatprep.mubr.bf16.mxu1 %v5381_v63  ;;  %4830 = vmatpush3.bf16.msra.mxu1 %v5102_v60  ;;  %v5112_v60 = vld [vmem:[%s6588_s1 + $0x1e0] sm:$0xff]  }
  0xd2   : > { %4831 = vmatprep.subr.bf16.mxu1 %v5104_v12 }
  0xd5   : > { %4832 = vmatpush3.bf16.msra.mxu1 %v5104_v12  ;;  %v5114_v12 = vld [vmem:[%s6588_s1 + $0x1d8] sm:$0xff]  }
  0xd6   : > { %4913 = vmatprep.subr.bf16.mxu1 %v5106_v8 }
  0xd7   : > { %4806 = vmatmul.mubr.bf16.gmra.mxu0 %v6609_v56 }
  0xd8   : > { %4754 = vmatmul.mubr.bf16.gmra.mxu1 %v5428_v62  ;;  %4809 = vmatprep.mubr.bf16.mxu0 %v5673_v10 }
  0xd9   : > { %4757 = vmatprep.mubr.bf16.mxu1 %v5511_v41 }
  0xdf   : > { %4810 = vmatmul.mubr.bf16.gmra.mxu0 %v5697_v59 }
  0xe0   : > { %4758 = vmatmul.mubr.bf16.gmra.mxu1 %v5544_v11  ;;  %4813 = vmatprep.mubr.bf16.mxu0 %v5730_v34 }
  0xe1   : > { %4761 = vmatprep.mubr.bf16.mxu1 %v5635_v48 }
  0xe7   : > { %4814 = vmatmul.mubr.bf16.gmra.mxu0 %v5975_v32 }
  0xe8   : > { %4762 = vmatmul.mubr.bf16.gmra.mxu1 %v5666_v21  ;;  %4881 = vmatprep.mubr.bf16.mxu0 %v5402_v24  ;;  %v5108_v24 = vld [vmem:[%s6588_s1 + $0x1f0] sm:$0xff]  }
  0xe9   : > { %4765 = vmatprep.mubr.bf16.mxu1 %v5714_v5 }
  0xef   : > { %4882 = vmatmul.mubr.bf16.vlgmr.msra.gmra.mxu0 %v5497_v61  ;;  %v5113_v61 = vld [vmem:[%s6588_s1 + $0x220] sm:$0xff]  }
  0xf0   : > { %4766 = vmatmul.mubr.bf16.gmra.mxu1 %v5957_v25  ;;  %4962 = vmatpush3.bf16.msra.mxu0 %v5107_v40 }
  0xf1   : > { %4833 = vmatprep.mubr.bf16.mxu1 %v5724_v51  ;;  %4885 = vmatprep.mubr.bf16.mxu0 %v5524_v49  ;;  %v5110_v49 = vld [vmem:[%s6588_s1 + $0x1e8] sm:$0xff]  }
  0xf2   : > { %4963 = vmatprep.subr.bf16.mxu0 %v5109_v18 }
  0xf4   : > { %4964 = vmatpush3.bf16.msra.mxu0 %v5109_v18 }
  0xf5   : > { %4965 = vmatprep.subr.bf16.mxu0 %v5111_v36 }
  0xf7   : > { %4886 = vmatmul.mubr.bf16.gmra.mxu0 %v5605_v27 }
  0xf8   : > { %4834 = vmatmul.mubr.bf16.vlgmr.msra.gmra.mxu1 %v5733_v42  ;;  %4889 = vmatprep.mubr.bf16.mxu0 %v5653_v6  ;;  %v5115_v6 = vld [vmem:[%s6588_s1 + $0x218] sm:$0xff]  }
  0xf9   : > { %4914 = vmatpush3.bf16.msra.mxu1 %v5106_v8  ;;  %4837 = vmatprep.mubr.bf16.mxu1 %v5748_v13  ;;  %v6004_v51 = vpop.f32.mrf.mxu0  ;;  %v6016_v38 = vpop.f32.mrf.mxu1 }
  0xfa   : > { %4915 = vmatprep.subr.bf16.mxu1 %v5108_v24  ;;  %4966 = vmatpush3.bf16.msra.mxu0 %v5111_v36 }
  0xfb   : > { %4967 = vmatprep.subr.bf16.mxu0 %v5113_v61  ;;  %v6006_v27 = vpop.f32.mrf.mxu0 }
  0xfd   : > { %4916 = vmatpush3.bf16.msra.mxu1 %v5108_v24  ;;  %v6019_v55 = vpop.f32.mrf.mxu0 }
  0xfe   : > { %4917 = vmatprep.subr.bf16.mxu1 %v5110_v49  ;;  %4968 = vmatpush3.bf16.msra.mxu0 %v5113_v61 }
  0xff   : > { %4890 = vmatmul.mubr.bf16.gmra.mxu0 %v5689_v46  ;;  %4969 = vmatprep.subr.bf16.mxu0 %v5115_v6  ;;  %v6028_v46 = vpop.f32.mrf.mxu1  ;;  %v6030_v40 = vpop.f32.mrf.mxu0 }
 0x100   : > { %4838 = vmatmul.mubr.bf16.gmra.mxu1 %v5754_v9  ;;  %4893 = vmatprep.mubr.bf16.mxu0 %v5364_v29  ;;  %v5119_v29 = vld [vmem:[%s6588_s1 + $0x208] sm:$0xff]  }
 0x101   : > { %4841 = vmatprep.mubr.bf16.mxu1 %v5772_v2  ;;  %4918 = vmatpush3.bf16.msra.mxu1 %v5110_v49  ;;  %v6040_v8 = vpop.f32.mrf.mxu1 }
 0x102   : > { %4919 = vmatprep.subr.bf16.mxu1 %v5112_v60  ;;  %4970 = vmatpush3.bf16.msra.mxu0 %v5115_v6 }
 0x103   : > { %4971 = vmatprep.subr.bf16.mxu0 %v5117_v33  ;;  %v6052_v23 = vpop.f32.mrf.mxu1 }
 0x105   : > { %4920 = vmatpush3.bf16.msra.mxu1 %v5112_v60 }
 0x106   : > { %4921 = vmatprep.subr.bf16.mxu1 %v5114_v12  ;;  %4972 = vmatpush3.bf16.msra.mxu0 %v5117_v33 }
 0x107   : > { %4894 = vmatmul.mubr.bf16.gmra.mxu0 %v5381_v63  ;;  %4973 = vmatprep.subr.bf16.mxu0 %v5119_v29  ;;  %v5121_v63 = vld [vmem:[%s6588_s1 + $0x200] sm:$0xff]  }
 0x108   : > { %4842 = vmatmul.mubr.bf16.gmra.mxu1 %v5778_v50  ;;  %4897 = vmatprep.mubr.bf16.mxu0 %v5428_v62  ;;  %v6044_v15 = vpop.f32.mrf.mxu0  ;;  %v5120_v62 = vld [vmem:[%s6588_s1 + $0x1c0] sm:$0xff]  }
 0x109   : > { %4845 = vmatprep.mubr.bf16.mxu1 %v5798_v4  ;;  %4922 = vmatpush3.bf16.msra.mxu1 %v5114_v12  ;;  %v2398_v12 = vrot.slane %v5966_v37, 1 }
 0x10a   : > { %4923 = vmatprep.subr.bf16.mxu1 %v5116_v22  ;;  %v6054_v57 = vpop.f32.mrf.mxu0  ;;  %4974 = vmatpush3.bf16.msra.mxu0 %v5119_v29  ;;  %v6061_v45 = vpop.f32.mrf.mxu1 }
 0x10b   : > { %4975 = vmatprep.subr.bf16.mxu0 %v5121_v63 }
 0x10c   : > { %v6065_v52 = vpop.f32.mrf.mxu0  ;;  %v6067_v18 = vpop.f32.mrf.mxu1 }
 0x10d   : > { %4924 = vmatpush3.bf16.msra.mxu1 %v5116_v22 }
 0x10e   : > { %4925 = vmatprep.subr.bf16.mxu1 %v5118_v28  ;;  %4976 = vmatpush3.bf16.msra.mxu0 %v5121_v63  ;;  %v6069_v36 = vpop.f32.mrf.mxu0 }
 0x10f   : > { %4898 = vmatmul.mubr.bf16.gmra.mxu0 %v5511_v41  ;;  %v6073_v41 = vpop.f32.mrf.mxu1 }
 0x110   : > { %4846 = vmatmul.mubr.bf16.gmra.mxu1 %v5801_v16  ;;  %4901 = vmatprep.mubr.bf16.mxu0 %v5544_v11 }
 0x111   : > { %4849 = vmatprep.mubr.bf16.mxu1 %v5824_v58  ;;  %4926 = vmatpush3.bf16.msra.mxu1 %v5118_v28  ;;  %v6079_v24 = vpop.f32.mrf.mxu1 }
 0x112   : > { %4927 = vmatprep.subr.bf16.mxu1 %v5120_v62 }
 0x115   : > { %4928 = vmatpush3.bf16.msra.mxu1 %v5120_v62 }
 0x117   : > { %4902 = vmatmul.mubr.bf16.gmra.mxu0 %v5635_v48 }
 0x118   : > { %4850 = vmatmul.mubr.bf16.gmra.mxu1 %v5827_v31  ;;  %4905 = vmatprep.mubr.bf16.mxu0 %v5666_v21  ;;  %v6077_v11 = vpop.f32.mrf.mxu0 }
 0x119   : > { %4853 = vmatprep.mubr.bf16.mxu1 %v5847_v54 }
 0x11a   : > { %v6081_v61 = vpop.f32.mrf.mxu0 }
 0x11c   : > { %v6087_v60 = vpop.f32.mrf.mxu0 }
 0x11e   : > { %v6084_v49 = vpop.f32.mrf.mxu1  ;;  %v6093_v21 = vpop.f32.mrf.mxu0 }
 0x11f   : > { %6611 = vst [vmem:[#allocation12_spill] sm:$0xff] %v6084_v49  ;;  %4906 = vmatmul.mubr.bf16.gmra.mxu0 %v5714_v5  ;;  %v2397_v5 = vrot.slane %v5957_v25, 1 }
 0x120   : > { %4854 = vmatmul.mubr.bf16.gmra.mxu1 %v5850_v43  ;;  %4909 = vmatprep.mubr.bf16.mxu0 %v5957_v25  ;;  %v6091_v48 = vpop.f32.mrf.mxu1 }
 0x121   : > { %4857 = vmatprep.mubr.bf16.mxu1 %v5861_v30  ;;  %6612 = vst [vmem:[#allocation13_spill] sm:$0xff] %v6091_v48  ;;  %v6112_v63 = vsel %vm1543_vm4, %v2397_v5, %v2398_v12 }
 0x122   : > { %v6096_v6 = vpop.f32.mrf.mxu1 }
 0x123   : > { %6613 = vst [vmem:[#allocation14_spill] sm:$0xff] %v6096_v6 }
 0x124   : > { %v6107_v29 = vpop.f32.mrf.mxu1 }
 0x125   : > { %6614 = vst [vmem:[#allocation15_spill] sm:$0xff] %v6107_v29 }
 0x127   : > { %v6098_v33 = vpop.f32.mrf.mxu0  ;;  %4910 = vmatmul.mubr.bf16.gmra.mxu0 %v5251_v19 }
 0x128   : > { %4858 = vmatmul.mubr.bf16.gmra.mxu1 %v5864_v47  ;;  %4977 = vmatprep.mubr.bf16.mxu0 %v5733_v42 }
 0x129   : > { %4861 = vmatprep.mubr.bf16.mxu1 %v5873_v44  ;;  %v6105_v22 = vpop.f32.mrf.mxu0 }
 0x12b   : > { %v6109_v28 = vpop.f32.mrf.mxu0 }
 0x12d   : > { %v6114_v62 = vpop.f32.mrf.mxu0 }
 0x12f   : > { %v4691_v25 = vpop.f32.mrf.mxu0  ;;  %4978 = vmatmul.mubr.bf16.vlgmr.msra.gmra.mxu0 %v5748_v13 }
 0x130   : > { %v6116_v19 = vpop.f32.mrf.mxu1  ;;  %4862 = vmatmul.mubr.bf16.gmra.mxu1 %v6112_v63  ;;  %4981 = vmatprep.mubr.bf16.mxu0 %v5754_v9 }
 0x131   : > { %6615 = vst [vmem:[#allocation16_spill] sm:$0xff] %v6116_v19  ;;  %4929 = vmatprep.mubr.bf16.mxu1 %v5453_v1  ;;  %v1707_v37 = vpop.f32.mrf.mxu0 }
 0x132   : > { %v6122_v42 = vpop.f32.mrf.mxu1 }
 0x133   : > { %6616 = vst [vmem:[#allocation17_spill] sm:$0xff] %v6122_v42  ;;  %v4692_v5 = vpop.f32.mrf.mxu0 }
 0x134   : > { %v6124_v29 = vpop.f32.mrf.mxu1 }
 0x135   : > { %6617 = vst [vmem:[#allocation18_spill] sm:$0xff] %v6124_v29  ;;  %v1710_v6 = vpop.f32.mrf.mxu0 }
 0x136   : > { %v6126_v12 = vpop.f32.mrf.mxu1 }
 0x137   : > { %6618 = vst [vmem:[#allocation19_spill] sm:$0xff] %v6126_v12  ;;  %v4695_v19 = vpop.f32.mrf.mxu0  ;;  %4982 = vmatmul.mubr.bf16.gmra.mxu0 %v5772_v2 }
 0x138   : > { %v4643_v48 = vpop.f32.mrf.mxu1  ;;  %4930 = vmatmul.mubr.bf16.vlgmr.msra.gmra.mxu1 %v5538_v3  ;;  %4985 = vmatprep.mubr.bf16.mxu0 %v5778_v50 }
 0x139   : > { %v1393_v13 = vadd.f32 %v4643_v48, %v6004_v51  ;;  %4933 = vmatprep.mubr.bf16.mxu1 %v5563_v53  ;;  %v1723_v9 = vpop.f32.mrf.mxu0 }
 0x13a   : > { %v1384_v1 = vpop.f32.mrf.mxu1 }
 0x13b   : > { %v6133_v42 = vadd.f32 %v4691_v25, %v1393_v13  ;;  %v1385_v29 = vadd.f32 %v1384_v1, %v6006_v27  ;;  %v4696_v32 = vpop.f32.mrf.mxu0 }
 0x13c   : > { %v4644_v12 = vpop.f32.mrf.mxu1 }
 0x13d   : > { %v6136_v49 = vadd.f32 %v1707_v37, %v1385_v29  ;;  %v1396_v3 = vadd.f32 %v4644_v12, %v6019_v55  ;;  %v1726_v2 = vpop.f32.mrf.mxu0 }
 0x13e   : > { %v1387_v14 = vpop.f32.mrf.mxu1 }
 0x13f   : > { %v6139_v34 = vadd.f32 %v4692_v5, %v1396_v3  ;;  %v1388_v53 = vadd.f32 %v1387_v14, %v6030_v40  ;;  %v4699_v50 = vpop.f32.mrf.mxu0  ;;  %4986 = vmatmul.mubr.bf16.gmra.mxu0 %v5798_v4 }
 0x140   : > { %v4647_v51 = vpop.f32.mrf.mxu1  ;;  %4934 = vmatmul.mubr.bf16.gmra.mxu1 %v5643_v26  ;;  %4989 = vmatprep.mubr.bf16.mxu0 %v5801_v16 }
 0x141   : > { %v6144_v48 = vadd.f32 %v1710_v6, %v1388_v53  ;;  %v1409_v27 = vadd.f32 %v4647_v51, %v6044_v15  ;;  %4937 = vmatprep.mubr.bf16.mxu1 %v5685_v7  ;;  %v1739_v29 = vpop.f32.mrf.mxu0 }
 0x142   : > { %v1400_v55 = vpop.f32.mrf.mxu1 }
 0x143   : > { %v6149_v25 = vadd.f32 %v4695_v19, %v1409_v27  ;;  %v1401_v14 = vadd.f32 %v1400_v55, %v6054_v57  ;;  %v4700_v37 = vpop.f32.mrf.mxu0 }
 0x144   : > { %v4648_v40 = vpop.f32.mrf.mxu1 }
 0x145   : > { %v6152_v26 = vadd.f32 %v1723_v9, %v1401_v14  ;;  %v1412_v4 = vadd.f32 %v4648_v40, %v6065_v52  ;;  %v1742_v5 = vpop.f32.mrf.mxu0 }
 0x146   : > { %v1403_v6 = vpop.f32.mrf.mxu1 }
 0x147   : > { %v6155_v12 = vadd.f32 %v4696_v32, %v1412_v4  ;;  %v1404_v7 = vadd.f32 %v1403_v6, %v6069_v36  ;;  %v4703_v16 = vpop.f32.mrf.mxu0  ;;  %4990 = vmatmul.mubr.bf16.gmra.mxu0 %v5824_v58 }
 0x148   : > { %v4651_v15 = vpop.f32.mrf.mxu1  ;;  %4938 = vmatmul.mubr.bf16.gmra.mxu1 %v5708_v20  ;;  %4993 = vmatprep.mubr.bf16.mxu0 %v5827_v31 }
 0x149   : > { %v6160_v19 = vadd.f32 %v1726_v2, %v1404_v7  ;;  %v1425_v57 = vadd.f32 %v4651_v15, %v6077_v11  ;;  %4941 = vmatprep.mubr.bf16.mxu1 %v5405_v0  ;;  %v1755_v13 = vpop.f32.mrf.mxu0 }
 0x14a   : > { %v1416_v52 = vpop.f32.mrf.mxu1 }
 0x14b   : > { %v6165_v32 = vadd.f32 %v4699_v50, %v1425_v57  ;;  %v1417_v36 = vadd.f32 %v1416_v52, %v6081_v61  ;;  %v4704_v9 = vpop.f32.mrf.mxu0 }
 0x14c   : > { %v4652_v1 = vpop.f32.mrf.mxu1 }
 0x14d   : > { %v6168_v20 = vadd.f32 %v1739_v29, %v1417_v36  ;;  %v1428_v58 = vadd.f32 %v4652_v1, %v6087_v60  ;;  %v1758_v2 = vpop.f32.mrf.mxu0 }
 0x14e   : > { %v1419_v3 = vpop.f32.mrf.mxu1 }
 0x14f   : > { %v6171_v53 = vadd.f32 %v4700_v37, %v1428_v58  ;;  %v1420_v0 = vadd.f32 %v1419_v3, %v6093_v21  ;;  %v4707_v31 = vpop.f32.mrf.mxu0  ;;  %4994 = vmatmul.mubr.bf16.gmra.mxu0 %v5847_v54 }
 0x150   : > { %v4655_v11 = vpop.f32.mrf.mxu1  ;;  %4942 = vmatmul.mubr.bf16.gmra.mxu1 %v5418_v17  ;;  %4997 = vmatprep.mubr.bf16.mxu0 %v5850_v43 }
 0x151   : > { %v6176_v51 = vadd.f32 %v1742_v5, %v1420_v0  ;;  %v1441_v61 = vadd.f32 %v4655_v11, %v6098_v33  ;;  %4945 = vmatprep.mubr.bf16.mxu1 %v5473_v39  ;;  %v1771_v50 = vpop.f32.mrf.mxu0 }
 0x152   : > { %v1432_v60 = vpop.f32.mrf.mxu1 }
 0x153   : > { %v6181_v27 = vadd.f32 %v4703_v16, %v1441_v61  ;;  %v1433_v21 = vadd.f32 %v1432_v60, %v6105_v22  ;;  %v4708_v29 = vpop.f32.mrf.mxu0 }
 0x154   : > { %v4656_v55 = vpop.f32.mrf.mxu1 }
 0x155   : > { %v6184_v17 = vadd.f32 %v1755_v13, %v1433_v21  ;;  %v1444_v54 = vadd.f32 %v4656_v55, %v6109_v28  ;;  %v1774_v40 = vpop.f32.mrf.mxu0 }
 0x156   : > { %v1435_v14 = vpop.f32.mrf.mxu1 }
 0x157   : > { %v6187_v37 = vadd.f32 %v4704_v9, %v1444_v54  ;;  %v1436_v39 = vadd.f32 %v1435_v14, %v6114_v62  ;;  %v4711_v43 = vpop.f32.mrf.mxu0  ;;  %4998 = vmatmul.mubr.bf16.gmra.mxu0 %v5861_v30 }
 0x158   : > { %v4659_v33 = vpop.f32.mrf.mxu1  ;;  %4946 = vmatmul.mubr.bf16.gmra.mxu1 %v5556_v35  ;;  %5001 = vmatprep.mubr.bf16.mxu0 %v5864_v47 }
 0x159   : > { %v6192_v4 = vadd.f32 %v1758_v2, %v1436_v39  ;;  %v1457_v22 = vadd.f32 %v4659_v33, %v6016_v38  ;;  %4949 = vmatprep.mubr.bf16.mxu1 %v6609_v56  ;;  %v1787_v6 = vpop.f32.mrf.mxu0  ;;  %v6624_v39 = vld [vmem:[#allocation14_spill] sm:$0xff] }
 0x15a   : > { %v1448_v28 = vpop.f32.mrf.mxu1 }
 0x15b   : > { %v6197_v5 = vadd.f32 %v4707_v31, %v1457_v22  ;;  %v1449_v62 = vadd.f32 %v1448_v28, %v6028_v46  ;;  %v4712_v15 = vpop.f32.mrf.mxu0  ;;  %v6620_v31 = vld [vmem:[#allocation10_spill] sm:$0xff] }
 0x15c   : > { %v4660_v7 = vpop.f32.mrf.mxu1 }
 0x15d   : > { %v6200_v35 = vadd.f32 %v1771_v50, %v1449_v62  ;;  %v1460_v30 = vadd.f32 %v4660_v7, %v6040_v8  ;;  %v1790_v57 = vpop.f32.mrf.mxu0  ;;  %v6622_v50 = vld [vmem:[#allocation9_spill] sm:$0xff] }
 0x15e   : > { %v1451_v16 = vpop.f32.mrf.mxu1 }
 0x15f   : > { %v6203_v52 = vadd.f32 %v4708_v29, %v1460_v30  ;;  %v1452_v56 = vadd.f32 %v1451_v16, %v6052_v23  ;;  %v4715_v47 = vpop.f32.mrf.mxu0  ;;  %5002 = vmatmul.mubr.bf16.gmra.mxu0 %v5873_v44  ;;  %v6623_v29 = vld [vmem:[#allocation13_spill] sm:$0xff] }
 0x160   : > { %v4663_v38 = vpop.f32.mrf.mxu1  ;;  %4950 = vmatmul.mubr.bf16.gmra.mxu1 %v5673_v10  ;;  %5005 = vmatprep.mubr.bf16.mxu0 %v6112_v63  ;;  %v6619_v63 = vld [vmem:[#allocation11_spill] sm:$0xff] }
 0x161   : > { %v6208_v13 = vadd.f32 %v1774_v40, %v1452_v56  ;;  %v1473_v46 = vadd.f32 %v4663_v38, %v6061_v45  ;;  %4953 = vmatprep.mubr.bf16.mxu1 %v5697_v59  ;;  %v1803_v36 = vpop.f32.mrf.mxu0 }
 0x162   : > { %v1464_v8 = vpop.f32.mrf.mxu1 }
 0x163   : > { %v6213_v1 = vadd.f32 %v4711_v43, %v1473_v46  ;;  %v1465_v23 = vadd.f32 %v1464_v8, %v6067_v18  ;;  %v4716_v58 = vpop.f32.mrf.mxu0  ;;  %v6621_v18 = vld [vmem:[#allocation12_spill] sm:$0xff]  ;;  %v6628_v8 = vld [vmem:[#allocation17_spill] sm:$0xff] }
 0x164   : > { %v4664_v9 = vpop.f32.mrf.mxu1 }
 0x165   : > { %v6216_v10 = vadd.f32 %v1787_v6, %v1465_v23  ;;  %v1476_v44 = vadd.f32 %v4664_v9, %v6073_v41  ;;  %v1806_v2 = vpop.f32.mrf.mxu0  ;;  %v6625_v6 = vld [vmem:[#allocation15_spill] sm:$0xff] }
 0x166   : > { %v1467_v3 = vpop.f32.mrf.mxu1 }
 0x167   : > { %v6219_v0 = vadd.f32 %v4712_v15, %v1476_v44  ;;  %v1468_v59 = vadd.f32 %v1467_v3, %v6079_v24  ;;  %v4719_v11 = vpop.f32.mrf.mxu0  ;;  %5006 = vmatmul.mubr.bf16.gmra.mxu0 %v6620_v31  ;;  %v6626_v15 = vld [vmem:[#allocation8_spill] sm:$0xff]  ;;  %v6629_v44 = vld [vmem:[#allocation18_spill] sm:$0xff] }
 0x168   : > { %v4667_v45 = vpop.f32.mrf.mxu1  ;;  %4954 = vmatmul.mubr.bf16.gmra.mxu1 %v6619_v63 }
 0x169   : > { %v6224_v61 = vadd.f32 %v1790_v57, %v1468_v59  ;;  %v1489_v60 = vadd.f32 %v4667_v45, %v6621_v18  ;;  %4957 = vmatprep.mubr.bf16.mxu1 %v6622_v50  ;;  %v1819_v41 = vpop.f32.mrf.mxu0  ;;  %v6627_v57 = vld [vmem:[#allocation16_spill] sm:$0xff] }
 0x16a   : > { %v1480_v21 = vpop.f32.mrf.mxu1 }
 0x16b   : > { %v6228_v55 = vadd.f32 %v4715_v47, %v1489_v60  ;;  %v1481_v54 = vadd.f32 %v1480_v21, %v6623_v29  ;;  %v4720_v24 = vpop.f32.mrf.mxu0 }
 0x16c   : > { %v4668_v14 = vpop.f32.mrf.mxu1 }
 0x16d   : > { %v6231_v40 = vadd.f32 %v1803_v36, %v1481_v54  ;;  %v1492_v33 = vadd.f32 %v4668_v14, %v6624_v39  ;;  %v1822_v22 = vpop.f32.mrf.mxu0 }
 0x16e   : > { %v1483_v43 = vpop.f32.mrf.mxu1 }
 0x16f   : > { %v6234_v28 = vadd.f32 %v4716_v58, %v1492_v33  ;;  %v1484_v62 = vadd.f32 %v1483_v43, %v6625_v6  ;;  %v4787_v30 = vpop.f32.mrf.mxu0 }
 0x170   : > { %v4671_v7 = vpop.f32.mrf.mxu1  ;;  %4958 = vmatmul.mubr.bf16.gmra.mxu1 %v6626_v15 }
 0x171   : > { %v6238_v16 = vadd.f32 %v1806_v2, %v1484_v62  ;;  %v1505_v56 = vadd.f32 %v4671_v7, %v6627_v57  ;;  %v2236_v47 = vpop.f32.mrf.mxu0  ;;  %v6630_v2 = vld [vmem:[#allocation19_spill] sm:$0xff] }
 0x172   : > { %v1496_v38 = vpop.f32.mrf.mxu1 }
 0x173   : > { %v6241_v46 = vadd.f32 %v4719_v11, %v1505_v56  ;;  %v1497_v36 = vadd.f32 %v1496_v38, %v6628_v8  ;;  %v4788_v9 = vpop.f32.mrf.mxu0 }
 0x174   : > { %v4672_v23 = vpop.f32.mrf.mxu1 }
 0x175   : > { %v6244_v58 = vadd.f32 %v1819_v41, %v1497_v36  ;;  %v1508_v3 = vadd.f32 %v4672_v23, %v6629_v44  ;;  %v2239_v45 = vpop.f32.mrf.mxu0 }
 0x176   : > { %v1499_v59 = vpop.f32.mrf.mxu1 }
 0x177   : > { %v6247_v63 = vadd.f32 %v4720_v24, %v1508_v3  ;;  %v1500_v31 = vadd.f32 %v1499_v59, %v6630_v2  ;;  %v4791_v60 = vpop.f32.mrf.mxu0 }
 0x178   : > { %v4739_v18 = vpop.f32.mrf.mxu1 }
 0x179   : > { %v6250_v50 = vadd.f32 %v1822_v22, %v1500_v31  ;;  %v2094_v11 = vadd.f32 %v4739_v18, %v6133_v42  ;;  %v2252_v29 = vpop.f32.mrf.mxu0 }
 0x17a   : > { %v1965_v21 = vpop.f32.mrf.mxu1 }
 0x17b   : > { %v6253_v54 = vadd.f32 %v4787_v30, %v2094_v11  ;;  %v2092_v41 = vadd.f32 %v1965_v21, %v6136_v49  ;;  %v4792_v39 = vpop.f32.mrf.mxu0 }
 0x17c   : > { %v4740_v14 = vpop.f32.mrf.mxu1 }
 0x17d   : > { %v6256_v33 = vadd.f32 %v2236_v47, %v2092_v41  ;;  %v2095_v24 = vadd.f32 %v4740_v14, %v6139_v34  ;;  %v2255_v6 = vpop.f32.mrf.mxu0 }
 0x17e   : > { %v1968_v43 = vpop.f32.mrf.mxu1 }
 0x17f   : > { %v6259_v62 = vadd.f32 %v4788_v9, %v2095_v24  ;;  %v2093_v22 = vadd.f32 %v1968_v43, %v6144_v48  ;;  %v4795_v42 = vpop.f32.mrf.mxu0 }
 0x180   : > { %v4743_v7 = vpop.f32.mrf.mxu1 }
 0x181   : > { %v6262_v15 = vadd.f32 %v2239_v45, %v2093_v22  ;;  %v2098_v30 = vadd.f32 %v4743_v7, %v6149_v25  ;;  %v2268_v49 = vpop.f32.mrf.mxu0 }
 0x182   : > { %v1981_v57 = vpop.f32.mrf.mxu1 }
 0x183   : > { %v6265_v56 = vadd.f32 %v4791_v60, %v2098_v30  ;;  %v2096_v38 = vadd.f32 %v1981_v57, %v6152_v26  ;;  %v4796_v34 = vpop.f32.mrf.mxu0 }
 0x184   : > { %v4744_v47 = vpop.f32.mrf.mxu1 }
 0x185   : > { %v6268_v8 = vadd.f32 %v2252_v29, %v2096_v38  ;;  %v2099_v36 = vadd.f32 %v4744_v47, %v6155_v12  ;;  %v2271_v48 = vpop.f32.mrf.mxu0 }
 0x186   : > { %v1984_v23 = vpop.f32.mrf.mxu1 }
 0x187   : > { %v6271_v9 = vadd.f32 %v4792_v39, %v2099_v36  ;;  %v2097_v44 = vadd.f32 %v1984_v23, %v6160_v19  ;;  %v4799_v25 = vpop.f32.mrf.mxu0 }
 0x188   : > { %v4747_v3 = vpop.f32.mrf.mxu1 }
 0x189   : > { %v6274_v59 = vadd.f32 %v2255_v6, %v2097_v44  ;;  %v2102_v45 = vadd.f32 %v4747_v3, %v6165_v32  ;;  %v2284_v26 = vpop.f32.mrf.mxu0 }
 0x18a   : > { %v1997_v2 = vpop.f32.mrf.mxu1 }
 0x18b   : > { %v6277_v31 = vadd.f32 %v4795_v42, %v2102_v45  ;;  %v2100_v18 = vadd.f32 %v1997_v2, %v6168_v20  ;;  %v4800_v12 = vpop.f32.mrf.mxu0 }
 0x18c   : > { %v4748_v60 = vpop.f32.mrf.mxu1 }
 0x18d   : > { %v6280_v11 = vadd.f32 %v2268_v49, %v2100_v18  ;;  %v2103_v21 = vadd.f32 %v4748_v60, %v6171_v53  ;;  %v2287_v19 = vpop.f32.mrf.mxu0 }
 0x18e   : > { %v2000_v29 = vpop.f32.mrf.mxu1 }
 0x18f   : > { %v6283_v41 = vadd.f32 %v4796_v34, %v2103_v21  ;;  %v2101_v14 = vadd.f32 %v2000_v29, %v6176_v51  ;;  %v4803_v32 = vpop.f32.mrf.mxu0 }
 0x190   : > { %v4751_v39 = vpop.f32.mrf.mxu1 }
 0x191   : > { %v6286_v24 = vadd.f32 %v2271_v48, %v2101_v14  ;;  %v2106_v43 = vadd.f32 %v4751_v39, %v6181_v27  ;;  %v2300_v20 = vpop.f32.mrf.mxu0 }
 0x192   : > { %v2013_v6 = vpop.f32.mrf.mxu1 }
 0x193   : > { %v6289_v22 = vadd.f32 %v4799_v25, %v2106_v43  ;;  %v2104_v7 = vadd.f32 %v2013_v6, %v6184_v17  ;;  %v4804_v53 = vpop.f32.mrf.mxu0 }
 0x194   : > { %v4752_v42 = vpop.f32.mrf.mxu1 }
 0x195   : > { %v6292_v30 = vadd.f32 %v2284_v26, %v2104_v7  ;;  %v2107_v57 = vadd.f32 %v4752_v42, %v6187_v37  ;;  %v2303_v51 = vpop.f32.mrf.mxu0 }
 0x196   : > { %v2016_v49 = vpop.f32.mrf.mxu1 }
 0x197   : > { %v6295_v38 = vadd.f32 %v4800_v12, %v2107_v57  ;;  %v2105_v47 = vadd.f32 %v2016_v49, %v6192_v4  ;;  %v4807_v27 = vpop.f32.mrf.mxu0 }
 0x198   : > { %v4755_v34 = vpop.f32.mrf.mxu1 }
 0x199   : > { %v6298_v36 = vadd.f32 %v2287_v19, %v2105_v47  ;;  %v2110_v23 = vadd.f32 %v4755_v34, %v6197_v5  ;;  %v2316_v17 = vpop.f32.mrf.mxu0 }
 0x19a   : > { %v2029_v48 = vpop.f32.mrf.mxu1 }
 0x19b   : > { %v6301_v44 = vadd.f32 %v4803_v32, %v2110_v23  ;;  %v2108_v3 = vadd.f32 %v2029_v48, %v6200_v35  ;;  %v4808_v37 = vpop.f32.mrf.mxu0 }
 0x19c   : > { %v4756_v25 = vpop.f32.mrf.mxu1 }
 0x19d   : > { %v6304_v45 = vadd.f32 %v2300_v20, %v2108_v3  ;;  %v2111_v2 = vadd.f32 %v4756_v25, %v6203_v52  ;;  %v2319_v4 = vpop.f32.mrf.mxu0 }
 0x19e   : > { %v2032_v26 = vpop.f32.mrf.mxu1 }
 0x19f   : > { %v6307_v18 = vadd.f32 %v4804_v53, %v2111_v2  ;;  %v2109_v60 = vadd.f32 %v2032_v26, %v6208_v13  ;;  %v4811_v5 = vpop.f32.mrf.mxu0 }
 0x1a0   : > { %v4759_v12 = vpop.f32.mrf.mxu1 }
 0x1a1   : > { %v6310_v21 = vadd.f32 %v2303_v51, %v2109_v60  ;;  %v2114_v29 = vadd.f32 %v4759_v12, %v6213_v1  ;;  %v2332_v35 = vpop.f32.mrf.mxu0 }
 0x1a2   : > { %v2045_v19 = vpop.f32.mrf.mxu1 }
 0x1a3   : > { %v6313_v14 = vadd.f32 %v4807_v27, %v2114_v29  ;;  %v2112_v39 = vadd.f32 %v2045_v19, %v6216_v10  ;;  %v4812_v52 = vpop.f32.mrf.mxu0 }
 0x1a4   : > { %v4760_v32 = vpop.f32.mrf.mxu1 }
 0x1a5   : > { %v6316_v43 = vadd.f32 %v2316_v17, %v2112_v39  ;;  %v2115_v6 = vadd.f32 %v4760_v32, %v6219_v0  ;;  %v2335_v13 = vpop.f32.mrf.mxu0 }
 0x1a6   : > { %v2048_v20 = vpop.f32.mrf.mxu1 }
 0x1a7   : > { %6631 = vst [vmem:[#allocation11_spill] sm:$0xff] %v6316_v43  ;;  %v6319_v7 = vadd.f32 %v4808_v37, %v2115_v6  ;;  %v2113_v42 = vadd.f32 %v2048_v20, %v6224_v61  ;;  %v4815_v1 = vpop.f32.mrf.mxu0 }
 0x1a8   : > { %v4763_v53 = vpop.f32.mrf.mxu1 }
 0x1a9   : > { %6632 = vst [vmem:[#allocation10_spill] sm:$0xff] %v6319_v7  ;;  %v6322_v57 = vadd.f32 %v2319_v4, %v2113_v42  ;;  %v2118_v49 = vadd.f32 %v4763_v53, %v6228_v55  ;;  %v2348_v10 = vpop.f32.mrf.mxu0 }
 0x1aa   : > { %v2061_v51 = vpop.f32.mrf.mxu1 }
 0x1ab   : > { %6633 = vst [vmem:[#allocation12_spill] sm:$0xff] %v6322_v57  ;;  %v6325_v47 = vadd.f32 %v4811_v5, %v2118_v49  ;;  %v2116_v34 = vadd.f32 %v2061_v51, %v6231_v40  ;;  %v4816_v0 = vpop.f32.mrf.mxu0 }
 0x1ac   : > { %v4764_v27 = vpop.f32.mrf.mxu1 }
 0x1ad   : > { %v6328_v23 = vadd.f32 %v2332_v35, %v2116_v34  ;;  %v2119_v48 = vadd.f32 %v4764_v27, %v6234_v28  ;;  %v2351_v61 = vpop.f32.mrf.mxu0 }
 0x1ae   : > { %v2064_v17 = vpop.f32.mrf.mxu1 }
 0x1af   : > { %6634 = vst [vmem:[#allocation9_spill] sm:$0xff] %v6328_v23  ;;  %v6331_v3 = vadd.f32 %v4812_v52, %v2119_v48  ;;  %v2117_v25 = vadd.f32 %v2064_v17, %v6238_v16  ;;  %v4883_v55 = vpop.f32.mrf.mxu0 }
 0x1b0   : > { %v4767_v37 = vpop.f32.mrf.mxu1 }
 0x1b1   : > { %6635 = vst [vmem:[#allocation13_spill] sm:$0xff] %v6331_v3  ;;  %v6334_v2 = vadd.f32 %v2335_v13, %v2117_v25  ;;  %v2122_v26 = vadd.f32 %v4767_v37, %v6241_v46  ;;  %v2758_v40 = vpop.f32.mrf.mxu0 }
 0x1b2   : > { %v2077_v4 = vpop.f32.mrf.mxu1 }
 0x1b3   : > { %6636 = vst [vmem:[#allocation14_spill] sm:$0xff] %v6334_v2  ;;  %v6337_v60 = vadd.f32 %v4815_v1, %v2122_v26  ;;  %v2120_v12 = vadd.f32 %v2077_v4, %v6244_v58  ;;  %v6340_v28 = vpop.f32.mrf.mxu0 }
 0x1b4   : > { %v4768_v5 = vpop.f32.mrf.mxu1 }
 0x1b5   : > { %v6342_v29 = vadd.f32 %v2348_v10, %v2120_v12  ;;  %v2123_v19 = vadd.f32 %v4768_v5, %v6247_v63  ;;  %v6345_v35 = vpop.f32.mrf.mxu0 }
 0x1b6   : > { %v2080_v16 = vpop.f32.mrf.mxu1 }
 0x1b7   : > { %6637 = vst [vmem:[#allocation15_spill] sm:$0xff] %v6342_v29  ;;  %v6347_v39 = vadd.f32 %v4816_v0, %v2123_v19  ;;  %v2121_v46 = vadd.f32 %v2080_v16, %v6250_v50  ;;  %v4887_v52 = vpop.f32.mrf.mxu0 }
 0x1b8   : > { %v4835_v32 = vpop.f32.mrf.mxu1 }
 0x1b9   : > { %6638 = vst [vmem:[#allocation8_spill] sm:$0xff] %v6347_v39  ;;  %v6350_v6 = vadd.f32 %v2351_v61, %v2121_v46  ;;  %v2629_v58 = vadd.f32 %v4835_v32, %v6253_v54  ;;  %v6353_v13 = vpop.f32.mrf.mxu0 }
 0x1ba   : > { %v2500_v20 = vpop.f32.mrf.mxu1 }
 0x1bb   : > { %6639 = vst [vmem:[#allocation16_spill] sm:$0xff] %v6350_v6  ;;  %v6355_v42 = vadd.f32 %v4883_v55, %v2629_v58  ;;  %v2627_v63 = vadd.f32 %v2500_v20, %v6256_v33  ;;  %v6360_v1 = vpop.f32.mrf.mxu0 }
 0x1bc   : > { %v6358_v53 = vpop.f32.mrf.mxu1 }
 0x1bd   : > { %v6362_v49 = vadd.f32 %v2758_v40, %v2627_v63  ;;  %v6366_v51 = vpop.f32.mrf.mxu0 }
 0x1be   : > { %v6364_v50 = vpop.f32.mrf.mxu1 }
 0x1bf   : > { %v4891_v34 = vpop.f32.mrf.mxu0 }
 0x1c0   : > { %v4839_v10 = vpop.f32.mrf.mxu1 }
 0x1c1   : > { %v2633_v54 = vadd.f32 %v4839_v10, %v6265_v56  ;;  %v6371_v0 = vpop.f32.mrf.mxu0 }
 0x1c2   : > { %v6369_v27 = vpop.f32.mrf.mxu1 }
 0x1c3   : > { %v6373_v48 = vadd.f32 %v4887_v52, %v2633_v54  ;;  %v6377_v17 = vpop.f32.mrf.mxu0 }
 0x1c4   : > { %v6375_v33 = vpop.f32.mrf.mxu1 }
 0x1c5   : > { %v6381_v25 = vpop.f32.mrf.mxu0 }
 0x1c6   : > { %v6379_v61 = vpop.f32.mrf.mxu1 }
 0x1c7   : > { %v4895_v55 = vpop.f32.mrf.mxu0 }
 0x1c8   : > { %v4843_v37 = vpop.f32.mrf.mxu1 }
 0x1c9   : > { %v2637_v26 = vadd.f32 %v4843_v37, %v6277_v31  ;;  %v6386_v56 = vpop.f32.mrf.mxu0 }
 0x1ca   : > { %v6384_v4 = vpop.f32.mrf.mxu1 }
 0x1cb   : > { %v6388_v40 = vadd.f32 %v4891_v34, %v2637_v26  ;;  %v6392_v5 = vpop.f32.mrf.mxu0 }
 0x1cc   : > { %v6390_v12 = vpop.f32.mrf.mxu1 }
 0x1cd   : > { %v6396_v16 = vpop.f32.mrf.mxu0 }
 0x1ce   : > { %v6394_v19 = vpop.f32.mrf.mxu1 }
 0x1cf   : > { %v4899_v32 = vpop.f32.mrf.mxu0 }
 0x1d0   : > { %v4847_v46 = vpop.f32.mrf.mxu1 }
 0x1d1   : > { %v2641_v52 = vadd.f32 %v4847_v46, %v6289_v22  ;;  %v6401_v31 = vpop.f32.mrf.mxu0 }
 0x1d2   : > { %v6399_v58 = vpop.f32.mrf.mxu1 }
 0x1d3   : > { %v6403_v20 = vadd.f32 %v4895_v55, %v2641_v52  ;;  %v6407_v10 = vpop.f32.mrf.mxu0 }
 0x1d4   : > { %v6405_v63 = vpop.f32.mrf.mxu1 }
 0x1d5   : > { %v6411_v54 = vpop.f32.mrf.mxu0 }
 0x1d6   : > { %v6409_v34 = vpop.f32.mrf.mxu1  ;;  %6640 = vst [vmem:[#allocation17_spill] sm:$0xff] %v6411_v54 }
 0x1d7   : > { %v4903_v26 = vpop.f32.mrf.mxu0 }
 0x1d8   : > { %v4851_v37 = vpop.f32.mrf.mxu1 }
 0x1d9   : > { %v2645_v6 = vadd.f32 %v4851_v37, %v6301_v44  ;;  %v6416_v22 = vpop.f32.mrf.mxu0 }
 0x1da   : > { %v6414_v39 = vpop.f32.mrf.mxu1  ;;  %6641 = vst [vmem:[#allocation18_spill] sm:$0xff] %v6416_v22 }
 0x1db   : > { %v6418_v46 = vadd.f32 %v4899_v32, %v2645_v6  ;;  %v6422_v52 = vpop.f32.mrf.mxu0 }
 0x1dc   : > { %v6420_v55 = vpop.f32.mrf.mxu1  ;;  %6643 = vst [vmem:[#allocation20_spill] sm:$0xff] %v6422_v52 }
 0x1dd   : > { %6642 = vst [vmem:[#allocation19_spill] sm:$0xff] %v6418_v46  ;;  %v6426_v2 = vpop.f32.mrf.mxu0 }
 0x1de   : > { %v6424_v29 = vpop.f32.mrf.mxu1  ;;  %6644 = vst [vmem:[#allocation21_spill] sm:$0xff] %v6426_v2 }
 0x1df   : > { %v4907_v23 = vpop.f32.mrf.mxu0 }
 0x1e0   : > { %v4855_v3 = vpop.f32.mrf.mxu1 }
 0x1e1   : > { %v2649_v57 = vadd.f32 %v4855_v3, %v6313_v14  ;;  %v6431_v44 = vpop.f32.mrf.mxu0 }
 0x1e2   : > { %v6429_v7 = vpop.f32.mrf.mxu1  ;;  %6646 = vst [vmem:[#allocation23_spill] sm:$0xff] %v6431_v44 }
 0x1e3   : > { %6645 = vst [vmem:[#allocation22_spill] sm:$0xff] %v6429_v7  ;;  %v6433_v37 = vadd.f32 %v4903_v26, %v2649_v57  ;;  %v6437_v32 = vpop.f32.mrf.mxu0 }
 0x1e4   : > { %v6435_v6 = vpop.f32.mrf.mxu1  ;;  %6649 = vst [vmem:[#allocation26_spill] sm:$0xff] %v6437_v32 }
 0x1e5   : > { %6647 = vst [vmem:[#allocation24_spill] sm:$0xff] %v6433_v37  ;;  %6648 = vst [vmem:[#allocation25_spill] sm:$0xff] %v6435_v6  ;;  %v6441_v52 = vpop.f32.mrf.mxu0 }
 0x1e6   : > { %v6439_v22 = vpop.f32.mrf.mxu1  ;;  %6651 = vst [vmem:[#allocation28_spill] sm:$0xff] %v6441_v52 }
 0x1e7   : > { %6650 = vst [vmem:[#allocation27_spill] sm:$0xff] %v6439_v22  ;;  %v4911_v2 = vpop.f32.mrf.mxu0 }
 0x1e8   : > { %v4859_v43 = vpop.f32.mrf.mxu1 }
 0x1e9   : > { %v2653_v54 = vadd.f32 %v4859_v43, %v6325_v47  ;;  %v6446_v14 = vpop.f32.mrf.mxu0 }
 0x1ea   : > { %v6444_v46 = vpop.f32.mrf.mxu1  ;;  %6653 = vst [vmem:[#allocation30_spill] sm:$0xff] %v6446_v14 }
 0x1eb   : > { %6652 = vst [vmem:[#allocation29_spill] sm:$0xff] %v6444_v46  ;;  %v6448_v3 = vadd.f32 %v4907_v23, %v2653_v54  ;;  %v6452_v26 = vpop.f32.mrf.mxu0 }
 0x1ec   : > { %v6450_v57 = vpop.f32.mrf.mxu1  ;;  %6656 = vst [vmem:[#allocation33_spill] sm:$0xff] %v6452_v26  ;;  %v2630_v26 = vadd.f32 %v6358_v53, %v6259_v62  ;;  %v2631_v62 = vadd.f32 %v6369_v27, %v6268_v8  ;;  %v2634_v53 = vadd.f32 %v6375_v33, %v6271_v9 }
 0x1ed   : > { %6654 = vst [vmem:[#allocation31_spill] sm:$0xff] %v6448_v3  ;;  %6655 = vst [vmem:[#allocation32_spill] sm:$0xff] %v6450_v57  ;;  %v6456_v32 = vpop.f32.mrf.mxu0  ;;  %v2628_v57 = vadd.f32 %v6364_v50, %v6262_v15 }
 0x1ee   : > { %v6454_v44 = vpop.f32.mrf.mxu1  ;;  %6658 = vst [vmem:[#allocation35_spill] sm:$0xff] %v6456_v32  ;;  %v2889_v8 = vadd.f32 %v6353_v13, %v2631_v62  ;;  %v2892_v9 = vadd.f32 %v6360_v1, %v2634_v53 }
 0x1ef   : > { %6657 = vst [vmem:[#allocation34_spill] sm:$0xff] %v6454_v44  ;;  %v4979_v52 = vpop.f32.mrf.mxu0 }
 0x1f0   : > { %v4863_v37 = vpop.f32.mrf.mxu1 }
 0x1f1   : > { %v2657_v22 = vadd.f32 %v4863_v37, %v6337_v60  ;;  %v3293_v43 = vpop.f32.mrf.mxu0 }
 0x1f2   : > { %v6459_v6 = vpop.f32.mrf.mxu1 }
 0x1f3   : > { %6659 = vst [vmem:[#allocation36_spill] sm:$0xff] %v6459_v6  ;;  %v6461_v47 = vadd.f32 %v4911_v2, %v2657_v22  ;;  %v4980_v23 = vpop.f32.mrf.mxu0  ;;  %v2888_v6 = vadd.f32 %v6340_v28, %v2630_v26 }
 0x1f4   : > { %v6463_v14 = vpop.f32.mrf.mxu1 }
 0x1f5   : > { %6660 = vst [vmem:[#allocation37_spill] sm:$0xff] %v6461_v47  ;;  %6661 = vst [vmem:[#allocation38_spill] sm:$0xff] %v6463_v14  ;;  %v3296_v3 = vpop.f32.mrf.mxu0 }
 0x1f6   : > { %v6465_v54 = vpop.f32.mrf.mxu1 }
 0x1f7   : > { %6662 = vst [vmem:[#allocation39_spill] sm:$0xff] %v6465_v54  ;;  %v4983_v32 = vpop.f32.mrf.mxu0  ;;  %v2886_v54 = vadd.f32 %v6345_v35, %v2628_v57 }
 0x1f8   : > { %v4931_v44 = vpop.f32.mrf.mxu1 }
 0x1f9   : > { %v3309_v37 = vpop.f32.mrf.mxu0  ;;  %v3158_v2 = vadd.f32 %v4931_v44, %v6355_v42 }
 0x1fa   : > { %v3029_v60 = vpop.f32.mrf.mxu1 }
 0x1fb   : > { %v3156_v22 = vadd.f32 %v3029_v60, %v6362_v49  ;;  %v4984_v14 = vpop.f32.mrf.mxu0  ;;  %v3422_v7 = vadd.f32 %v4979_v52, %v3158_v2  ;;  %v2632_v49 = vadd.f32 %v6379_v61, %v6274_v59  ;;  %v2635_v61 = vadd.f32 %v6384_v4, %v6280_v11 }
 0x1fc   : > { %v4932_v47 = vpop.f32.mrf.mxu1 }
 0x1fd   : > { %v3159_v46 = vadd.f32 %v4932_v47, %v2888_v6  ;;  %v3312_v50 = vpop.f32.mrf.mxu0  ;;  %v3420_v28 = vadd.f32 %v3293_v43, %v3156_v22  ;;  %v2890_v59 = vadd.f32 %v6366_v51, %v2632_v49  ;;  %v2638_v22 = vadd.f32 %v6390_v12, %v6283_v41 }
 0x1fe   : > { %v3032_v15 = vpop.f32.mrf.mxu1 }
 0x1ff   : > { %v3423_v26 = vadd.f32 %v4980_v23, %v3159_v46  ;;  %v3157_v42 = vadd.f32 %v3032_v15, %v2886_v54  ;;  %v6481_v60 = vpop.f32.mrf.mxu0  ;;  %v3649_v57 = vmul.f32 %v3420_v28, %v3420_v28  ;;  %v3651_v54 = vmul.f32 %v3422_v7, %v3422_v7 }
 0x200   : > { %v4935_v44 = vpop.f32.mrf.mxu1 }
 0x201   : > { %v4258_v35 = vpack.c.bf16 %v3423_v26, %v3422_v7  ;;  %v3421_v6 = vadd.f32 %v3296_v3, %v3157_v42  ;;  %v3162_v27 = vadd.f32 %v4935_v44, %v6373_v48  ;;  %v3325_v52 = vpop.f32.mrf.mxu0  ;;  %v3652_v62 = vmul.f32 %v3423_v26, %v3423_v26 }
 0x202   : > { %v3045_v33 = vpop.f32.mrf.mxu1  ;;  %v2893_v44 = vadd.f32 %v6371_v0, %v2635_v61 }
 0x203   : > { %4346 = vst [vmem:[%s5223_s30 + $0x8] sm:$0xff] %v4258_v35   ;;  %v4253_v46 = vpack.c.bf16 %v3421_v6, %v3420_v28  ;;  %v3612_v43 = vadd.f32 %v3421_v6, %v3420_v28  ;;  %v3650_v47 = vmul.f32 %v3421_v6, %v3421_v6  ;;  %v3160_v3 = vadd.f32 %v3045_v33, %v2889_v8  ;;  %v4988_v13 = vpop.f32.mrf.mxu0 }
 0x204   : > { %v4936_v23 = vpop.f32.mrf.mxu1  ;;  %v3426_v53 = vadd.f32 %v4983_v32, %v3162_v27 }
 0x205   : > { %4254 = vst [vmem:[%s5223_s30] sm:$0xff] %v4253_v46   ;;  %v3613_v1 = vadd.f32 %v3612_v43, %v3422_v7  ;;  %v3681_v2 = vadd.f32 %v3650_v47, %v3649_v57  ;;  %v3163_v48 = vadd.f32 %v4936_v23, %v2892_v9  ;;  %v3424_v15 = vadd.f32 %v3309_v37, %v3160_v3  ;;  %v3328_v42 = vpop.f32.mrf.mxu0 }
 0x206   : > { %v3048_v28 = vpop.f32.mrf.mxu1  ;;  %v2636_v7 = vadd.f32 %v6394_v19, %v6286_v24 }
 0x207   : > { %v3682_v51 = vadd.f32 %v3681_v2, %v3651_v54  ;;  %v3614_v49 = vadd.f32 %v3613_v1, %v3423_v26  ;;  %v3427_v11 = vadd.f32 %v4984_v14, %v3163_v48  ;;  %v3161_v4 = vadd.f32 %v3048_v28, %v2890_v59  ;;  %v6496_v6 = vpop.f32.mrf.mxu0 }
 0x208   : > { %v4939_v35 = vpop.f32.mrf.mxu1  ;;  %v3653_v41 = vmul.f32 %v3424_v15, %v3424_v15  ;;  %v2896_v26 = vadd.f32 %v6377_v17, %v2638_v22  ;;  %v2894_v47 = vadd.f32 %v6381_v25, %v2636_v7  ;;  %v2642_v59 = vadd.f32 %v6405_v63, %v6295_v38 }
 0x209   : > { %v3615_v8 = vadd.f32 %v3614_v49, %v3424_v15  ;;  %v3683_v12 = vadd.f32 %v3682_v51, %v3652_v62  ;;  %v4268_v32 = vpack.c.bf16 %v3427_v11, %v3426_v53  ;;  %v3425_v37 = vadd.f32 %v3312_v50, %v3161_v4  ;;  %v3341_v27 = vpop.f32.mrf.mxu0 }
 0x20a   : > { %v3061_v9 = vpop.f32.mrf.mxu1  ;;  %v3166_v0 = vadd.f32 %v4939_v35, %v6388_v40  ;;  %v2639_v50 = vadd.f32 %v6399_v58, %v6292_v30  ;;  %v3655_v17 = vmul.f32 %v3426_v53, %v3426_v53  ;;  %v3656_v25 = vmul.f32 %v3427_v11, %v3427_v11 }
 0x20b   : > { %v3684_v14 = vadd.f32 %v3683_v12, %v3653_v41  ;;  %4348 = vst [vmem:[%s5223_s30 + $0x18] sm:$0xff] %v4268_v32   ;;  %v3164_v33 = vadd.f32 %v3061_v9, %v2893_v44  ;;  %v4263_v57 = vpack.c.bf16 %v3425_v37, %v3424_v15  ;;  %v3616_v24 = vadd.f32 %v3615_v8, %v3425_v37  ;;  %v4992_v43 = vpop.f32.mrf.mxu0 }
 0x20c   : > { %v3654_v19 = vmul.f32 %v3425_v37, %v3425_v37  ;;  %v4940_v46 = vpop.f32.mrf.mxu1  ;;  %v3430_v2 = vadd.f32 %v6481_v60, %v3166_v0  ;;  %v2897_v38 = vadd.f32 %v6386_v56, %v2639_v50  ;;  %v2640_v63 = vadd.f32 %v6409_v34, %v6298_v36 }
 0x20d   : > { %v3167_v61 = vadd.f32 %v4940_v46, %v2896_v26  ;;  %4347 = vst [vmem:[%s5223_s30 + $0x10] sm:$0xff] %v4263_v57   ;;  %v3617_v3 = vadd.f32 %v3616_v24, %v3426_v53  ;;  %v3428_v40 = vadd.f32 %v3325_v52, %v3164_v33  ;;  %v3344_v1 = vpop.f32.mrf.mxu0  ;;  %v2900_v28 = vadd.f32 %v6392_v5, %v2642_v59 }
 0x20e   : > { %v3685_v23 = vadd.f32 %v3684_v14, %v3654_v19  ;;  %v3064_v54 = vpop.f32.mrf.mxu1  ;;  %v2898_v34 = vadd.f32 %v6396_v16, %v2640_v63  ;;  %v2643_v5 = vadd.f32 %v6414_v39, %v6304_v45  ;;  %v3659_v32 = vmul.f32 %v3430_v2, %v3430_v2 }
 0x20f   : > { %v3431_v48 = vadd.f32 %v4988_v13, %v3167_v61  ;;  %v3165_v22 = vadd.f32 %v3064_v54, %v2894_v47  ;;  %v3618_v15 = vadd.f32 %v3617_v3, %v3427_v11  ;;  %v6508_v58 = vpop.f32.mrf.mxu0  ;;  %v3657_v60 = vmul.f32 %v3428_v40, %v3428_v40 }
 0x210   : > { %v3686_v62 = vadd.f32 %v3685_v23, %v3655_v17  ;;  %v4943_v30 = vpop.f32.mrf.mxu1  ;;  %v6663_v23 = vld [vmem:[#allocation19_spill] sm:$0xff] }
 0x211   : > { %v4278_v53 = vpack.c.bf16 %v3431_v48, %v3430_v2  ;;  %v3429_v52 = vadd.f32 %v3328_v42, %v3165_v22  ;;  %v3619_v51 = vadd.f32 %v3618_v15, %v3428_v40  ;;  %v3357_v4 = vpop.f32.mrf.mxu0  ;;  %v3170_v7 = vadd.f32 %v4943_v30, %v6403_v20  ;;  %v6665_v22 = vld [vmem:[#allocation11_spill] sm:$0xff]  ;;  %v6668_v15 = vld [vmem:[#allocation25_spill] sm:$0xff] }
 0x212   : > { %v3687_v13 = vadd.f32 %v3686_v62, %v3656_v25  ;;  %v3077_v49 = vpop.f32.mrf.mxu1  ;;  %v2646_v42 = vadd.f32 %v6420_v55, %v6307_v18  ;;  %v3660_v16 = vmul.f32 %v3431_v48, %v3431_v48  ;;  %v2901_v18 = vadd.f32 %v6401_v31, %v2643_v5  ;;  %v6667_v62 = vld [vmem:[#allocation10_spill] sm:$0xff]  ;;  %v6670_v5 = vld [vmem:[#allocation12_spill] sm:$0xff] }
 0x213   : > { %4350 = vst [vmem:[%s5223_s30 + $0x28] sm:$0xff] %v4278_v53   ;;  %v4273_v11 = vpack.c.bf16 %v3429_v52, %v3428_v40  ;;  %v3658_v44 = vmul.f32 %v3429_v52, %v3429_v52  ;;  %v3168_v35 = vadd.f32 %v3077_v49, %v2897_v38  ;;  %v3620_v8 = vadd.f32 %v3619_v51, %v3429_v52  ;;  %v4996_v36 = vpop.f32.mrf.mxu0 }
 0x214   : > { %v3688_v56 = vadd.f32 %v3687_v13, %v3657_v60  ;;  %v4944_v41 = vpop.f32.mrf.mxu1  ;;  %v3434_v0 = vadd.f32 %v6496_v6, %v3170_v7  ;;  %v2644_v55 = vadd.f32 %v6424_v29, %v6310_v21  ;;  %v2904_v47 = vadd.f32 %v6407_v10, %v2646_v42  ;;  %v6664_v29 = vld [vmem:[#allocation17_spill] sm:$0xff]  ;;  %v6666_v10 = vld [vmem:[#allocation22_spill] sm:$0xff]  ;;  %v6671_v42 = vld [vmem:[#allocation27_spill] sm:$0xff] }
 0x215   : > { %4349 = vst [vmem:[%s5223_s30 + $0x20] sm:$0xff] %v4273_v11   ;;  %v3171_v12 = vadd.f32 %v4944_v41, %v2900_v28  ;;  %v3621_v37 = vadd.f32 %v3620_v8, %v3430_v2  ;;  %v3432_v26 = vadd.f32 %v3341_v27, %v3168_v35  ;;  %v3360_v14 = vpop.f32.mrf.mxu0  ;;  %v2647_v25 = vadd.f32 %v6666_v10, %v6665_v22  ;;  %v6669_v41 = vld [vmem:[#allocation18_spill] sm:$0xff] }
 0x216   : > { %v3689_v9 = vadd.f32 %v3688_v56, %v3658_v44  ;;  %v3080_v20 = vpop.f32.mrf.mxu1  ;;  %v2650_v30 = vadd.f32 %v6668_v15, %v6667_v62  ;;  %v3663_v63 = vmul.f32 %v3434_v0, %v3434_v0 }
 0x217   : > { %v3435_v33 = vadd.f32 %v4992_v43, %v3171_v12  ;;  %v3169_v57 = vadd.f32 %v3080_v20, %v2898_v34  ;;  %v3622_v19 = vadd.f32 %v3621_v37, %v3431_v48  ;;  %v6523_v39 = vpop.f32.mrf.mxu0  ;;  %v3661_v6 = vmul.f32 %v3432_v26, %v3432_v26  ;;  %v6672_v37 = vld [vmem:[#allocation20_spill] sm:$0xff] }
 0x218   : > { %v3690_v24 = vadd.f32 %v3689_v9, %v3659_v32  ;;  %v4947_v45 = vpop.f32.mrf.mxu1  ;;  %v2905_v34 = vadd.f32 %v6669_v41, %v2647_v25  ;;  %v2648_v12 = vadd.f32 %v6671_v42, %v6670_v5  ;;  %v2908_v9 = vadd.f32 %v6672_v37, %v2650_v30  ;;  %v6679_v30 = vld [vmem:[#allocation23_spill] sm:$0xff]  ;;  %v6686_v37 = vld [vmem:[#allocation36_spill] sm:$0xff] }
 0x219   : > { %v4288_v46 = vpack.c.bf16 %v3435_v33, %v3434_v0  ;;  %v3433_v27 = vadd.f32 %v3344_v1, %v3169_v57  ;;  %v3623_v50 = vadd.f32 %v3622_v19, %v3432_v26  ;;  %v3373_v61 = vpop.f32.mrf.mxu0  ;;  %v3174_v40 = vadd.f32 %v4947_v45, %v6663_v23 }
 0x21a   : > { %v3691_v43 = vadd.f32 %v3690_v24, %v3660_v16  ;;  %v3093_v59 = vpop.f32.mrf.mxu1  ;;  %v2902_v1 = vadd.f32 %v6664_v29, %v2644_v55  ;;  %v3664_v44 = vmul.f32 %v3435_v33, %v3435_v33  ;;  %v6673_v16 = vld [vmem:[#allocation24_spill] sm:$0xff] }
 0x21b   : > { %4352 = vst [vmem:[%s5223_s30 + $0x38] sm:$0xff] %v4288_v46   ;;  %v4283_v17 = vpack.c.bf16 %v3433_v27, %v3432_v26  ;;  %v3662_v3 = vmul.f32 %v3433_v27, %v3433_v27  ;;  %v3172_v54 = vadd.f32 %v3093_v59, %v2901_v18  ;;  %v3624_v2 = vadd.f32 %v3623_v50, %v3433_v27  ;;  %v5000_v21 = vpop.f32.mrf.mxu0  ;;  %v6674_v27 = vld [vmem:[#allocation21_spill] sm:$0xff]  ;;  %v6678_v59 = vld [vmem:[#allocation32_spill] sm:$0xff] }
 0x21c   : > { %v3692_v31 = vadd.f32 %v3691_v43, %v3661_v6  ;;  %v4948_v48 = vpop.f32.mrf.mxu1  ;;  %v3438_v13 = vadd.f32 %v6508_v58, %v3174_v40  ;;  %v6676_v50 = vld [vmem:[#allocation29_spill] sm:$0xff] }
 0x21d   : > { %4351 = vst [vmem:[%s5223_s30 + $0x30] sm:$0xff] %v4283_v17   ;;  %v3175_v38 = vadd.f32 %v4948_v48, %v2904_v47  ;;  %v3625_v53 = vadd.f32 %v3624_v2, %v3434_v0  ;;  %v3436_v28 = vadd.f32 %v3357_v4, %v3172_v54  ;;  %v3376_v60 = vpop.f32.mrf.mxu0  ;;  %v6675_v47 = vld [vmem:[#allocation9_spill] sm:$0xff] }
 0x21e   : > { %v3693_v52 = vadd.f32 %v3692_v31, %v3662_v3  ;;  %v3096_v51 = vpop.f32.mrf.mxu1  ;;  %v2651_v6 = vadd.f32 %v6676_v50, %v6675_v47  ;;  %v6677_v43 = vld [vmem:[#allocation13_spill] sm:$0xff]  ;;  %v3667_v23 = vmul.f32 %v3438_v13, %v3438_v13 }
 0x21f   : > { %v3439_v49 = vadd.f32 %v4996_v36, %v3175_v38  ;;  %v3173_v11 = vadd.f32 %v3096_v51, %v2902_v1  ;;  %v3626_v35 = vadd.f32 %v3625_v53, %v3435_v33  ;;  %v6538_v8 = vpop.f32.mrf.mxu0  ;;  %v3665_v58 = vmul.f32 %v3436_v28, %v3436_v28  ;;  %v6681_v53 = vld [vmem:[#allocation34_spill] sm:$0xff] }
 0x220   : > { %v3694_v7 = vadd.f32 %v3693_v52, %v3663_v63  ;;  %v4951_v56 = vpop.f32.mrf.mxu1  ;;  %v2654_v17 = vadd.f32 %v6678_v59, %v6677_v43  ;;  %v2909_v38 = vadd.f32 %v6679_v30, %v2651_v6  ;;  %v6680_v63 = vld [vmem:[#allocation14_spill] sm:$0xff] }
 0x221   : > { %v4298_v32 = vpack.c.bf16 %v3439_v49, %v3438_v13  ;;  %v3437_v4 = vadd.f32 %v3360_v14, %v3173_v11  ;;  %v3627_v26 = vadd.f32 %v3626_v35, %v3436_v28  ;;  %v3389_v0 = vpop.f32.mrf.mxu0  ;;  %v3178_v24 = vadd.f32 %v4951_v56, %v6673_v16  ;;  %v6689_v43 = vld [vmem:[#allocation30_spill] sm:$0xff] }
 0x222   : > { %v3695_v36 = vadd.f32 %v3694_v7, %v3664_v44  ;;  %v3109_v20 = vpop.f32.mrf.mxu1  ;;  %v2906_v14 = vadd.f32 %v6674_v27, %v2648_v12  ;;  %v3668_v22 = vmul.f32 %v3439_v49, %v3439_v49  ;;  %v2652_v52 = vadd.f32 %v6681_v53, %v6680_v63  ;;  %v6694_v53 = vld [vmem:[#allocation35_spill] sm:$0xff] }
 0x223   : > { %4354 = vst [vmem:[%s5223_s30 + $0x48] sm:$0xff] %v4298_v32   ;;  %v4293_v33 = vpack.c.bf16 %v3437_v4, %v3436_v28  ;;  %v3666_v57 = vmul.f32 %v3437_v4, %v3437_v4  ;;  %v3176_v19 = vadd.f32 %v3109_v20, %v2905_v34  ;;  %v3628_v18 = vadd.f32 %v3627_v26, %v3437_v4  ;;  %v5004_v46 = vpop.f32.mrf.mxu0  ;;  %v6684_v32 = vld [vmem:[#allocation28_spill] sm:$0xff] }
 0x224   : > { %v3696_v45 = vadd.f32 %v3695_v36, %v3665_v58  ;;  %v4952_v55 = vpop.f32.mrf.mxu1  ;;  %v3442_v48 = vadd.f32 %v6523_v39, %v3178_v24  ;;  %v2910_v4 = vadd.f32 %v6684_v32, %v2652_v52  ;;  %v6687_v26 = vld [vmem:[#allocation8_spill] sm:$0xff]  ;;  %v6688_v58 = vld [vmem:[#allocation38_spill] sm:$0xff] }
 0x225   : > { %4353 = vst [vmem:[%s5223_s30 + $0x40] sm:$0xff] %v4293_v33   ;;  %v3179_v3 = vadd.f32 %v4952_v55, %v2908_v9  ;;  %v3629_v40 = vadd.f32 %v3628_v18, %v3438_v13  ;;  %v3440_v31 = vadd.f32 %v3373_v61, %v3176_v19  ;;  %v3392_v15 = vpop.f32.mrf.mxu0  ;;  %v6682_v13 = vld [vmem:[#allocation26_spill] sm:$0xff]  ;;  %v2658_v36 = vadd.f32 %v6688_v58, %v6687_v26 }
 0x226   : > { %v3697_v54 = vadd.f32 %v3696_v45, %v3666_v57  ;;  %v3112_v2 = vpop.f32.mrf.mxu1  ;;  %v2912_v61 = vadd.f32 %v6682_v13, %v2654_v17  ;;  %v3671_v33 = vmul.f32 %v3442_v48, %v3442_v48  ;;  %v6690_v17 = vld [vmem:[#allocation16_spill] sm:$0xff] }
 0x227   : > { %v3443_v29 = vadd.f32 %v5000_v21, %v3179_v3  ;;  %v3177_v1 = vadd.f32 %v3112_v2, %v2906_v14  ;;  %v3630_v25 = vadd.f32 %v3629_v40, %v3439_v49  ;;  %v3669_v39 = vmul.f32 %v3440_v31, %v3440_v31  ;;  %v6683_v49 = vld [vmem:[#allocation31_spill] sm:$0xff]  ;;  %v5007_v12 = vpop.f32.mrf.mxu0 }
 0x228   : > { %v3698_v10 = vadd.f32 %v3697_v54, %v3667_v23  ;;  %v4955_v62 = vpop.f32.mrf.mxu1  ;;  %v6691_v3 = vld [vmem:[#allocation39_spill] sm:$0xff] }
 0x229   : > { %v4308_v28 = vpack.c.bf16 %v3443_v29, %v3442_v48  ;;  %v3441_v51 = vadd.f32 %v3376_v60, %v3177_v1  ;;  %v3631_v11 = vadd.f32 %v3630_v25, %v3440_v31  ;;  %v3182_v56 = vadd.f32 %v4955_v62, %v6683_v49  ;;  %v6685_v60 = vld [vmem:[#allocation15_spill] sm:$0xff]  ;;  %v3405_v6 = vpop.f32.mrf.mxu0 }
 0x22a   : > { %v3699_v21 = vadd.f32 %v3698_v10, %v3668_v22  ;;  %v3125_v44 = vpop.f32.mrf.mxu1  ;;  %v2655_v9 = vadd.f32 %v6686_v37, %v6685_v60  ;;  %v3672_v27 = vmul.f32 %v3443_v29, %v3443_v29  ;;  %v2656_v23 = vadd.f32 %v6691_v3, %v6690_v17 }
 0x22b   : > { %4356 = vst [vmem:[%s5223_s30 + $0x58] sm:$0xff] %v4308_v28   ;;  %v4303_v7 = vpack.c.bf16 %v3441_v51, %v3440_v31  ;;  %v3670_v35 = vmul.f32 %v3441_v51, %v3441_v51  ;;  %v3180_v41 = vadd.f32 %v3125_v44, %v2909_v38  ;;  %v3632_v5 = vadd.f32 %v3631_v11, %v3441_v51  ;;  %v6692_v31 = vld [vmem:[#allocation33_spill] sm:$0xff]  ;;  %v5008_v63 = vpop.f32.mrf.mxu0 }
 0x22c   : > { %v3700_v34 = vadd.f32 %v3699_v21, %v3669_v39  ;;  %v4956_v42 = vpop.f32.mrf.mxu1  ;;  %v3446_v45 = vadd.f32 %v6538_v8, %v3182_v56  ;;  %v2913_v59 = vadd.f32 %v6689_v43, %v2655_v9  ;;  %v2914_v52 = vadd.f32 %v6694_v53, %v2656_v23 }
 0x22d   : > { %4355 = vst [vmem:[%s5223_s30 + $0x50] sm:$0xff] %v4303_v7   ;;  %v3183_v20 = vadd.f32 %v4956_v42, %v2912_v61  ;;  %v3633_v57 = vadd.f32 %v3632_v5, %v3442_v48  ;;  %v3444_v24 = vadd.f32 %v3389_v0, %v3180_v41  ;;  %v2916_v0 = vadd.f32 %v6692_v31, %v2658_v36  ;;  %v3408_v56 = vpop.f32.mrf.mxu0 }
 0x22e   : > { %v3701_v16 = vadd.f32 %v3700_v34, %v3670_v35  ;;  %v3128_v19 = vpop.f32.mrf.mxu1  ;;  %v3675_v28 = vmul.f32 %v3446_v45, %v3446_v45 }
 0x22f   : > { %v3447_v18 = vadd.f32 %v5004_v46, %v3183_v20  ;;  %v3181_v55 = vadd.f32 %v3128_v19, %v2910_v4  ;;  %v3634_v47 = vadd.f32 %v3633_v57, %v3443_v29  ;;  %v3673_v8 = vmul.f32 %v3444_v24, %v3444_v24  ;;  %v6693_v29 = vld [vmem:[#allocation37_spill] sm:$0xff] }
 0x230   : > { %v3702_v14 = vadd.f32 %v3701_v16, %v3671_v33  ;;  %v4959_v50 = vpop.f32.mrf.mxu1 }
 0x231   : > { %v4318_v40 = vpack.c.bf16 %v3447_v18, %v3446_v45  ;;  %v3445_v54 = vadd.f32 %v3392_v15, %v3181_v55  ;;  %v3635_v2 = vadd.f32 %v3634_v47, %v3444_v24  ;;  %v3186_v10 = vadd.f32 %v4959_v50, %v6693_v29 }
 0x232   : > { %v3703_v46 = vadd.f32 %v3702_v14, %v3672_v27  ;;  %v3141_v48 = vpop.f32.mrf.mxu1  ;;  %v3676_v7 = vmul.f32 %v3447_v18, %v3447_v18 }
 0x233   : > { %4358 = vst [vmem:[%s5223_s30 + $0x68] sm:$0xff] %v4318_v40   ;;  %v4313_v1 = vpack.c.bf16 %v3445_v54, %v3444_v24  ;;  %v3674_v22 = vmul.f32 %v3445_v54, %v3445_v54  ;;  %v3184_v25 = vadd.f32 %v3141_v48, %v2913_v59  ;;  %v3636_v30 = vadd.f32 %v3635_v2, %v3445_v54 }
 0x234   : > { %v3704_v62 = vadd.f32 %v3703_v46, %v3673_v8  ;;  %v4960_v38 = vpop.f32.mrf.mxu1  ;;  %v3450_v39 = vadd.f32 %v5007_v12, %v3186_v10 }
 0x235   : > { %4357 = vst [vmem:[%s5223_s30 + $0x60] sm:$0xff] %v4313_v1   ;;  %v3187_v15 = vadd.f32 %v4960_v38, %v2916_v0  ;;  %v3637_v51 = vadd.f32 %v3636_v30, %v3446_v45  ;;  %v3448_v61 = vadd.f32 %v3405_v6, %v3184_v25 }
 0x236   : > { %v3705_v13 = vadd.f32 %v3704_v62, %v3674_v22  ;;  %v3144_v11 = vpop.f32.mrf.mxu1  ;;  %v3679_v26 = vmul.f32 %v3450_v39, %v3450_v39 }
 0x237   : > { %v3451_v21 = vadd.f32 %v5008_v63, %v3187_v15  ;;  %v3185_v44 = vadd.f32 %v3144_v11, %v2914_v52  ;;  %v3638_v49 = vadd.f32 %v3637_v51, %v3447_v18  ;;  %v3677_v42 = vmul.f32 %v3448_v61, %v3448_v61 }
 0x238   : > { %v3706_v35 = vadd.f32 %v3705_v13, %v3675_v28 }
 0x239   : > { %v4328_v41 = vpack.c.bf16 %v3451_v21, %v3450_v39  ;;  %v3449_v34 = vadd.f32 %v3408_v56, %v3185_v44  ;;  %v3639_v5 = vadd.f32 %v3638_v49, %v3448_v61  ;;  %v3680_v36 = vmul.f32 %v3451_v21, %v3451_v21 }
 0x23a   : > { %v3707_v32 = vadd.f32 %v3706_v35, %v3676_v7 }
 0x23b   : > { %4360 = vst [vmem:[%s5223_s30 + $0x78] sm:$0xff] %v4328_v41   ;;  %v4323_v4 = vpack.c.bf16 %v3449_v34, %v3448_v61  ;;  %v3678_v60 = vmul.f32 %v3449_v34, %v3449_v34  ;;  %v3640_v9 = vadd.f32 %v3639_v5, %v3449_v34 }
 0x23c   : > { %v3708_v37 = vadd.f32 %v3707_v32, %v3677_v42 }
 0x23d   : > { %4359 = vst [vmem:[%s5223_s30 + $0x70] sm:$0xff] %v4323_v4   ;;  %v3641_v12 = vadd.f32 %v3640_v9, %v3450_v39 }
 0x23e   : > { %v3709_v58 = vadd.f32 %v3708_v37, %v3678_v60 }
 0x23f   : > { %v3642_v20 = vadd.f32 %v3641_v12, %v3451_v21 }
 0x240   : > { %v3710_v33 = vadd.f32 %v3709_v58, %v3679_v26 }
 0x241   : > { %v3643_v57 = vrot.slane %v3642_v20, 4 }
 0x242   : > { %v3711_v16 = vadd.f32 %v3710_v33, %v3680_v36 }
 0x243   : > { %v3644_v24 = vadd.f32 %v3643_v57, %v3642_v20 }
 0x244   : > { %v3712_v19 = vrot.slane %v3711_v16, 4 }
 0x245   : > { %v3645_v45 = vrot.slane %v3644_v24, 2 }
 0x246   : > { %v3713_v18 = vadd.f32 %v3712_v19, %v3711_v16 }
 0x247   : > { %v3646_v55 = vadd.f32 %v3645_v45, %v3644_v24 }
 0x248   : > { %v3714_v27 = vrot.slane %v3713_v18, 2 }
 0x249   : > { %v3647_v14 = vrot.slane %v3646_v55, 1 }
 0x24a   : > { %v3715_v47 = vadd.f32 %v3714_v27, %v3713_v18 }
 0x24b   : > { %v3648_v6 = vadd.f32 %v3647_v14, %v3646_v55 }
 0x24c   : > { %v3716_v50 = vrot.slane %v3715_v47, 1 }
 0x24e   : > { %v3717_v43 = vadd.f32 %v3716_v50, %v3715_v47 }
 0x250   : > { %v3719_v59 = vsel %vm812_vm0, %v3648_v6, %v3717_v43 }
 0x251   : > { %3720 = vst [vmem:[%s5228_s8] sm:$0x3] %v3719_v59 }
 0x252 PF: > { %s16_s20 = sadd.s32 1, %s5148_s20   ;;  %s6695_s18 = smov %s5144_s19 }
 0x253   : > { %p13_p5 = scmp.ge.s32.totalorder %s16_s20, 4   ;;  %s6696_s19 = smov %s6698_s21 }
 0x255   :  { %15 = sbr.rel (!%p13_p5) target bundleno = 2 (0x2), region = 232 }
 0x25a   :  { %3773 = vsyncmov [#allocation3] }
 0x25d   :  { %s3774_s30 = vpop.sfrf %3773 }
 0x25e   :  { %p4148_p6 = scmp.ne.s32.totalorder %s3774_s30, 0 }
 0x260   :  { %3778 = shalt.err (%p4148_p6)  }
 0x261   :  { %3780 = vsyncmov [#allocation3 + $0x1] }
 0x264   :  { %s3781_s24 = vpop.sfrf %3780 }
 0x265   :  { %p4149_p7 = scmp.ne.s32.totalorder %s3781_s24, 0 }
 0x267   :  { %3785 = shalt.err (%p4149_p7)  }
 0x268   :  { %3787 = vsyncmov [#allocation3 + $0x2] }
 0x26b   :  { %s3788_s8 = vpop.sfrf %3787 }
 0x26c   :  { %p4150_p8 = scmp.ne.s32.totalorder %s3788_s8, 0 }
 0x26e   :  { %3792 = shalt.err (%p4150_p8)  }

</bundles_post_ra>
